<compile_context>
chip_gen: v5e
topology: v5e:2x2
jax: 0.10.0
libtpu: 0.0.40
codegen_flags: <defaults>
</compile_context>

<pallas_src>
import jax
import jax.numpy as jnp
from jax.experimental import pallas as pl
from jax.experimental.pallas import tpu as pltpu

F32 = jnp.float32
HI = jax.lax.Precision.HIGHEST

# ------------------------------------------------------------------ geometry
H = W = 14                      # size1 default of AttentionModule_stage3
HP, WP = H + 2, W + 2           # zero-padded canvas
P = HP * WP                     # 256 flattened canvas tokens (= 2 x 128 lanes)
HS = (H + 2 - 3) // 2 + 1       # 7: MaxPool2d(3, stride=2, pad=1) output
WS = (W + 2 - 3) // 2 + 1
NEG = -1e30                     # finite "-inf" for max-pool border masking

# 3x3 conv tap offsets in flattened canvas coordinates (row stride = WP).
TAP_OFFS = tuple((dy - 1) * WP + (dx - 1) for dy in range(3) for dx in range(3))


# --------------------------------------------------------------------------
# The fused Pallas kernel
# --------------------------------------------------------------------------

def _make_kernel(C, CM):
    def kernel(x_ref, bnc_ref, bncm_ref, w1_ref, w2_ref, w3_ref, wm_ref,
               selT_ref, interpT_ref, mfull_ref, msmall_ref, o_ref):
        # Hoist the mask broadcasts once (JAX does not CSE broadcast_in_dim).
        mfull = mfull_ref[...]                               # (1, P)
        msmall = msmall_ref[...]                             # (1, P)
        mfull_c = jnp.broadcast_to(mfull, (C, P))
        msmall_c = jnp.broadcast_to(msmall, (C, P))
        mfull_cm = jnp.broadcast_to(mfull, (CM, P))
        msmall_cm = jnp.broadcast_to(msmall, (CM, P))

        def shift(v, off):
            # out[:, p] = v[:, p + off]; wrap-around only touches border
            # columns, which are masked before/after every use.
            return v if off == 0 else pltpu.roll(v, (-off) % P, 1)

        def conv3x3(h, blk, cm_mask):
            # Zeroing the canvas border ring == the conv's zero padding.
            hz = h * cm_mask                                 # (CM, P)
            # Stack the 9 lane-shifted planes along the contraction axis and
            # run ONE matmul against the tap-fused (CM, 9*CM) weight.
            hstack = jnp.concatenate([shift(hz, off) for off in TAP_OFFS],
                                     axis=0)                 # (9*CM, P)
            return jnp.dot(w2_ref[blk], hstack,
                           preferred_element_type=F32)       # (CM, P)

        def residual_block(x, blk, cm_mask, c_mask):
            # pre-activation bottleneck: BN-ReLU-1x1, BN-ReLU-3x3, BN-ReLU-1x1, +x
            s1 = bnc_ref[:, 2 * blk:2 * blk + 1]             # (C, 1)
            b1 = bnc_ref[:, 2 * blk + 1:2 * blk + 2]
            h = jnp.maximum(x * s1 + b1, 0.0)
            h = jnp.dot(w1_ref[blk], h, preferred_element_type=F32)   # (CM, P)
            s2 = bncm_ref[:, 4 * blk + 0:4 * blk + 1]
            b2 = bncm_ref[:, 4 * blk + 1:4 * blk + 2]
            h = jnp.maximum(h * s2 + b2, 0.0)
            h = conv3x3(h, blk, cm_mask)
            s3 = bncm_ref[:, 4 * blk + 2:4 * blk + 3]
            b3 = bncm_ref[:, 4 * blk + 3:4 * blk + 4]
            h = jnp.maximum(h * s3 + b3, 0.0)
            h = jnp.dot(w3_ref[blk], h, preferred_element_type=F32)   # (C, P)
            # Re-mask the border so garbage never accumulates / overflows.
            return (h + x) * c_mask

        x = x_ref[0]                                          # (C, P)
        x = residual_block(x, 0, mfull_cm, mfull_c)           # first_residual_blocks
        trunk = residual_block(x, 1, mfull_cm, mfull_c)       # trunk_branches
        trunk = residual_block(trunk, 2, mfull_cm, mfull_c)

        # MaxPool2d(kernel=3, stride=2, pad=1): border -> NEG, stride-1 3x3
        # window max via lane rolls, then a constant decimation matmul lands
        # the stride-2 samples on the 7x7 sub-canvas.
        xneg = jnp.where(mfull_c > 0.0, x, NEG)
        wmax = xneg
        for off in TAP_OFFS:
            if off != 0:
                wmax = jnp.maximum(wmax, shift(xneg, off))
        small = jnp.dot(wmax, selT_ref[...], preferred_element_type=F32)  # (C, P)

        r1 = residual_block(small, 3, msmall_cm, msmall_c)    # residual1_blocks
        r1 = residual_block(r1, 4, msmall_cm, msmall_c)

        # UpsamplingBilinear2d(size=(14,14), align_corners=True) + trunk
        up = jnp.dot(r1, interpT_ref[...], preferred_element_type=F32)   # (C, P)
        u = up + trunk                                        # out_interp1

        # residual2_blocks: BN-ReLU-1x1-BN-ReLU-1x1-Sigmoid (soft mask)
        sa = bnc_ref[:, 12:13]
        ba = bnc_ref[:, 13:14]
        sb = bnc_ref[:, 14:15]
        bb = bnc_ref[:, 15:16]
        hm = jnp.maximum(u * sa + ba, 0.0)
        hm = jnp.dot(wm_ref[0], hm, preferred_element_type=F32)
        hm = jnp.maximum(hm * sb + bb, 0.0)
        hm = jnp.dot(wm_ref[1], hm, preferred_element_type=F32)
        soft = 0.5 * (jnp.tanh(0.5 * hm) + 1.0)               # stable sigmoid (EUP)

        out = residual_block((1.0 + soft) * trunk, 5, mfull_cm, mfull_c)  # last_blocks
        o_ref[0] = out

    return kernel


def _fused_forward(x_canvas, packed, consts):
    N, C, _ = x_canvas.shape
    CM = C // 4
    invariant2 = lambda n: (0, 0)
    invariant3 = lambda n: (0, 0, 0)
    return pl.pallas_call(
        _make_kernel(C, CM),
        out_shape=jax.ShapeDtypeStruct((N, C, P), F32),
        grid=(N,),
        in_specs=[
            pl.BlockSpec((1, C, P), lambda n: (n, 0, 0)),      # input canvas
            pl.BlockSpec((C, 16), invariant2),                 # BN scale/bias cols (C)
            pl.BlockSpec((CM, 24), invariant2),                # BN scale/bias cols (CM)
            pl.BlockSpec((6, CM, C), invariant3),              # 1x1 reduce weights
            pl.BlockSpec((6, CM, 9 * CM), invariant3),         # tap-fused 3x3 weights
            pl.BlockSpec((6, C, CM), invariant3),              # 1x1 expand weights
            pl.BlockSpec((2, C, C), invariant3),               # soft-mask 1x1 weights
            pl.BlockSpec((P, P), invariant2),                  # maxpool decimation (T)
            pl.BlockSpec((P, P), invariant2),                  # bilinear interp (T)
            pl.BlockSpec((1, P), invariant2),                  # 14x14 interior mask
            pl.BlockSpec((1, P), invariant2),                  # 7x7 interior mask
        ],
        out_specs=pl.BlockSpec((1, C, P), lambda n: (n, 0, 0)),
        compiler_params=pltpu.CompilerParams(
            dimension_semantics=("parallel",),
            vmem_limit_bytes=32 * 1024 * 1024),
    )(x_canvas, packed['bnc'], packed['bncm'], packed['w1'], packed['w2'],
      packed['w3'], packed['wm'], consts['selT'], consts['interpT'],
      consts['mask_full'], consts['mask_small'])


# --------------------------------------------------------------------------
# Host-side glue: canvas layout + constant matrices
# --------------------------------------------------------------------------

def attention_module_stage3(x_nchw, packed, consts):
    N, C, h, w = x_nchw.shape
    assert (h, w) == (H, W)
    x = jnp.pad(x_nchw.astype(F32), ((0, 0), (0, 0), (1, 1), (1, 1)))
    x = x.reshape(N, C, P)                                    # channels-first canvas
    out = _fused_forward(x, packed, consts)
    return out.reshape(N, C, HP, WP)[:, :, 1:1 + H, 1:1 + W]


def _interp_matrix_align_corners(out_size, in_size):
    """Row-interpolation matrix for UpsamplingBilinear2d (align_corners=True)."""
    o = jnp.arange(out_size, dtype=F32)
    src = o * (in_size - 1) / (out_size - 1)
    i0 = jnp.clip(jnp.floor(src).astype(jnp.int32), 0, in_size - 2)
    frac = src - i0.astype(F32)
    rows = jnp.arange(out_size)
    R = jnp.zeros((out_size, in_size), F32)
    R = R.at[rows, i0].add(1.0 - frac)
    R = R.at[rows, i0 + 1].add(frac)
    return R


def build_consts():
    idx = jnp.arange(P)
    yy, xx = idx // WP, idx % WP
    mask_full = ((yy >= 1) & (yy <= H) & (xx >= 1) & (xx <= W)
                 ).astype(F32).reshape(1, P)
    mask_small = ((yy >= 1) & (yy <= HS) & (xx >= 1) & (xx <= WS)
                  ).astype(F32).reshape(1, P)

    def cidx(r, c):            # unpadded coords -> flattened canvas position
        return (r + 1) * WP + (c + 1)

    # maxpool stride-2 decimation: small(:, q) = window_max(:, src); selT[src, q] = 1
    oy = jnp.repeat(jnp.arange(HS), WS)
    ox = jnp.tile(jnp.arange(WS), HS)
    selT = jnp.zeros((P, P), F32).at[
        (2 * oy + 1) * WP + (2 * ox + 1), cidx(oy, ox)].set(1.0)

    # bilinear upsample (align_corners=True): up(:, p) = sum_q r1(:, q) * interpT[q, p]
    Rh = _interp_matrix_align_corners(H, HS)
    Rw = _interp_matrix_align_corners(W, WS)
    kr = jnp.kron(Rh, Rw)                                     # (H*W, HS*WS)
    yo = jnp.repeat(jnp.arange(H), W)
    xo = jnp.tile(jnp.arange(W), H)
    yi = jnp.repeat(jnp.arange(HS), WS)
    xi = jnp.tile(jnp.arange(WS), HS)
    interpT = jnp.zeros((P, P), F32).at[
        cidx(yi, xi)[:, None], cidx(yo, xo)[None, :]].set(kr.T)

    return dict(selT=selT, interpT=interpT,
                mask_full=mask_full, mask_small=mask_small)


# --------------------------------------------------------------------------
# Deterministic parameter init (eval-mode BN folded into scale/bias) + packing
# --------------------------------------------------------------------------

def _init_bn(key, C):
    kg, kb, km, kv = jax.random.split(key, 4)
    gamma = jax.random.uniform(kg, (C,), F32, 0.5, 1.5)
    beta = 0.1 * jax.random.normal(kb, (C,), F32)
    mean = 0.1 * jax.random.normal(km, (C,), F32)
    var = jax.random.uniform(kv, (C,), F32, 0.5, 1.5)
    scale = gamma / jnp.sqrt(var + 1e-5)
    bias = beta - mean * scale
    return scale, bias


def _init_resblock(key, C):
    CM = C // 4
    ks = jax.random.split(key, 6)
    s1, b1 = _init_bn(ks[0], C)
    w1 = 0.1 * jax.random.normal(ks[1], (CM, C), F32)         # 1x1 reduce (out, in)
    s2, b2 = _init_bn(ks[2], CM)
    w2 = 0.1 * jax.random.normal(ks[3], (9, CM, CM), F32)     # 3x3 (tap, out, in)
    s3, b3 = _init_bn(ks[4], CM)
    w3 = 0.1 * jax.random.normal(ks[5], (C, CM), F32)         # 1x1 expand (out, in)
    return dict(s1=s1, b1=b1, w1=w1, s2=s2, b2=b2, w2=w2, s3=s3, b3=b3, w3=w3)


def _init_mask(key, C):
    ks = jax.random.split(key, 4)
    sa, ba = _init_bn(ks[0], C)
    wa = 0.1 * jax.random.normal(ks[1], (C, C), F32)
    sb, bb = _init_bn(ks[2], C)
    wb = 0.1 * jax.random.normal(ks[3], (C, C), F32)
    return dict(sa=sa, ba=ba, wa=wa, sb=sb, bb=bb, wb=wb)


_BLOCK_NAMES = ['first', 'trunk0', 'trunk1', 'res1_0', 'res1_1', 'last']


def init_params(key, C):
    ks = jax.random.split(key, len(_BLOCK_NAMES) + 1)
    params = {n: _init_resblock(k, C) for n, k in zip(_BLOCK_NAMES, ks[:-1])}
    params['mask'] = _init_mask(ks[-1], C)
    return params


def pack_params(params):
    CM_, C_ = params['first']['w1'].shape
    bnc_cols, bncm_cols, w1l, w2l, w3l = [], [], [], [], []
    for name in _BLOCK_NAMES:
        p = params[name]
        bnc_cols += [p['s1'], p['b1']]
        bncm_cols += [p['s2'], p['b2'], p['s3'], p['b3']]
        w1l.append(p['w1'])
        # fuse the 9 taps along the contraction axis -> (CM, 9*CM), tap-major cols
        w2l.append(jnp.transpose(p['w2'], (1, 0, 2)).reshape(CM_, 9 * CM_))
        w3l.append(p['w3'])
    mp = params['mask']
    bnc_cols += [mp['sa'], mp['ba'], mp['sb'], mp['bb']]
    return dict(
        bnc=jnp.stack(bnc_cols, axis=1),         # (C, 16)  column j = j-th BN vector
        bncm=jnp.stack(bncm_cols, axis=1),       # (CM, 24)
        w1=jnp.stack(w1l),                       # (6, CM, C)
        w2=jnp.stack(w2l),                       # (6, CM, 9*CM)
        w3=jnp.stack(w3l),                       # (6, C, CM)
        wm=jnp.stack([mp['wa'], mp['wb']]),      # (2, C, C)
    )


# --------------------------------------------------------------------------
# Pure-JAX reference (same math, no Pallas) for a correctness check
# --------------------------------------------------------------------------

def _ref_resblock(x, p):
    N, Hx, Wx, _ = x.shape
    a = jnp.maximum(x * p['s1'] + p['b1'], 0.0)
    h = jnp.einsum('nhwc,dc->nhwd', a, p['w1'], precision=HI)
    h = jnp.maximum(h * p['s2'] + p['b2'], 0.0)
    hp = jnp.pad(h, ((0, 0), (1, 1), (1, 1), (0, 0)))
    acc = jnp.zeros((N, Hx, Wx, p['w2'].shape[1]), F32)
    for dy in range(3):
        for dx in range(3):
            acc = acc + jnp.einsum('nhwc,dc->nhwd',
                                   hp[:, dy:dy + Hx, dx:dx + Wx, :],
                                   p['w2'][3 * dy + dx], precision=HI)
    h = jnp.maximum(acc * p['s3'] + p['b3'], 0.0)
    h = jnp.einsum('nhwc,dc->nhwd', h, p['w3'], precision=HI)
    return h + x


def _ref_maxpool(x):
    N, Hx, Wx, C = x.shape
    xp = jnp.pad(x, ((0, 0), (1, 1), (1, 1), (0, 0)), constant_values=-jnp.inf)
    acc = jnp.full((N, Hx, Wx, C), -jnp.inf, F32)
    for dy in range(3):
        for dx in range(3):
            acc = jnp.maximum(acc, xp[:, dy:dy + Hx, dx:dx + Wx, :])
    return acc[:, ::2, ::2, :]


def _ref_forward(x_nchw, params, Rh, Rw):
    x = jnp.transpose(x_nchw, (0, 2, 3, 1)).astype(F32)
    x = _ref_resblock(x, params['first'])
    trunk = _ref_resblock(_ref_resblock(x, params['trunk0']), params['trunk1'])
    r1 = _ref_resblock(_ref_resblock(_ref_maxpool(x), params['res1_0']),
                       params['res1_1'])
    up = jnp.einsum('oi,nijc->nojc', Rh, r1, precision=HI)
    up = jnp.einsum('pj,nojc->nopc', Rw, up, precision=HI)
    u = up + trunk
    mp = params['mask']
    h = jnp.maximum(u * mp['sa'] + mp['ba'], 0.0)
    h = jnp.einsum('nhwc,dc->nhwd', h, mp['wa'], precision=HI)
    h = jnp.maximum(h * mp['sb'] + mp['bb'], 0.0)
    h = jnp.einsum('nhwc,dc->nhwd', h, mp['wb'], precision=HI)
    soft = 0.5 * (jnp.tanh(0.5 * h) + 1.0)
    out = _ref_resblock((1.0 + soft) * trunk, params['last'])
    return jnp.transpose(out, (0, 3, 1, 2))


# --------------------------------------------------------------------------

if __name__ == "__main__":
    N, C = 2, 16                         # H = W = 14 (module default size1)
    key = jax.random.PRNGKey(0)
    kx, kp = jax.random.split(key)
    x = jax.random.normal(kx, (N, C, H, W), F32)

    params = init_params(kp, C)
    packed = pack_params(params)
    consts = build_consts()

    fwd = jax.jit(attention_module_stage3)
    out = jax.block_until_ready(fwd(x, packed, consts))
    assert out.shape == (N, C, H, W), out.shape

    Rh = _interp_matrix_align_corners(H, HS)
    Rw = _interp_matrix_align_corners(W, WS)
    ref = _ref_forward(x, params, Rh, Rw)
    err = float(jnp.max(jnp.abs(out - ref)))
    tol = 2e-3 * max(1.0, float(jnp.max(jnp.abs(ref))))
    assert err < tol, f"max abs err {err} (tol {tol})"
    print("KERNEL_OK")
</pallas_src>

<mosaic_0001>
module attributes {stable_mosaic.version = 11 : i64} {
  func.func @kernel(%arg0: i32, %arg1: memref<1x16x256xf32, #tpu.memory_space<vmem>>, %arg2: memref<16x16xf32, #tpu.memory_space<vmem>>, %arg3: memref<4x24xf32, #tpu.memory_space<vmem>>, %arg4: memref<6x4x16xf32, #tpu.memory_space<vmem>>, %arg5: memref<6x4x36xf32, #tpu.memory_space<vmem>>, %arg6: memref<6x16x4xf32, #tpu.memory_space<vmem>>, %arg7: memref<2x16x16xf32, #tpu.memory_space<vmem>>, %arg8: memref<256x256xf32, #tpu.memory_space<vmem>>, %arg9: memref<256x256xf32, #tpu.memory_space<vmem>>, %arg10: memref<1x256xf32, #tpu.memory_space<vmem>>, %arg11: memref<1x256xf32, #tpu.memory_space<vmem>>, %arg12: memref<1x16x256xf32, #tpu.memory_space<vmem>>) attributes {dimension_semantics = [#tpu.dimension_semantics<parallel>], iteration_bounds = array<i64: 2>, scalar_prefetch = 0 : i64, scratch_operands = 0 : i64, tpu.core_type = #tpu.core_type<tc>, window_params = [{transform_indices = @transform_0, window_bounds = array<i64: 1, 16, 256>}, {pipeline_mode = #tpu.pipeline_mode<synchronous>, transform_indices = @transform_1, window_bounds = array<i64: 16, 16>}, {pipeline_mode = #tpu.pipeline_mode<synchronous>, transform_indices = @transform_2, window_bounds = array<i64: 4, 24>}, {pipeline_mode = #tpu.pipeline_mode<synchronous>, transform_indices = @transform_3, window_bounds = array<i64: 6, 4, 16>}, {pipeline_mode = #tpu.pipeline_mode<synchronous>, transform_indices = @transform_4, window_bounds = array<i64: 6, 4, 36>}, {pipeline_mode = #tpu.pipeline_mode<synchronous>, transform_indices = @transform_5, window_bounds = array<i64: 6, 16, 4>}, {pipeline_mode = #tpu.pipeline_mode<synchronous>, transform_indices = @transform_6, window_bounds = array<i64: 2, 16, 16>}, {pipeline_mode = #tpu.pipeline_mode<synchronous>, transform_indices = @transform_7, window_bounds = array<i64: 256, 256>}, {pipeline_mode = #tpu.pipeline_mode<synchronous>, transform_indices = @transform_8, window_bounds = array<i64: 256, 256>}, {pipeline_mode = #tpu.pipeline_mode<synchronous>, transform_indices = @transform_9, window_bounds = array<i64: 1, 256>}, {pipeline_mode = #tpu.pipeline_mode<synchronous>, transform_indices = @transform_10, window_bounds = array<i64: 1, 256>}, {transform_indices = @transform_11, window_bounds = array<i64: 1, 16, 256>}]} {
    %c0 = arith.constant 0 : index
    %c0_0 = arith.constant 0 : index
    %0 = vector.load %arg10[%c0, %c0_0] : memref<1x256xf32, #tpu.memory_space<vmem>>, vector<1x256xf32>
    %c0_1 = arith.constant 0 : index
    %c0_2 = arith.constant 0 : index
    %1 = vector.load %arg11[%c0_1, %c0_2] : memref<1x256xf32, #tpu.memory_space<vmem>>, vector<1x256xf32>
    %2 = vector.shape_cast %0 : vector<1x256xf32> to vector<1x256xf32>
    %3 = vector.broadcast %2 : vector<1x256xf32> to vector<16x256xf32>
    %4 = vector.shape_cast %1 : vector<1x256xf32> to vector<1x256xf32>
    %5 = vector.broadcast %4 : vector<1x256xf32> to vector<16x256xf32>
    %6 = vector.shape_cast %0 : vector<1x256xf32> to vector<1x256xf32>
    %7 = vector.broadcast %6 : vector<1x256xf32> to vector<4x256xf32>
    %8 = vector.shape_cast %1 : vector<1x256xf32> to vector<1x256xf32>
    %9 = vector.broadcast %8 : vector<1x256xf32> to vector<4x256xf32>
    %c0_3 = arith.constant 0 : index
    %c0_4 = arith.constant 0 : index
    %c0_5 = arith.constant 0 : index
    %10 = vector.load %arg1[%c0_3, %c0_4, %c0_5] : memref<1x16x256xf32, #tpu.memory_space<vmem>>, vector<1x16x256xf32>
    %11 = vector.shape_cast %10 : vector<1x16x256xf32> to vector<16x256xf32>
    %c0_6 = arith.constant 0 : index
    %c0_7 = arith.constant 0 : index
    %12 = vector.load %arg2[%c0_6, %c0_7] : memref<16x16xf32, #tpu.memory_space<vmem>>, vector<16x1xf32>
    %c0_8 = arith.constant 0 : index
    %c1 = arith.constant 1 : index
    %13 = vector.load %arg2[%c0_8, %c1] : memref<16x16xf32, #tpu.memory_space<vmem>>, vector<16x1xf32>
    %14 = vector.broadcast %12 : vector<16x1xf32> to vector<16x256xf32>
    %15 = arith.mulf %11, %14 : vector<16x256xf32>
    %16 = vector.broadcast %13 : vector<16x1xf32> to vector<16x256xf32>
    %17 = arith.addf %15, %16 : vector<16x256xf32>
    %cst = arith.constant 0.000000e+00 : f32
    %18 = vector.broadcast %cst : f32 to vector<16x256xf32>
    %19 = arith.maximumf %17, %18 : vector<16x256xf32>
    %c0_9 = arith.constant 0 : index
    %c0_10 = arith.constant 0 : index
    %c0_11 = arith.constant 0 : index
    %20 = vector.load %arg4[%c0_9, %c0_10, %c0_11] : memref<6x4x16xf32, #tpu.memory_space<vmem>>, vector<1x4x16xf32>
    %21 = vector.shape_cast %20 : vector<1x4x16xf32> to vector<4x16xf32>
    %cst_12 = arith.constant dense<0.000000e+00> : vector<4x256xf32>
    %22 = tpu.matmul %21, %19, %cst_12 {dimension_numbers = #tpu.dot_dimension_numbers<[1], [0], [0], [1], [0, 0, 1, 1], [], []>} : vector<4x16xf32>, vector<16x256xf32>, vector<4x256xf32> -> vector<4x256xf32>
    %c0_13 = arith.constant 0 : index
    %c0_14 = arith.constant 0 : index
    %23 = vector.load %arg3[%c0_13, %c0_14] : memref<4x24xf32, #tpu.memory_space<vmem>>, vector<4x1xf32>
    %c0_15 = arith.constant 0 : index
    %c1_16 = arith.constant 1 : index
    %24 = vector.load %arg3[%c0_15, %c1_16] : memref<4x24xf32, #tpu.memory_space<vmem>>, vector<4x1xf32>
    %25 = vector.broadcast %23 : vector<4x1xf32> to vector<4x256xf32>
    %26 = arith.mulf %22, %25 : vector<4x256xf32>
    %27 = vector.broadcast %24 : vector<4x1xf32> to vector<4x256xf32>
    %28 = arith.addf %26, %27 : vector<4x256xf32>
    %cst_17 = arith.constant 0.000000e+00 : f32
    %29 = vector.broadcast %cst_17 : f32 to vector<4x256xf32>
    %30 = arith.maximumf %28, %29 : vector<4x256xf32>
    %31 = arith.mulf %30, %7 : vector<4x256xf32>
    %c17_i32 = arith.constant 17 : i32
    %32 = tpu.dynamic_rotate %31 by %c17_i32 dim 1 : vector<4x256xf32>, i32 -> vector<4x256xf32>
    %c16_i32 = arith.constant 16 : i32
    %33 = tpu.dynamic_rotate %31 by %c16_i32 dim 1 : vector<4x256xf32>, i32 -> vector<4x256xf32>
    %c15_i32 = arith.constant 15 : i32
    %34 = tpu.dynamic_rotate %31 by %c15_i32 dim 1 : vector<4x256xf32>, i32 -> vector<4x256xf32>
    %c1_i32 = arith.constant 1 : i32
    %35 = tpu.dynamic_rotate %31 by %c1_i32 dim 1 : vector<4x256xf32>, i32 -> vector<4x256xf32>
    %c255_i32 = arith.constant 255 : i32
    %36 = tpu.dynamic_rotate %31 by %c255_i32 dim 1 : vector<4x256xf32>, i32 -> vector<4x256xf32>
    %c241_i32 = arith.constant 241 : i32
    %37 = tpu.dynamic_rotate %31 by %c241_i32 dim 1 : vector<4x256xf32>, i32 -> vector<4x256xf32>
    %c240_i32 = arith.constant 240 : i32
    %38 = tpu.dynamic_rotate %31 by %c240_i32 dim 1 : vector<4x256xf32>, i32 -> vector<4x256xf32>
    %c239_i32 = arith.constant 239 : i32
    %39 = tpu.dynamic_rotate %31 by %c239_i32 dim 1 : vector<4x256xf32>, i32 -> vector<4x256xf32>
    %40 = tpu.concatenate %32, %33, %34, %35, %31, %36, %37, %38, %39 in 0 : vector<4x256xf32>, vector<4x256xf32>, vector<4x256xf32>, vector<4x256xf32>, vector<4x256xf32>, vector<4x256xf32>, vector<4x256xf32>, vector<4x256xf32>, vector<4x256xf32> -> vector<36x256xf32>
    %c0_18 = arith.constant 0 : index
    %c0_19 = arith.constant 0 : index
    %c0_20 = arith.constant 0 : index
    %41 = vector.load %arg5[%c0_18, %c0_19, %c0_20] : memref<6x4x36xf32, #tpu.memory_space<vmem>>, vector<1x4x36xf32>
    %42 = vector.shape_cast %41 : vector<1x4x36xf32> to vector<4x36xf32>
    %cst_21 = arith.constant dense<0.000000e+00> : vector<4x256xf32>
    %43 = tpu.matmul %42, %40, %cst_21 {dimension_numbers = #tpu.dot_dimension_numbers<[1], [0], [0], [1], [0, 0, 1, 1], [], []>} : vector<4x36xf32>, vector<36x256xf32>, vector<4x256xf32> -> vector<4x256xf32>
    %c0_22 = arith.constant 0 : index
    %c2 = arith.constant 2 : index
    %44 = vector.load %arg3[%c0_22, %c2] : memref<4x24xf32, #tpu.memory_space<vmem>>, vector<4x1xf32>
    %c0_23 = arith.constant 0 : index
    %c3 = arith.constant 3 : index
    %45 = vector.load %arg3[%c0_23, %c3] : memref<4x24xf32, #tpu.memory_space<vmem>>, vector<4x1xf32>
    %46 = vector.broadcast %44 : vector<4x1xf32> to vector<4x256xf32>
    %47 = arith.mulf %43, %46 : vector<4x256xf32>
    %48 = vector.broadcast %45 : vector<4x1xf32> to vector<4x256xf32>
    %49 = arith.addf %47, %48 : vector<4x256xf32>
    %cst_24 = arith.constant 0.000000e+00 : f32
    %50 = vector.broadcast %cst_24 : f32 to vector<4x256xf32>
    %51 = arith.maximumf %49, %50 : vector<4x256xf32>
    %c0_25 = arith.constant 0 : index
    %c0_26 = arith.constant 0 : index
    %c0_27 = arith.constant 0 : index
    %52 = vector.load %arg6[%c0_25, %c0_26, %c0_27] : memref<6x16x4xf32, #tpu.memory_space<vmem>>, vector<1x16x4xf32>
    %53 = vector.shape_cast %52 : vector<1x16x4xf32> to vector<16x4xf32>
    %cst_28 = arith.constant dense<0.000000e+00> : vector<16x256xf32>
    %54 = tpu.matmul %53, %51, %cst_28 {dimension_numbers = #tpu.dot_dimension_numbers<[1], [0], [0], [1], [0, 0, 1, 1], [], []>} : vector<16x4xf32>, vector<4x256xf32>, vector<16x256xf32> -> vector<16x256xf32>
    %55 = arith.addf %54, %11 : vector<16x256xf32>
    %56 = arith.mulf %55, %3 : vector<16x256xf32>
    %c0_29 = arith.constant 0 : index
    %c2_30 = arith.constant 2 : index
    %57 = vector.load %arg2[%c0_29, %c2_30] : memref<16x16xf32, #tpu.memory_space<vmem>>, vector<16x1xf32>
    %c0_31 = arith.constant 0 : index
    %c3_32 = arith.constant 3 : index
    %58 = vector.load %arg2[%c0_31, %c3_32] : memref<16x16xf32, #tpu.memory_space<vmem>>, vector<16x1xf32>
    %59 = vector.broadcast %57 : vector<16x1xf32> to vector<16x256xf32>
    %60 = arith.mulf %56, %59 : vector<16x256xf32>
    %61 = vector.broadcast %58 : vector<16x1xf32> to vector<16x256xf32>
    %62 = arith.addf %60, %61 : vector<16x256xf32>
    %cst_33 = arith.constant 0.000000e+00 : f32
    %63 = vector.broadcast %cst_33 : f32 to vector<16x256xf32>
    %64 = arith.maximumf %62, %63 : vector<16x256xf32>
    %c1_34 = arith.constant 1 : index
    %c0_35 = arith.constant 0 : index
    %c0_36 = arith.constant 0 : index
    %65 = vector.load %arg4[%c1_34, %c0_35, %c0_36] : memref<6x4x16xf32, #tpu.memory_space<vmem>>, vector<1x4x16xf32>
    %66 = vector.shape_cast %65 : vector<1x4x16xf32> to vector<4x16xf32>
    %cst_37 = arith.constant dense<0.000000e+00> : vector<4x256xf32>
    %67 = tpu.matmul %66, %64, %cst_37 {dimension_numbers = #tpu.dot_dimension_numbers<[1], [0], [0], [1], [0, 0, 1, 1], [], []>} : vector<4x16xf32>, vector<16x256xf32>, vector<4x256xf32> -> vector<4x256xf32>
    %c0_38 = arith.constant 0 : index
    %c4 = arith.constant 4 : index
    %68 = vector.load %arg3[%c0_38, %c4] : memref<4x24xf32, #tpu.memory_space<vmem>>, vector<4x1xf32>
    %c0_39 = arith.constant 0 : index
    %c5 = arith.constant 5 : index
    %69 = vector.load %arg3[%c0_39, %c5] : memref<4x24xf32, #tpu.memory_space<vmem>>, vector<4x1xf32>
    %70 = vector.broadcast %68 : vector<4x1xf32> to vector<4x256xf32>
    %71 = arith.mulf %67, %70 : vector<4x256xf32>
    %72 = vector.broadcast %69 : vector<4x1xf32> to vector<4x256xf32>
    %73 = arith.addf %71, %72 : vector<4x256xf32>
    %cst_40 = arith.constant 0.000000e+00 : f32
    %74 = vector.broadcast %cst_40 : f32 to vector<4x256xf32>
    %75 = arith.maximumf %73, %74 : vector<4x256xf32>
    %76 = arith.mulf %75, %7 : vector<4x256xf32>
    %c17_i32_41 = arith.constant 17 : i32
    %77 = tpu.dynamic_rotate %76 by %c17_i32_41 dim 1 : vector<4x256xf32>, i32 -> vector<4x256xf32>
    %c16_i32_42 = arith.constant 16 : i32
    %78 = tpu.dynamic_rotate %76 by %c16_i32_42 dim 1 : vector<4x256xf32>, i32 -> vector<4x256xf32>
    %c15_i32_43 = arith.constant 15 : i32
    %79 = tpu.dynamic_rotate %76 by %c15_i32_43 dim 1 : vector<4x256xf32>, i32 -> vector<4x256xf32>
    %c1_i32_44 = arith.constant 1 : i32
    %80 = tpu.dynamic_rotate %76 by %c1_i32_44 dim 1 : vector<4x256xf32>, i32 -> vector<4x256xf32>
    %c255_i32_45 = arith.constant 255 : i32
    %81 = tpu.dynamic_rotate %76 by %c255_i32_45 dim 1 : vector<4x256xf32>, i32 -> vector<4x256xf32>
    %c241_i32_46 = arith.constant 241 : i32
    %82 = tpu.dynamic_rotate %76 by %c241_i32_46 dim 1 : vector<4x256xf32>, i32 -> vector<4x256xf32>
    %c240_i32_47 = arith.constant 240 : i32
    %83 = tpu.dynamic_rotate %76 by %c240_i32_47 dim 1 : vector<4x256xf32>, i32 -> vector<4x256xf32>
    %c239_i32_48 = arith.constant 239 : i32
    %84 = tpu.dynamic_rotate %76 by %c239_i32_48 dim 1 : vector<4x256xf32>, i32 -> vector<4x256xf32>
    %85 = tpu.concatenate %77, %78, %79, %80, %76, %81, %82, %83, %84 in 0 : vector<4x256xf32>, vector<4x256xf32>, vector<4x256xf32>, vector<4x256xf32>, vector<4x256xf32>, vector<4x256xf32>, vector<4x256xf32>, vector<4x256xf32>, vector<4x256xf32> -> vector<36x256xf32>
    %c1_49 = arith.constant 1 : index
    %c0_50 = arith.constant 0 : index
    %c0_51 = arith.constant 0 : index
    %86 = vector.load %arg5[%c1_49, %c0_50, %c0_51] : memref<6x4x36xf32, #tpu.memory_space<vmem>>, vector<1x4x36xf32>
    %87 = vector.shape_cast %86 : vector<1x4x36xf32> to vector<4x36xf32>
    %cst_52 = arith.constant dense<0.000000e+00> : vector<4x256xf32>
    %88 = tpu.matmul %87, %85, %cst_52 {dimension_numbers = #tpu.dot_dimension_numbers<[1], [0], [0], [1], [0, 0, 1, 1], [], []>} : vector<4x36xf32>, vector<36x256xf32>, vector<4x256xf32> -> vector<4x256xf32>
    %c0_53 = arith.constant 0 : index
    %c6 = arith.constant 6 : index
    %89 = vector.load %arg3[%c0_53, %c6] : memref<4x24xf32, #tpu.memory_space<vmem>>, vector<4x1xf32>
    %c0_54 = arith.constant 0 : index
    %c7 = arith.constant 7 : index
    %90 = vector.load %arg3[%c0_54, %c7] : memref<4x24xf32, #tpu.memory_space<vmem>>, vector<4x1xf32>
    %91 = vector.broadcast %89 : vector<4x1xf32> to vector<4x256xf32>
    %92 = arith.mulf %88, %91 : vector<4x256xf32>
    %93 = vector.broadcast %90 : vector<4x1xf32> to vector<4x256xf32>
    %94 = arith.addf %92, %93 : vector<4x256xf32>
    %cst_55 = arith.constant 0.000000e+00 : f32
    %95 = vector.broadcast %cst_55 : f32 to vector<4x256xf32>
    %96 = arith.maximumf %94, %95 : vector<4x256xf32>
    %c1_56 = arith.constant 1 : index
    %c0_57 = arith.constant 0 : index
    %c0_58 = arith.constant 0 : index
    %97 = vector.load %arg6[%c1_56, %c0_57, %c0_58] : memref<6x16x4xf32, #tpu.memory_space<vmem>>, vector<1x16x4xf32>
    %98 = vector.shape_cast %97 : vector<1x16x4xf32> to vector<16x4xf32>
    %cst_59 = arith.constant dense<0.000000e+00> : vector<16x256xf32>
    %99 = tpu.matmul %98, %96, %cst_59 {dimension_numbers = #tpu.dot_dimension_numbers<[1], [0], [0], [1], [0, 0, 1, 1], [], []>} : vector<16x4xf32>, vector<4x256xf32>, vector<16x256xf32> -> vector<16x256xf32>
    %100 = arith.addf %99, %56 : vector<16x256xf32>
    %101 = arith.mulf %100, %3 : vector<16x256xf32>
    %c0_60 = arith.constant 0 : index
    %c4_61 = arith.constant 4 : index
    %102 = vector.load %arg2[%c0_60, %c4_61] : memref<16x16xf32, #tpu.memory_space<vmem>>, vector<16x1xf32>
    %c0_62 = arith.constant 0 : index
    %c5_63 = arith.constant 5 : index
    %103 = vector.load %arg2[%c0_62, %c5_63] : memref<16x16xf32, #tpu.memory_space<vmem>>, vector<16x1xf32>
    %104 = vector.broadcast %102 : vector<16x1xf32> to vector<16x256xf32>
    %105 = arith.mulf %101, %104 : vector<16x256xf32>
    %106 = vector.broadcast %103 : vector<16x1xf32> to vector<16x256xf32>
    %107 = arith.addf %105, %106 : vector<16x256xf32>
    %cst_64 = arith.constant 0.000000e+00 : f32
    %108 = vector.broadcast %cst_64 : f32 to vector<16x256xf32>
    %109 = arith.maximumf %107, %108 : vector<16x256xf32>
    %c2_65 = arith.constant 2 : index
    %c0_66 = arith.constant 0 : index
    %c0_67 = arith.constant 0 : index
    %110 = vector.load %arg4[%c2_65, %c0_66, %c0_67] : memref<6x4x16xf32, #tpu.memory_space<vmem>>, vector<1x4x16xf32>
    %111 = vector.shape_cast %110 : vector<1x4x16xf32> to vector<4x16xf32>
    %cst_68 = arith.constant dense<0.000000e+00> : vector<4x256xf32>
    %112 = tpu.matmul %111, %109, %cst_68 {dimension_numbers = #tpu.dot_dimension_numbers<[1], [0], [0], [1], [0, 0, 1, 1], [], []>} : vector<4x16xf32>, vector<16x256xf32>, vector<4x256xf32> -> vector<4x256xf32>
    %c0_69 = arith.constant 0 : index
    %c8 = arith.constant 8 : index
    %113 = vector.load %arg3[%c0_69, %c8] : memref<4x24xf32, #tpu.memory_space<vmem>>, vector<4x1xf32>
    %c0_70 = arith.constant 0 : index
    %c9 = arith.constant 9 : index
    %114 = vector.load %arg3[%c0_70, %c9] : memref<4x24xf32, #tpu.memory_space<vmem>>, vector<4x1xf32>
    %115 = vector.broadcast %113 : vector<4x1xf32> to vector<4x256xf32>
    %116 = arith.mulf %112, %115 : vector<4x256xf32>
    %117 = vector.broadcast %114 : vector<4x1xf32> to vector<4x256xf32>
    %118 = arith.addf %116, %117 : vector<4x256xf32>
    %cst_71 = arith.constant 0.000000e+00 : f32
    %119 = vector.broadcast %cst_71 : f32 to vector<4x256xf32>
    %120 = arith.maximumf %118, %119 : vector<4x256xf32>
    %121 = arith.mulf %120, %7 : vector<4x256xf32>
    %c17_i32_72 = arith.constant 17 : i32
    %122 = tpu.dynamic_rotate %121 by %c17_i32_72 dim 1 : vector<4x256xf32>, i32 -> vector<4x256xf32>
    %c16_i32_73 = arith.constant 16 : i32
    %123 = tpu.dynamic_rotate %121 by %c16_i32_73 dim 1 : vector<4x256xf32>, i32 -> vector<4x256xf32>
    %c15_i32_74 = arith.constant 15 : i32
    %124 = tpu.dynamic_rotate %121 by %c15_i32_74 dim 1 : vector<4x256xf32>, i32 -> vector<4x256xf32>
    %c1_i32_75 = arith.constant 1 : i32
    %125 = tpu.dynamic_rotate %121 by %c1_i32_75 dim 1 : vector<4x256xf32>, i32 -> vector<4x256xf32>
    %c255_i32_76 = arith.constant 255 : i32
    %126 = tpu.dynamic_rotate %121 by %c255_i32_76 dim 1 : vector<4x256xf32>, i32 -> vector<4x256xf32>
    %c241_i32_77 = arith.constant 241 : i32
    %127 = tpu.dynamic_rotate %121 by %c241_i32_77 dim 1 : vector<4x256xf32>, i32 -> vector<4x256xf32>
    %c240_i32_78 = arith.constant 240 : i32
    %128 = tpu.dynamic_rotate %121 by %c240_i32_78 dim 1 : vector<4x256xf32>, i32 -> vector<4x256xf32>
    %c239_i32_79 = arith.constant 239 : i32
    %129 = tpu.dynamic_rotate %121 by %c239_i32_79 dim 1 : vector<4x256xf32>, i32 -> vector<4x256xf32>
    %130 = tpu.concatenate %122, %123, %124, %125, %121, %126, %127, %128, %129 in 0 : vector<4x256xf32>, vector<4x256xf32>, vector<4x256xf32>, vector<4x256xf32>, vector<4x256xf32>, vector<4x256xf32>, vector<4x256xf32>, vector<4x256xf32>, vector<4x256xf32> -> vector<36x256xf32>
    %c2_80 = arith.constant 2 : index
    %c0_81 = arith.constant 0 : index
    %c0_82 = arith.constant 0 : index
    %131 = vector.load %arg5[%c2_80, %c0_81, %c0_82] : memref<6x4x36xf32, #tpu.memory_space<vmem>>, vector<1x4x36xf32>
    %132 = vector.shape_cast %131 : vector<1x4x36xf32> to vector<4x36xf32>
    %cst_83 = arith.constant dense<0.000000e+00> : vector<4x256xf32>
    %133 = tpu.matmul %132, %130, %cst_83 {dimension_numbers = #tpu.dot_dimension_numbers<[1], [0], [0], [1], [0, 0, 1, 1], [], []>} : vector<4x36xf32>, vector<36x256xf32>, vector<4x256xf32> -> vector<4x256xf32>
    %c0_84 = arith.constant 0 : index
    %c10 = arith.constant 10 : index
    %134 = vector.load %arg3[%c0_84, %c10] : memref<4x24xf32, #tpu.memory_space<vmem>>, vector<4x1xf32>
    %c0_85 = arith.constant 0 : index
    %c11 = arith.constant 11 : index
    %135 = vector.load %arg3[%c0_85, %c11] : memref<4x24xf32, #tpu.memory_space<vmem>>, vector<4x1xf32>
    %136 = vector.broadcast %134 : vector<4x1xf32> to vector<4x256xf32>
    %137 = arith.mulf %133, %136 : vector<4x256xf32>
    %138 = vector.broadcast %135 : vector<4x1xf32> to vector<4x256xf32>
    %139 = arith.addf %137, %138 : vector<4x256xf32>
    %cst_86 = arith.constant 0.000000e+00 : f32
    %140 = vector.broadcast %cst_86 : f32 to vector<4x256xf32>
    %141 = arith.maximumf %139, %140 : vector<4x256xf32>
    %c2_87 = arith.constant 2 : index
    %c0_88 = arith.constant 0 : index
    %c0_89 = arith.constant 0 : index
    %142 = vector.load %arg6[%c2_87, %c0_88, %c0_89] : memref<6x16x4xf32, #tpu.memory_space<vmem>>, vector<1x16x4xf32>
    %143 = vector.shape_cast %142 : vector<1x16x4xf32> to vector<16x4xf32>
    %cst_90 = arith.constant dense<0.000000e+00> : vector<16x256xf32>
    %144 = tpu.matmul %143, %141, %cst_90 {dimension_numbers = #tpu.dot_dimension_numbers<[1], [0], [0], [1], [0, 0, 1, 1], [], []>} : vector<16x4xf32>, vector<4x256xf32>, vector<16x256xf32> -> vector<16x256xf32>
    %145 = arith.addf %144, %101 : vector<16x256xf32>
    %146 = arith.mulf %145, %3 : vector<16x256xf32>
    %cst_91 = arith.constant 0.000000e+00 : f32
    %147 = vector.broadcast %cst_91 : f32 to vector<16x256xf32>
    %148 = arith.cmpf ogt, %3, %147 : vector<16x256xf32>
    %cst_92 = arith.constant -1.000000e+30 : f32
    %149 = vector.broadcast %cst_92 : f32 to vector<16x256xf32>
    %150 = arith.select %148, %56, %149 : vector<16x256xi1>, vector<16x256xf32>
    %c17_i32_93 = arith.constant 17 : i32
    %151 = tpu.dynamic_rotate %150 by %c17_i32_93 dim 1 : vector<16x256xf32>, i32 -> vector<16x256xf32>
    %152 = arith.maximumf %150, %151 : vector<16x256xf32>
    %c16_i32_94 = arith.constant 16 : i32
    %153 = tpu.dynamic_rotate %150 by %c16_i32_94 dim 1 : vector<16x256xf32>, i32 -> vector<16x256xf32>
    %154 = arith.maximumf %152, %153 : vector<16x256xf32>
    %c15_i32_95 = arith.constant 15 : i32
    %155 = tpu.dynamic_rotate %150 by %c15_i32_95 dim 1 : vector<16x256xf32>, i32 -> vector<16x256xf32>
    %156 = arith.maximumf %154, %155 : vector<16x256xf32>
    %c1_i32_96 = arith.constant 1 : i32
    %157 = tpu.dynamic_rotate %150 by %c1_i32_96 dim 1 : vector<16x256xf32>, i32 -> vector<16x256xf32>
    %158 = arith.maximumf %156, %157 : vector<16x256xf32>
    %c255_i32_97 = arith.constant 255 : i32
    %159 = tpu.dynamic_rotate %150 by %c255_i32_97 dim 1 : vector<16x256xf32>, i32 -> vector<16x256xf32>
    %160 = arith.maximumf %158, %159 : vector<16x256xf32>
    %c241_i32_98 = arith.constant 241 : i32
    %161 = tpu.dynamic_rotate %150 by %c241_i32_98 dim 1 : vector<16x256xf32>, i32 -> vector<16x256xf32>
    %162 = arith.maximumf %160, %161 : vector<16x256xf32>
    %c240_i32_99 = arith.constant 240 : i32
    %163 = tpu.dynamic_rotate %150 by %c240_i32_99 dim 1 : vector<16x256xf32>, i32 -> vector<16x256xf32>
    %164 = arith.maximumf %162, %163 : vector<16x256xf32>
    %c239_i32_100 = arith.constant 239 : i32
    %165 = tpu.dynamic_rotate %150 by %c239_i32_100 dim 1 : vector<16x256xf32>, i32 -> vector<16x256xf32>
    %166 = arith.maximumf %164, %165 : vector<16x256xf32>
    %c0_101 = arith.constant 0 : index
    %c0_102 = arith.constant 0 : index
    %167 = vector.load %arg8[%c0_101, %c0_102] : memref<256x256xf32, #tpu.memory_space<vmem>>, vector<256x256xf32>
    %cst_103 = arith.constant dense<0.000000e+00> : vector<16x256xf32>
    %168 = tpu.matmul %166, %167, %cst_103 {dimension_numbers = #tpu.dot_dimension_numbers<[1], [0], [0], [1], [0, 0, 1, 1], [], []>} : vector<16x256xf32>, vector<256x256xf32>, vector<16x256xf32> -> vector<16x256xf32>
    %c0_104 = arith.constant 0 : index
    %c6_105 = arith.constant 6 : index
    %169 = vector.load %arg2[%c0_104, %c6_105] : memref<16x16xf32, #tpu.memory_space<vmem>>, vector<16x1xf32>
    %c0_106 = arith.constant 0 : index
    %c7_107 = arith.constant 7 : index
    %170 = vector.load %arg2[%c0_106, %c7_107] : memref<16x16xf32, #tpu.memory_space<vmem>>, vector<16x1xf32>
    %171 = vector.broadcast %169 : vector<16x1xf32> to vector<16x256xf32>
    %172 = arith.mulf %168, %171 : vector<16x256xf32>
    %173 = vector.broadcast %170 : vector<16x1xf32> to vector<16x256xf32>
    %174 = arith.addf %172, %173 : vector<16x256xf32>
    %cst_108 = arith.constant 0.000000e+00 : f32
    %175 = vector.broadcast %cst_108 : f32 to vector<16x256xf32>
    %176 = arith.maximumf %174, %175 : vector<16x256xf32>
    %c3_109 = arith.constant 3 : index
    %c0_110 = arith.constant 0 : index
    %c0_111 = arith.constant 0 : index
    %177 = vector.load %arg4[%c3_109, %c0_110, %c0_111] : memref<6x4x16xf32, #tpu.memory_space<vmem>>, vector<1x4x16xf32>
    %178 = vector.shape_cast %177 : vector<1x4x16xf32> to vector<4x16xf32>
    %cst_112 = arith.constant dense<0.000000e+00> : vector<4x256xf32>
    %179 = tpu.matmul %178, %176, %cst_112 {dimension_numbers = #tpu.dot_dimension_numbers<[1], [0], [0], [1], [0, 0, 1, 1], [], []>} : vector<4x16xf32>, vector<16x256xf32>, vector<4x256xf32> -> vector<4x256xf32>
    %c0_113 = arith.constant 0 : index
    %c12 = arith.constant 12 : index
    %180 = vector.load %arg3[%c0_113, %c12] : memref<4x24xf32, #tpu.memory_space<vmem>>, vector<4x1xf32>
    %c0_114 = arith.constant 0 : index
    %c13 = arith.constant 13 : index
    %181 = vector.load %arg3[%c0_114, %c13] : memref<4x24xf32, #tpu.memory_space<vmem>>, vector<4x1xf32>
    %182 = vector.broadcast %180 : vector<4x1xf32> to vector<4x256xf32>
    %183 = arith.mulf %179, %182 : vector<4x256xf32>
    %184 = vector.broadcast %181 : vector<4x1xf32> to vector<4x256xf32>
    %185 = arith.addf %183, %184 : vector<4x256xf32>
    %cst_115 = arith.constant 0.000000e+00 : f32
    %186 = vector.broadcast %cst_115 : f32 to vector<4x256xf32>
    %187 = arith.maximumf %185, %186 : vector<4x256xf32>
    %188 = arith.mulf %187, %9 : vector<4x256xf32>
    %c17_i32_116 = arith.constant 17 : i32
    %189 = tpu.dynamic_rotate %188 by %c17_i32_116 dim 1 : vector<4x256xf32>, i32 -> vector<4x256xf32>
    %c16_i32_117 = arith.constant 16 : i32
    %190 = tpu.dynamic_rotate %188 by %c16_i32_117 dim 1 : vector<4x256xf32>, i32 -> vector<4x256xf32>
    %c15_i32_118 = arith.constant 15 : i32
    %191 = tpu.dynamic_rotate %188 by %c15_i32_118 dim 1 : vector<4x256xf32>, i32 -> vector<4x256xf32>
    %c1_i32_119 = arith.constant 1 : i32
    %192 = tpu.dynamic_rotate %188 by %c1_i32_119 dim 1 : vector<4x256xf32>, i32 -> vector<4x256xf32>
    %c255_i32_120 = arith.constant 255 : i32
    %193 = tpu.dynamic_rotate %188 by %c255_i32_120 dim 1 : vector<4x256xf32>, i32 -> vector<4x256xf32>
    %c241_i32_121 = arith.constant 241 : i32
    %194 = tpu.dynamic_rotate %188 by %c241_i32_121 dim 1 : vector<4x256xf32>, i32 -> vector<4x256xf32>
    %c240_i32_122 = arith.constant 240 : i32
    %195 = tpu.dynamic_rotate %188 by %c240_i32_122 dim 1 : vector<4x256xf32>, i32 -> vector<4x256xf32>
    %c239_i32_123 = arith.constant 239 : i32
    %196 = tpu.dynamic_rotate %188 by %c239_i32_123 dim 1 : vector<4x256xf32>, i32 -> vector<4x256xf32>
    %197 = tpu.concatenate %189, %190, %191, %192, %188, %193, %194, %195, %196 in 0 : vector<4x256xf32>, vector<4x256xf32>, vector<4x256xf32>, vector<4x256xf32>, vector<4x256xf32>, vector<4x256xf32>, vector<4x256xf32>, vector<4x256xf32>, vector<4x256xf32> -> vector<36x256xf32>
    %c3_124 = arith.constant 3 : index
    %c0_125 = arith.constant 0 : index
    %c0_126 = arith.constant 0 : index
    %198 = vector.load %arg5[%c3_124, %c0_125, %c0_126] : memref<6x4x36xf32, #tpu.memory_space<vmem>>, vector<1x4x36xf32>
    %199 = vector.shape_cast %198 : vector<1x4x36xf32> to vector<4x36xf32>
    %cst_127 = arith.constant dense<0.000000e+00> : vector<4x256xf32>
    %200 = tpu.matmul %199, %197, %cst_127 {dimension_numbers = #tpu.dot_dimension_numbers<[1], [0], [0], [1], [0, 0, 1, 1], [], []>} : vector<4x36xf32>, vector<36x256xf32>, vector<4x256xf32> -> vector<4x256xf32>
    %c0_128 = arith.constant 0 : index
    %c14 = arith.constant 14 : index
    %201 = vector.load %arg3[%c0_128, %c14] : memref<4x24xf32, #tpu.memory_space<vmem>>, vector<4x1xf32>
    %c0_129 = arith.constant 0 : index
    %c15 = arith.constant 15 : index
    %202 = vector.load %arg3[%c0_129, %c15] : memref<4x24xf32, #tpu.memory_space<vmem>>, vector<4x1xf32>
    %203 = vector.broadcast %201 : vector<4x1xf32> to vector<4x256xf32>
    %204 = arith.mulf %200, %203 : vector<4x256xf32>
    %205 = vector.broadcast %202 : vector<4x1xf32> to vector<4x256xf32>
    %206 = arith.addf %204, %205 : vector<4x256xf32>
    %cst_130 = arith.constant 0.000000e+00 : f32
    %207 = vector.broadcast %cst_130 : f32 to vector<4x256xf32>
    %208 = arith.maximumf %206, %207 : vector<4x256xf32>
    %c3_131 = arith.constant 3 : index
    %c0_132 = arith.constant 0 : index
    %c0_133 = arith.constant 0 : index
    %209 = vector.load %arg6[%c3_131, %c0_132, %c0_133] : memref<6x16x4xf32, #tpu.memory_space<vmem>>, vector<1x16x4xf32>
    %210 = vector.shape_cast %209 : vector<1x16x4xf32> to vector<16x4xf32>
    %cst_134 = arith.constant dense<0.000000e+00> : vector<16x256xf32>
    %211 = tpu.matmul %210, %208, %cst_134 {dimension_numbers = #tpu.dot_dimension_numbers<[1], [0], [0], [1], [0, 0, 1, 1], [], []>} : vector<16x4xf32>, vector<4x256xf32>, vector<16x256xf32> -> vector<16x256xf32>
    %212 = arith.addf %211, %168 : vector<16x256xf32>
    %213 = arith.mulf %212, %5 : vector<16x256xf32>
    %c0_135 = arith.constant 0 : index
    %c8_136 = arith.constant 8 : index
    %214 = vector.load %arg2[%c0_135, %c8_136] : memref<16x16xf32, #tpu.memory_space<vmem>>, vector<16x1xf32>
    %c0_137 = arith.constant 0 : index
    %c9_138 = arith.constant 9 : index
    %215 = vector.load %arg2[%c0_137, %c9_138] : memref<16x16xf32, #tpu.memory_space<vmem>>, vector<16x1xf32>
    %216 = vector.broadcast %214 : vector<16x1xf32> to vector<16x256xf32>
    %217 = arith.mulf %213, %216 : vector<16x256xf32>
    %218 = vector.broadcast %215 : vector<16x1xf32> to vector<16x256xf32>
    %219 = arith.addf %217, %218 : vector<16x256xf32>
    %cst_139 = arith.constant 0.000000e+00 : f32
    %220 = vector.broadcast %cst_139 : f32 to vector<16x256xf32>
    %221 = arith.maximumf %219, %220 : vector<16x256xf32>
    %c4_140 = arith.constant 4 : index
    %c0_141 = arith.constant 0 : index
    %c0_142 = arith.constant 0 : index
    %222 = vector.load %arg4[%c4_140, %c0_141, %c0_142] : memref<6x4x16xf32, #tpu.memory_space<vmem>>, vector<1x4x16xf32>
    %223 = vector.shape_cast %222 : vector<1x4x16xf32> to vector<4x16xf32>
    %cst_143 = arith.constant dense<0.000000e+00> : vector<4x256xf32>
    %224 = tpu.matmul %223, %221, %cst_143 {dimension_numbers = #tpu.dot_dimension_numbers<[1], [0], [0], [1], [0, 0, 1, 1], [], []>} : vector<4x16xf32>, vector<16x256xf32>, vector<4x256xf32> -> vector<4x256xf32>
    %c0_144 = arith.constant 0 : index
    %c16 = arith.constant 16 : index
    %225 = vector.load %arg3[%c0_144, %c16] : memref<4x24xf32, #tpu.memory_space<vmem>>, vector<4x1xf32>
    %c0_145 = arith.constant 0 : index
    %c17 = arith.constant 17 : index
    %226 = vector.load %arg3[%c0_145, %c17] : memref<4x24xf32, #tpu.memory_space<vmem>>, vector<4x1xf32>
    %227 = vector.broadcast %225 : vector<4x1xf32> to vector<4x256xf32>
    %228 = arith.mulf %224, %227 : vector<4x256xf32>
    %229 = vector.broadcast %226 : vector<4x1xf32> to vector<4x256xf32>
    %230 = arith.addf %228, %229 : vector<4x256xf32>
    %cst_146 = arith.constant 0.000000e+00 : f32
    %231 = vector.broadcast %cst_146 : f32 to vector<4x256xf32>
    %232 = arith.maximumf %230, %231 : vector<4x256xf32>
    %233 = arith.mulf %232, %9 : vector<4x256xf32>
    %c17_i32_147 = arith.constant 17 : i32
    %234 = tpu.dynamic_rotate %233 by %c17_i32_147 dim 1 : vector<4x256xf32>, i32 -> vector<4x256xf32>
    %c16_i32_148 = arith.constant 16 : i32
    %235 = tpu.dynamic_rotate %233 by %c16_i32_148 dim 1 : vector<4x256xf32>, i32 -> vector<4x256xf32>
    %c15_i32_149 = arith.constant 15 : i32
    %236 = tpu.dynamic_rotate %233 by %c15_i32_149 dim 1 : vector<4x256xf32>, i32 -> vector<4x256xf32>
    %c1_i32_150 = arith.constant 1 : i32
    %237 = tpu.dynamic_rotate %233 by %c1_i32_150 dim 1 : vector<4x256xf32>, i32 -> vector<4x256xf32>
    %c255_i32_151 = arith.constant 255 : i32
    %238 = tpu.dynamic_rotate %233 by %c255_i32_151 dim 1 : vector<4x256xf32>, i32 -> vector<4x256xf32>
    %c241_i32_152 = arith.constant 241 : i32
    %239 = tpu.dynamic_rotate %233 by %c241_i32_152 dim 1 : vector<4x256xf32>, i32 -> vector<4x256xf32>
    %c240_i32_153 = arith.constant 240 : i32
    %240 = tpu.dynamic_rotate %233 by %c240_i32_153 dim 1 : vector<4x256xf32>, i32 -> vector<4x256xf32>
    %c239_i32_154 = arith.constant 239 : i32
    %241 = tpu.dynamic_rotate %233 by %c239_i32_154 dim 1 : vector<4x256xf32>, i32 -> vector<4x256xf32>
    %242 = tpu.concatenate %234, %235, %236, %237, %233, %238, %239, %240, %241 in 0 : vector<4x256xf32>, vector<4x256xf32>, vector<4x256xf32>, vector<4x256xf32>, vector<4x256xf32>, vector<4x256xf32>, vector<4x256xf32>, vector<4x256xf32>, vector<4x256xf32> -> vector<36x256xf32>
    %c4_155 = arith.constant 4 : index
    %c0_156 = arith.constant 0 : index
    %c0_157 = arith.constant 0 : index
    %243 = vector.load %arg5[%c4_155, %c0_156, %c0_157] : memref<6x4x36xf32, #tpu.memory_space<vmem>>, vector<1x4x36xf32>
    %244 = vector.shape_cast %243 : vector<1x4x36xf32> to vector<4x36xf32>
    %cst_158 = arith.constant dense<0.000000e+00> : vector<4x256xf32>
    %245 = tpu.matmul %244, %242, %cst_158 {dimension_numbers = #tpu.dot_dimension_numbers<[1], [0], [0], [1], [0, 0, 1, 1], [], []>} : vector<4x36xf32>, vector<36x256xf32>, vector<4x256xf32> -> vector<4x256xf32>
    %c0_159 = arith.constant 0 : index
    %c18 = arith.constant 18 : index
    %246 = vector.load %arg3[%c0_159, %c18] : memref<4x24xf32, #tpu.memory_space<vmem>>, vector<4x1xf32>
    %c0_160 = arith.constant 0 : index
    %c19 = arith.constant 19 : index
    %247 = vector.load %arg3[%c0_160, %c19] : memref<4x24xf32, #tpu.memory_space<vmem>>, vector<4x1xf32>
    %248 = vector.broadcast %246 : vector<4x1xf32> to vector<4x256xf32>
    %249 = arith.mulf %245, %248 : vector<4x256xf32>
    %250 = vector.broadcast %247 : vector<4x1xf32> to vector<4x256xf32>
    %251 = arith.addf %249, %250 : vector<4x256xf32>
    %cst_161 = arith.constant 0.000000e+00 : f32
    %252 = vector.broadcast %cst_161 : f32 to vector<4x256xf32>
    %253 = arith.maximumf %251, %252 : vector<4x256xf32>
    %c4_162 = arith.constant 4 : index
    %c0_163 = arith.constant 0 : index
    %c0_164 = arith.constant 0 : index
    %254 = vector.load %arg6[%c4_162, %c0_163, %c0_164] : memref<6x16x4xf32, #tpu.memory_space<vmem>>, vector<1x16x4xf32>
    %255 = vector.shape_cast %254 : vector<1x16x4xf32> to vector<16x4xf32>
    %cst_165 = arith.constant dense<0.000000e+00> : vector<16x256xf32>
    %256 = tpu.matmul %255, %253, %cst_165 {dimension_numbers = #tpu.dot_dimension_numbers<[1], [0], [0], [1], [0, 0, 1, 1], [], []>} : vector<16x4xf32>, vector<4x256xf32>, vector<16x256xf32> -> vector<16x256xf32>
    %257 = arith.addf %256, %213 : vector<16x256xf32>
    %258 = arith.mulf %257, %5 : vector<16x256xf32>
    %c0_166 = arith.constant 0 : index
    %c0_167 = arith.constant 0 : index
    %259 = vector.load %arg9[%c0_166, %c0_167] : memref<256x256xf32, #tpu.memory_space<vmem>>, vector<256x256xf32>
    %cst_168 = arith.constant dense<0.000000e+00> : vector<16x256xf32>
    %260 = tpu.matmul %258, %259, %cst_168 {dimension_numbers = #tpu.dot_dimension_numbers<[1], [0], [0], [1], [0, 0, 1, 1], [], []>} : vector<16x256xf32>, vector<256x256xf32>, vector<16x256xf32> -> vector<16x256xf32>
    %261 = arith.addf %260, %146 : vector<16x256xf32>
    %c0_169 = arith.constant 0 : index
    %c12_170 = arith.constant 12 : index
    %262 = vector.load %arg2[%c0_169, %c12_170] : memref<16x16xf32, #tpu.memory_space<vmem>>, vector<16x1xf32>
    %c0_171 = arith.constant 0 : index
    %c13_172 = arith.constant 13 : index
    %263 = vector.load %arg2[%c0_171, %c13_172] : memref<16x16xf32, #tpu.memory_space<vmem>>, vector<16x1xf32>
    %c0_173 = arith.constant 0 : index
    %c14_174 = arith.constant 14 : index
    %264 = vector.load %arg2[%c0_173, %c14_174] : memref<16x16xf32, #tpu.memory_space<vmem>>, vector<16x1xf32>
    %c0_175 = arith.constant 0 : index
    %c15_176 = arith.constant 15 : index
    %265 = vector.load %arg2[%c0_175, %c15_176] : memref<16x16xf32, #tpu.memory_space<vmem>>, vector<16x1xf32>
    %266 = vector.broadcast %262 : vector<16x1xf32> to vector<16x256xf32>
    %267 = arith.mulf %261, %266 : vector<16x256xf32>
    %268 = vector.broadcast %263 : vector<16x1xf32> to vector<16x256xf32>
    %269 = arith.addf %267, %268 : vector<16x256xf32>
    %cst_177 = arith.constant 0.000000e+00 : f32
    %270 = vector.broadcast %cst_177 : f32 to vector<16x256xf32>
    %271 = arith.maximumf %269, %270 : vector<16x256xf32>
    %c0_178 = arith.constant 0 : index
    %c0_179 = arith.constant 0 : index
    %c0_180 = arith.constant 0 : index
    %272 = vector.load %arg7[%c0_178, %c0_179, %c0_180] : memref<2x16x16xf32, #tpu.memory_space<vmem>>, vector<1x16x16xf32>
    %273 = vector.shape_cast %272 : vector<1x16x16xf32> to vector<16x16xf32>
    %cst_181 = arith.constant dense<0.000000e+00> : vector<16x256xf32>
    %274 = tpu.matmul %273, %271, %cst_181 {dimension_numbers = #tpu.dot_dimension_numbers<[1], [0], [0], [1], [0, 0, 1, 1], [], []>} : vector<16x16xf32>, vector<16x256xf32>, vector<16x256xf32> -> vector<16x256xf32>
    %275 = vector.broadcast %264 : vector<16x1xf32> to vector<16x256xf32>
    %276 = arith.mulf %274, %275 : vector<16x256xf32>
    %277 = vector.broadcast %265 : vector<16x1xf32> to vector<16x256xf32>
    %278 = arith.addf %276, %277 : vector<16x256xf32>
    %cst_182 = arith.constant 0.000000e+00 : f32
    %279 = vector.broadcast %cst_182 : f32 to vector<16x256xf32>
    %280 = arith.maximumf %278, %279 : vector<16x256xf32>
    %c1_183 = arith.constant 1 : index
    %c0_184 = arith.constant 0 : index
    %c0_185 = arith.constant 0 : index
    %281 = vector.load %arg7[%c1_183, %c0_184, %c0_185] : memref<2x16x16xf32, #tpu.memory_space<vmem>>, vector<1x16x16xf32>
    %282 = vector.shape_cast %281 : vector<1x16x16xf32> to vector<16x16xf32>
    %cst_186 = arith.constant dense<0.000000e+00> : vector<16x256xf32>
    %283 = tpu.matmul %282, %280, %cst_186 {dimension_numbers = #tpu.dot_dimension_numbers<[1], [0], [0], [1], [0, 0, 1, 1], [], []>} : vector<16x16xf32>, vector<16x256xf32>, vector<16x256xf32> -> vector<16x256xf32>
    %cst_187 = arith.constant 5.000000e-01 : f32
    %284 = vector.broadcast %cst_187 : f32 to vector<16x256xf32>
    %285 = arith.mulf %284, %283 : vector<16x256xf32>
    %286 = math.tanh %285 : vector<16x256xf32>
    %cst_188 = arith.constant 1.000000e+00 : f32
    %287 = vector.broadcast %cst_188 : f32 to vector<16x256xf32>
    %288 = arith.addf %286, %287 : vector<16x256xf32>
    %cst_189 = arith.constant 5.000000e-01 : f32
    %289 = vector.broadcast %cst_189 : f32 to vector<16x256xf32>
    %290 = arith.mulf %289, %288 : vector<16x256xf32>
    %cst_190 = arith.constant 1.000000e+00 : f32
    %291 = vector.broadcast %cst_190 : f32 to vector<16x256xf32>
    %292 = arith.addf %291, %290 : vector<16x256xf32>
    %293 = arith.mulf %292, %146 : vector<16x256xf32>
    %c0_191 = arith.constant 0 : index
    %c10_192 = arith.constant 10 : index
    %294 = vector.load %arg2[%c0_191, %c10_192] : memref<16x16xf32, #tpu.memory_space<vmem>>, vector<16x1xf32>
    %c0_193 = arith.constant 0 : index
    %c11_194 = arith.constant 11 : index
    %295 = vector.load %arg2[%c0_193, %c11_194] : memref<16x16xf32, #tpu.memory_space<vmem>>, vector<16x1xf32>
    %296 = vector.broadcast %294 : vector<16x1xf32> to vector<16x256xf32>
    %297 = arith.mulf %293, %296 : vector<16x256xf32>
    %298 = vector.broadcast %295 : vector<16x1xf32> to vector<16x256xf32>
    %299 = arith.addf %297, %298 : vector<16x256xf32>
    %cst_195 = arith.constant 0.000000e+00 : f32
    %300 = vector.broadcast %cst_195 : f32 to vector<16x256xf32>
    %301 = arith.maximumf %299, %300 : vector<16x256xf32>
    %c5_196 = arith.constant 5 : index
    %c0_197 = arith.constant 0 : index
    %c0_198 = arith.constant 0 : index
    %302 = vector.load %arg4[%c5_196, %c0_197, %c0_198] : memref<6x4x16xf32, #tpu.memory_space<vmem>>, vector<1x4x16xf32>
    %303 = vector.shape_cast %302 : vector<1x4x16xf32> to vector<4x16xf32>
    %cst_199 = arith.constant dense<0.000000e+00> : vector<4x256xf32>
    %304 = tpu.matmul %303, %301, %cst_199 {dimension_numbers = #tpu.dot_dimension_numbers<[1], [0], [0], [1], [0, 0, 1, 1], [], []>} : vector<4x16xf32>, vector<16x256xf32>, vector<4x256xf32> -> vector<4x256xf32>
    %c0_200 = arith.constant 0 : index
    %c20 = arith.constant 20 : index
    %305 = vector.load %arg3[%c0_200, %c20] : memref<4x24xf32, #tpu.memory_space<vmem>>, vector<4x1xf32>
    %c0_201 = arith.constant 0 : index
    %c21 = arith.constant 21 : index
    %306 = vector.load %arg3[%c0_201, %c21] : memref<4x24xf32, #tpu.memory_space<vmem>>, vector<4x1xf32>
    %307 = vector.broadcast %305 : vector<4x1xf32> to vector<4x256xf32>
    %308 = arith.mulf %304, %307 : vector<4x256xf32>
    %309 = vector.broadcast %306 : vector<4x1xf32> to vector<4x256xf32>
    %310 = arith.addf %308, %309 : vector<4x256xf32>
    %cst_202 = arith.constant 0.000000e+00 : f32
    %311 = vector.broadcast %cst_202 : f32 to vector<4x256xf32>
    %312 = arith.maximumf %310, %311 : vector<4x256xf32>
    %313 = arith.mulf %312, %7 : vector<4x256xf32>
    %c17_i32_203 = arith.constant 17 : i32
    %314 = tpu.dynamic_rotate %313 by %c17_i32_203 dim 1 : vector<4x256xf32>, i32 -> vector<4x256xf32>
    %c16_i32_204 = arith.constant 16 : i32
    %315 = tpu.dynamic_rotate %313 by %c16_i32_204 dim 1 : vector<4x256xf32>, i32 -> vector<4x256xf32>
    %c15_i32_205 = arith.constant 15 : i32
    %316 = tpu.dynamic_rotate %313 by %c15_i32_205 dim 1 : vector<4x256xf32>, i32 -> vector<4x256xf32>
    %c1_i32_206 = arith.constant 1 : i32
    %317 = tpu.dynamic_rotate %313 by %c1_i32_206 dim 1 : vector<4x256xf32>, i32 -> vector<4x256xf32>
    %c255_i32_207 = arith.constant 255 : i32
    %318 = tpu.dynamic_rotate %313 by %c255_i32_207 dim 1 : vector<4x256xf32>, i32 -> vector<4x256xf32>
    %c241_i32_208 = arith.constant 241 : i32
    %319 = tpu.dynamic_rotate %313 by %c241_i32_208 dim 1 : vector<4x256xf32>, i32 -> vector<4x256xf32>
    %c240_i32_209 = arith.constant 240 : i32
    %320 = tpu.dynamic_rotate %313 by %c240_i32_209 dim 1 : vector<4x256xf32>, i32 -> vector<4x256xf32>
    %c239_i32_210 = arith.constant 239 : i32
    %321 = tpu.dynamic_rotate %313 by %c239_i32_210 dim 1 : vector<4x256xf32>, i32 -> vector<4x256xf32>
    %322 = tpu.concatenate %314, %315, %316, %317, %313, %318, %319, %320, %321 in 0 : vector<4x256xf32>, vector<4x256xf32>, vector<4x256xf32>, vector<4x256xf32>, vector<4x256xf32>, vector<4x256xf32>, vector<4x256xf32>, vector<4x256xf32>, vector<4x256xf32> -> vector<36x256xf32>
    %c5_211 = arith.constant 5 : index
    %c0_212 = arith.constant 0 : index
    %c0_213 = arith.constant 0 : index
    %323 = vector.load %arg5[%c5_211, %c0_212, %c0_213] : memref<6x4x36xf32, #tpu.memory_space<vmem>>, vector<1x4x36xf32>
    %324 = vector.shape_cast %323 : vector<1x4x36xf32> to vector<4x36xf32>
    %cst_214 = arith.constant dense<0.000000e+00> : vector<4x256xf32>
    %325 = tpu.matmul %324, %322, %cst_214 {dimension_numbers = #tpu.dot_dimension_numbers<[1], [0], [0], [1], [0, 0, 1, 1], [], []>} : vector<4x36xf32>, vector<36x256xf32>, vector<4x256xf32> -> vector<4x256xf32>
    %c0_215 = arith.constant 0 : index
    %c22 = arith.constant 22 : index
    %326 = vector.load %arg3[%c0_215, %c22] : memref<4x24xf32, #tpu.memory_space<vmem>>, vector<4x1xf32>
    %c0_216 = arith.constant 0 : index
    %c23 = arith.constant 23 : index
    %327 = vector.load %arg3[%c0_216, %c23] : memref<4x24xf32, #tpu.memory_space<vmem>>, vector<4x1xf32>
    %328 = vector.broadcast %326 : vector<4x1xf32> to vector<4x256xf32>
    %329 = arith.mulf %325, %328 : vector<4x256xf32>
    %330 = vector.broadcast %327 : vector<4x1xf32> to vector<4x256xf32>
    %331 = arith.addf %329, %330 : vector<4x256xf32>
    %cst_217 = arith.constant 0.000000e+00 : f32
    %332 = vector.broadcast %cst_217 : f32 to vector<4x256xf32>
    %333 = arith.maximumf %331, %332 : vector<4x256xf32>
    %c5_218 = arith.constant 5 : index
    %c0_219 = arith.constant 0 : index
    %c0_220 = arith.constant 0 : index
    %334 = vector.load %arg6[%c5_218, %c0_219, %c0_220] : memref<6x16x4xf32, #tpu.memory_space<vmem>>, vector<1x16x4xf32>
    %335 = vector.shape_cast %334 : vector<1x16x4xf32> to vector<16x4xf32>
    %cst_221 = arith.constant dense<0.000000e+00> : vector<16x256xf32>
    %336 = tpu.matmul %335, %333, %cst_221 {dimension_numbers = #tpu.dot_dimension_numbers<[1], [0], [0], [1], [0, 0, 1, 1], [], []>} : vector<16x4xf32>, vector<4x256xf32>, vector<16x256xf32> -> vector<16x256xf32>
    %337 = arith.addf %336, %293 : vector<16x256xf32>
    %338 = arith.mulf %337, %3 : vector<16x256xf32>
    %c0_222 = arith.constant 0 : index
    %c0_223 = arith.constant 0 : index
    %c0_224 = arith.constant 0 : index
    %339 = vector.load %arg12[%c0_222, %c0_223, %c0_224] : memref<1x16x256xf32, #tpu.memory_space<vmem>>, vector<1x16x256xf32>
    %340 = vector.shape_cast %339 : vector<1x16x256xf32> to vector<16x256xf32>
    %341 = vector.shape_cast %338 : vector<16x256xf32> to vector<1x16x256xf32>
    tpu.vector_store %arg12[%c0_222, %c0_223, %c0_224], %341 {strides = array<i32>} : memref<1x16x256xf32, #tpu.memory_space<vmem>>, vector<1x16x256xf32>,
    return
  }
  func.func @transform_0(%arg0: i32) -> (i32, i32, i32) {
    %c0_i32 = arith.constant 0 : i32
    %c0_i32_0 = arith.constant 0 : i32
    %c0_i32_1 = arith.constant 0 : i32
    return %arg0, %c0_i32, %c0_i32_0 : i32, i32, i32
  }
  func.func @transform_1(%arg0: i32) -> (i32, i32) {
    %c0_i32 = arith.constant 0 : i32
    %c0_i32_0 = arith.constant 0 : i32
    %c0_i32_1 = arith.constant 0 : i32
    return %c0_i32, %c0_i32_0 : i32, i32
  }
  func.func @transform_2(%arg0: i32) -> (i32, i32) {
    %c0_i32 = arith.constant 0 : i32
    %c0_i32_0 = arith.constant 0 : i32
    %c0_i32_1 = arith.constant 0 : i32
    return %c0_i32, %c0_i32_0 : i32, i32
  }
  func.func @transform_3(%arg0: i32) -> (i32, i32, i32) {
    %c0_i32 = arith.constant 0 : i32
    %c0_i32_0 = arith.constant 0 : i32
    %c0_i32_1 = arith.constant 0 : i32
    %c0_i32_2 = arith.constant 0 : i32
    return %c0_i32, %c0_i32_0, %c0_i32_1 : i32, i32, i32
  }
  func.func @transform_4(%arg0: i32) -> (i32, i32, i32) {
    %c0_i32 = arith.constant 0 : i32
    %c0_i32_0 = arith.constant 0 : i32
    %c0_i32_1 = arith.constant 0 : i32
    %c0_i32_2 = arith.constant 0 : i32
    return %c0_i32, %c0_i32_0, %c0_i32_1 : i32, i32, i32
  }
  func.func @transform_5(%arg0: i32) -> (i32, i32, i32) {
    %c0_i32 = arith.constant 0 : i32
    %c0_i32_0 = arith.constant 0 : i32
    %c0_i32_1 = arith.constant 0 : i32
    %c0_i32_2 = arith.constant 0 : i32
    return %c0_i32, %c0_i32_0, %c0_i32_1 : i32, i32, i32
  }
  func.func @transform_6(%arg0: i32) -> (i32, i32, i32) {
    %c0_i32 = arith.constant 0 : i32
    %c0_i32_0 = arith.constant 0 : i32
    %c0_i32_1 = arith.constant 0 : i32
    %c0_i32_2 = arith.constant 0 : i32
    return %c0_i32, %c0_i32_0, %c0_i32_1 : i32, i32, i32
  }
  func.func @transform_7(%arg0: i32) -> (i32, i32) {
    %c0_i32 = arith.constant 0 : i32
    %c0_i32_0 = arith.constant 0 : i32
    %c0_i32_1 = arith.constant 0 : i32
    return %c0_i32, %c0_i32_0 : i32, i32
  }
  func.func @transform_8(%arg0: i32) -> (i32, i32) {
    %c0_i32 = arith.constant 0 : i32
    %c0_i32_0 = arith.constant 0 : i32
    %c0_i32_1 = arith.constant 0 : i32
    return %c0_i32, %c0_i32_0 : i32, i32
  }
  func.func @transform_9(%arg0: i32) -> (i32, i32) {
    %c0_i32 = arith.constant 0 : i32
    %c0_i32_0 = arith.constant 0 : i32
    %c0_i32_1 = arith.constant 0 : i32
    return %c0_i32, %c0_i32_0 : i32, i32
  }
  func.func @transform_10(%arg0: i32) -> (i32, i32) {
    %c0_i32 = arith.constant 0 : i32
    %c0_i32_0 = arith.constant 0 : i32
    %c0_i32_1 = arith.constant 0 : i32
    return %c0_i32, %c0_i32_0 : i32, i32
  }
  func.func @transform_11(%arg0: i32) -> (i32, i32, i32) {
    %c0_i32 = arith.constant 0 : i32
    %c0_i32_0 = arith.constant 0 : i32
    %c0_i32_1 = arith.constant 0 : i32
    return %arg0, %c0_i32, %c0_i32_0 : i32, i32, i32
  }
}

</mosaic_0001>

<bundles_post_ra>
// kernel: attention_module_stage3.1
= control target key start
LH: loop header
LB: loop body
LE: loop exit
PB: predicated region body
PF: predicated region fallthrough
CT: control target
= control target key end

     0   :  { %s3519_s17 = smov 0   ;;  %s4904_s0 = inlined_call_operand.vmem [shape: f32[2,16,256], index: 0, kind: input, shape index: {}]   ;;  %s4905_s1 = inlined_call_operand.vmem [shape: f32[16,16], index: 1, kind: input, shape index: {}]   ;;  %s4906_s2 = inlined_call_operand.vmem [shape: f32[4,24], index: 2, kind: input, shape index: {}]   ;;  %s4907_s3 = inlined_call_operand.vmem [shape: f32[6,4,16], index: 3, kind: input, shape index: {}]   ;;  %s4908_s4 = inlined_call_operand.vmem [shape: f32[6,4,36], index: 4, kind: input, shape index: {}]   ;;  %s4909_s5 = inlined_call_operand.vmem [shape: f32[6,16,4], index: 5, kind: input, shape index: {}]   ;;  %s4910_s6 = inlined_call_operand.vmem [shape: f32[2,16,16], index: 6, kind: input, shape index: {}]   ;;  %s4911_s7 = inlined_call_operand.vmem [shape: f32[256,256], index: 7, kind: input, shape index: {}]   ;;  %s4912_s8 = inlined_call_operand.vmem [shape: f32[256,256], index: 8, kind: input, shape index: {}]   ;;  %s4913_s9 = inlined_call_operand.vmem [shape: f32[1,256], index: 9, kind: input, shape index: {}]   ;;  %s4914_s10 = inlined_call_operand.vmem [shape: f32[1,256], index: 10, kind: input, shape index: {}]   ;;  %s4915_s11 = inlined_call_operand.vmem [shape: f32[2,16,256], index: 11, kind: output, shape index: {}]  }
   0x1 LB: > { %s2908_s18 = sadd.s32 4294967295, %s3425_s17   ;;  %p2912_p0 = scmp.ge.s32.totalorder %s3425_s17, 1  ;;  %s3425_s17 = sphi %s3519_s17, %s21_s17  }
   0x2   : > { %p337_p1 = scmp.lt.s32.totalorder %s3425_s17, 3 }
   0x4   : > { %p338_p2 = pnand %p2912_p0, %p337_p1 }
   0x5   : > { %p377_p3 = scmp.lt.s32.totalorder (!%p338_p2), %s2908_s18, 1  ;;  %s3429_s14 = smov (!%p338_p2), 111  }
   0x6   : > { %341 = sbr.rel (%p338_p2) target bundleno = 3992 (0xf98), region = 64  ;;  %s3430_s15 = smov (!%p338_p2), 112  }
   0x7   : > { %s3431_s16 = smov (!%p338_p2), 1   ;;  %s3432_s19 = smov (!%p338_p2), 113  }
   0x8   : > { %s3433_s20 = smov (!%p338_p2), 127   ;;  %s4919_s21 = smov (!%p338_p2), 17  }
   0x9   : > { %s3435_s22 = smov (!%p338_p2), 15   ;;  %s4917_s23 = smov (!%p338_p2), 16  }
   0xb   : > { %v3530_v0 = vld [vmem:[%s4905_s1 + $0x8] sm:$0xff]  ;;  %v3427_v1 = vmov 1   ;;  %v3428_v2 = vmov 0   ;;  %v3537_v3 = vld [vmem:[%s4905_s1] sm:$0xff]  ;;  %s4924_s18 = smov (!%p377_p3, %s2908_s18), 1  ;;  %vm436_vm0 = vcmask 130048   ;;  %v502_v42 = vlaneseq }
   0xc   : > { %3064 = vset.pattern.permute.xlu1 %v3427_v1  ;;  %3063 = vset.pattern.permute.xlu0 %v3428_v2  ;;  %v3544_v4 = vld [vmem:[%s4906_s2] sm:$0xf]  ;;  %s4916_s25 = sshll.u32 %s4924_s18, 5  ;;  %v3437_v44 = vmov 2   ;;  %v3438_v45 = vmov 3   ;;  %vm580_vm2 = vcmask 1043456  }
   0xd   : > { %424 = vperm.xlu1 %3064, %v3530_v0   ;;  %412 = vperm.xlu0 %3063, %v3530_v0   ;;  %s381_s28 = scalar_lea.vmem %s4904_s0, %s4916_s25  ;;  %v435_v25 = vld [vmem:[%s4907_s3] sm:$0xf]  ;;  %v3599_v46 = vand.u32 127, %v502_v42  ;;  %vm590_vm10 = vcmask 293888   ;;  %vm656_vm11 = vcmask 31744   ;;  %s4920_s25 = smov 16  }
   0xe   : > { %3065 = vset.pattern.permute.xlu2 %v3428_v2  ;;  %v3556_v5 = vld [vmem:[%s381_s28 + $0x10] sm:$0xff]  ;;  %v3558_v6 = vld [vmem:[%s381_s28 + $0x18] sm:$0xff]  ;;  %v3562_v15 = vld [vmem:[%s381_s28] sm:$0xff] }
   0xf   : > { %483 = vperm.xlu2 %3065, %v3544_v4   ;;  %v3564_v16 = vld [vmem:[%s381_s28 + $0x8] sm:$0xff]  ;;  %v387_v30 = vld [vmem:[%s4913_s9] sm:$0x3]  ;;  %vm553_vm1 = vcmp.lt.s32.totalorder %v3599_v46, 111  ;;  %vm546_vm3 = vcmp.lt.s32.totalorder %v3599_v46, 112  ;;  %vm539_vm4 = vcmp.lt.s32.totalorder %v3599_v46, 113 }
  0x10   : > { %v3576_v33 = vperm.slane %v387_v30, 0  ;;  %v3578_v34 = vperm.slane %v387_v30, 1  ;;  %vm532_vm5 = vcmp.lt.s32.totalorder %v3599_v46, 127  ;;  %vm525_vm6 = vcmp.lt.s32.totalorder %v3599_v46, 1 }
  0x11   : > { %vm518_vm7 = vcmp.lt.s32.totalorder %v3599_v46, 15  ;;  %vm511_vm8 = vcmp.lt.s32.totalorder %v3599_v46, 16  ;;  %vm504_vm9 = vcmp.lt.s32.totalorder %v3599_v46, 17 }
  0x12   : > { %vm1317_vm12 = vcmp.gt.f32.partialorder %v3576_v33, 0.0  ;;  %vm1318_vm13 = vcmp.gt.f32.partialorder %v3578_v34, 0.0 }
  0x15   : > { %420 = vperm.xlu1 %3064, %v3537_v3   ;;  %407 = vperm.xlu0 %3063, %v3537_v3  }
  0x17   : > { %3066 = vset.pattern.permute.xlu2 %v3427_v1 }
  0x18   : > { %489 = vperm.xlu2 %3066, %v3544_v4  }
  0x1d   : > { %3102 = vset.pattern.permute.xlu0 %v3437_v44  ;;  %3103 = vset.pattern.permute.xlu1 %v3438_v45 }
  0x20   : > { %3104 = vset.pattern.permute.xlu2 %v3437_v44 }
  0x69   : > { %v484_v26 = vpop.permute.xlu2 %483 }
  0x72   : > { %v490_v27 = vpop.permute.xlu2 %489 }
  0x7f   : > { %v425_v7 = vpop.permute.xlu1 %424  ;;  %v413_v8 = vpop.permute.xlu0 %412 }
  0x80   : > { %v417_v9 = vmul.f32 %v413_v8, %v3556_v5  ;;  %v418_v10 = vmul.f32 %v413_v8, %v3558_v6 }
  0x82   : > { %v429_v11 = vadd.f32 %v425_v7, %v417_v9  ;;  %v430_v12 = vadd.f32 %v425_v7, %v418_v10 }
  0x84   : > { %v433_v13 = vmax.f32 %v429_v11, 0.0  ;;  %v434_v14 = vmax.f32 %v430_v12, 0.0 }
  0x86   : > { %454 = vmatpush.msra.mxu2 %v433_v13  ;;  %474 = vmatpush.msra.mxu3 %v434_v14 }
  0x87   : > { %v408_v17 = vpop.permute.xlu0 %407  ;;  %v421_v20 = vpop.permute.xlu1 %420 }
  0x88   : > { %v415_v18 = vmul.f32 %v408_v17, %v3562_v15  ;;  %v416_v19 = vmul.f32 %v408_v17, %v3564_v16 }
  0x8a   : > { %v427_v21 = vadd.f32 %v421_v20, %v415_v18  ;;  %v428_v22 = vadd.f32 %v421_v20, %v416_v19 }
  0x8c   : > { %v431_v23 = vmax.f32 %v427_v21, 0.0  ;;  %v432_v24 = vmax.f32 %v428_v22, 0.0 }
  0x8e   : > { %455 = vmatpush.msra.mxu2 %v431_v23  ;;  %475 = vmatpush.msra.mxu3 %v432_v24 }
  0x8f   : > { %2917 = vmatmul.msk.f32.vlgmr.msra.gmra.mxu2 %vm436_vm0, %v435_v25  ;;  %2918 = vmatmul.msk.f32.vlgmr.msra.gmra.mxu3 %vm436_vm0, %v435_v25 }
 0x112   : > { %v457_v28 = vpop.f32.mrf.mxu2  ;;  %v477_v29 = vpop.f32.mrf.mxu3 }
 0x113   : > { %v486_v31 = vmul.f32 %v484_v26, %v457_v28  ;;  %v487_v32 = vmul.f32 %v484_v26, %v477_v29 }
 0x115   : > { %v492_v35 = vadd.f32 %v490_v27, %v486_v31  ;;  %v493_v36 = vadd.f32 %v490_v27, %v487_v32 }
 0x117   : > { %v494_v37 = vmax.f32 %v492_v35, 0.0  ;;  %v495_v38 = vmax.f32 %v493_v36, 0.0 }
 0x119   : > { %v3581_v39 = vmul.f32 %v494_v37, %v3576_v33  ;;  %v3584_v40 = vmul.f32 %v495_v38, %v3578_v34 }
 0x11b   : > { %551 = vrot.lane.b32.xlu2 %v3584_v40, %s3429_s14  ;;  %549 = vrot.lane.b32.xlu1 %v3581_v39, %s3429_s14  ;;  %v3067_v41 = vpack.i.bf16 %v3584_v40, %v3581_v39 }
 0x11d   : > { %3068 = vrot.lane.b32.xlu0 %v3067_v41, %s3430_s15 }
 0x123   : > { %3083 = vrot.lane.b32.xlu2 %v3067_v41, %s3431_s16  ;;  %3078 = vrot.lane.b32.xlu1 %v3067_v41, %s3432_s19 }
 0x125   : > { %3073 = vrot.lane.b32.xlu0 %v3067_v41, %s3433_s20 }
 0x12b   : > { %3098 = vrot.lane.b32.xlu2 %v3067_v41, %s4919_s21  ;;  %3093 = vrot.lane.b32.xlu1 %v3067_v41, %s3435_s22 }
 0x12d   : > { %3088 = vrot.lane.b32.xlu0 %v3067_v41, %s4917_s23 }
 0x133   : > { %647 = vperm.xlu1 %3103, %v3544_v4   ;;  %724 = vperm.xlu2 %3104, %v3530_v0  }
 0x135   : > { %641 = vperm.xlu0 %3102, %v3544_v4  }
 0x13b   : > { %3105 = vset.pattern.permute.xlu1 %v3437_v44  ;;  %3106 = vset.pattern.permute.xlu2 %v3438_v45  ;;  %v589_v44 = vld [vmem:[%s4908_s4] sm:$0xf] }
 0x13c   : > { %720 = vperm.xlu1 %3105, %v3537_v3   ;;  %736 = vperm.xlu2 %3106, %v3530_v0  }
 0x13d   : > { %3107 = vset.pattern.permute.xlu0 %v3438_v45 }
 0x13e   : > { %732 = vperm.xlu0 %3107, %v3537_v3  }
 0x175   : > { %v552_v43 = vpop.permute.xlu2 %551 }
 0x17d   : > { %v3084_v53 = vpop.permute.xlu2 %3083 }
 0x17e   : > { %v3086_v59 = vunpack.i.h.bf16 %v3084_v53  ;;  %v3085_v60 = vunpack.i.l.bf16 %v3084_v53 }
 0x180   : > { %v527_v17 = vsel %vm525_vm6, %v3086_v59, %v3085_v60  ;;  %v526_v19 = vsel %vm525_vm6, %v3085_v60, %v3086_v59  ;;  %v655_v59 = vld [vmem:[%s4909_s5 + $0x8] sm:$0xff]  ;;  %v3439_v60 = vmov 4  }
 0x181   : > { %v564_v25 = vrot.slane %v527_v17, 4  ;;  %v565_v29 = vrot.slane %v526_v19, 4  ;;  %3108 = vset.pattern.permute.xlu1 %v3439_v60  ;;  %3147 = vset.pattern.permute.xlu0 %v3439_v60 }
 0x182   : > { %793 = vperm.xlu1 %3108, %v3544_v4  }
 0x185   : > { %v3099_v18 = vpop.permute.xlu2 %3098 }
 0x186   : > { %v3101_v26 = vunpack.i.h.bf16 %v3099_v18  ;;  %v3100_v27 = vunpack.i.l.bf16 %v3099_v18 }
 0x188   : > { %v506_v42 = vsel %vm504_vm9, %v3101_v26, %v3100_v27 }
 0x18d   : > { %v550_v47 = vpop.permute.xlu1 %549 }
 0x18e   : > { %v554_v48 = vsel %vm553_vm1, %v550_v47, %v552_v43  ;;  %v555_v49 = vsel %vm553_vm1, %v552_v43, %v550_v47  ;;  %v505_v43 = vsel %vm504_vm9, %v3100_v27, %v3101_v26 }
 0x18f   : > { %2919 = vmatpush.msk.msrb.mxu2 %vm580_vm2, %v554_v48  ;;  %2921 = vmatpush.msk.msrb.mxu3 %vm580_vm2, %v555_v49  ;;  %v3069_v50 = vpop.permute.xlu0 %3068 }
 0x190   : > { %v3071_v51 = vunpack.i.h.bf16 %v3069_v50  ;;  %v3070_v52 = vunpack.i.l.bf16 %v3069_v50 }
 0x192   : > { %v547_v54 = vsel %vm546_vm3, %v3070_v52, %v3071_v51  ;;  %v548_v55 = vsel %vm546_vm3, %v3071_v51, %v3070_v52 }
 0x193   : > { %v576_v62 = vrot.slane %v547_v54, 4  ;;  %v577_v63 = vrot.slane %v548_v55, 4 }
 0x195   : > { %v3079_v56 = vpop.permute.xlu1 %3078 }
 0x196   : > { %v3081_v57 = vunpack.i.h.bf16 %v3079_v56  ;;  %v3080_v58 = vunpack.i.l.bf16 %v3079_v56 }
 0x197   : > { %v3074_v61 = vpop.permute.xlu0 %3073 }
 0x198   : > { %v3076_v1 = vunpack.i.h.bf16 %v3074_v61  ;;  %v3075_v2 = vunpack.i.l.bf16 %v3074_v61  ;;  %v540_v7 = vsel %vm539_vm4, %v3080_v58, %v3081_v57  ;;  %v541_v8 = vsel %vm539_vm4, %v3081_v57, %v3080_v58  ;;  %v654_v58 = vld [vmem:[%s4909_s5] sm:$0xff] }
 0x199   : > { %v587_v9 = vsel %vm580_vm2, %v540_v7, %v576_v62  ;;  %v588_v10 = vsel %vm580_vm2, %v541_v8, %v577_v63  ;;  %v3440_v61 = vmov 5  }
 0x19a   : > { %612 = vmatpush.msrb.mxu2 %v587_v9  ;;  %632 = vmatpush.msrb.mxu3 %v588_v10  ;;  %v533_v11 = vsel %vm532_vm5, %v3075_v2, %v3076_v1  ;;  %v534_v12 = vsel %vm532_vm5, %v3076_v1, %v3075_v2  ;;  %v725_v1 = vpop.permute.xlu2 %724 }
 0x19b   : > { %v570_v13 = vrot.slane %v533_v11, 4  ;;  %v571_v14 = vrot.slane %v534_v12, 4  ;;  %3109 = vset.pattern.permute.xlu2 %v3440_v61 }
 0x19c   : > { %799 = vperm.xlu2 %3109, %v3544_v4  }
 0x19d   : > { %v3094_v20 = vpop.permute.xlu1 %3093  ;;  %v585_v21 = vsel %vm580_vm2, %v3581_v39, %v570_v13  ;;  %v586_v22 = vsel %vm580_vm2, %v3584_v40, %v571_v14 }
 0x19e   : > { %v3096_v23 = vunpack.i.h.bf16 %v3094_v20  ;;  %v3095_v24 = vunpack.i.l.bf16 %v3094_v20  ;;  %613 = vmatpush.msrb.mxu2 %v585_v21  ;;  %633 = vmatpush.msrb.mxu3 %v586_v22 }
 0x19f   : > { %v3089_v28 = vpop.permute.xlu0 %3088 }
 0x1a0   : > { %v3091_v30 = vunpack.i.h.bf16 %v3089_v28  ;;  %v3090_v31 = vunpack.i.l.bf16 %v3089_v28  ;;  %v520_v32 = vsel %vm518_vm7, %v3096_v23, %v3095_v24  ;;  %v519_v35 = vsel %vm518_vm7, %v3095_v24, %v3096_v23 }
 0x1a1   : > { %v583_v36 = vsel %vm580_vm2, %v520_v32, %v564_v25  ;;  %v584_v37 = vsel %vm580_vm2, %v519_v35, %v565_v29  ;;  %v2929_v29 = vld [vmem:[%s4907_s3 + $0x4] sm:$0xf] }
 0x1a2   : > { %614 = vmatpush.msrb.mxu2 %v583_v36  ;;  %634 = vmatpush.msrb.mxu3 %v584_v37  ;;  %v513_v38 = vsel %vm511_vm8, %v3091_v30, %v3090_v31  ;;  %v512_v39 = vsel %vm511_vm8, %v3090_v31, %v3091_v30  ;;  %v737_v20 = vpop.permute.xlu2 %736 }
 0x1a3   : > { %v558_v40 = vrot.slane %v513_v38, 4  ;;  %v559_v41 = vrot.slane %v512_v39, 4 }
 0x1a5   : > { %v581_v45 = vsel %vm580_vm2, %v506_v42, %v558_v40  ;;  %v582_v47 = vsel %vm580_vm2, %v505_v43, %v559_v41  ;;  %v648_v49 = vpop.permute.xlu1 %647 }
 0x1a6   : > { %615 = vmatpush.msrb.mxu2 %v581_v45  ;;  %635 = vmatpush.msrb.mxu3 %v582_v47  ;;  %v3441_v47 = vmov 6  }
 0x1a7   : > { %2920 = vmatmul.msk.f32.vlgmr.msrb.gmra.mxu2 %vm590_vm10, %v589_v44  ;;  %2922 = vmatmul.msk.f32.vlgmr.msrb.gmra.mxu3 %vm590_vm10, %v589_v44  ;;  %v642_v48 = vpop.permute.xlu0 %641 }
 0x1a8   : > { %3145 = vset.pattern.permute.xlu1 %v3441_v47 }
 0x1ae   : > { %v721_v10 = vpop.permute.xlu1 %720 }
 0x1b0   : > { %v733_v19 = vpop.permute.xlu0 %732 }
 0x1f4   : > { %v794_v30 = vpop.permute.xlu1 %793 }
 0x1f6   : > { %v800_v31 = vpop.permute.xlu2 %799 }
 0x22a   : > { %v617_v50 = vpop.f32.mrf.mxu2  ;;  %v637_v51 = vpop.f32.mrf.mxu3 }
 0x22b   : > { %v644_v52 = vmul.f32 %v642_v48, %v617_v50  ;;  %v645_v53 = vmul.f32 %v642_v48, %v637_v51  ;;  %v3442_v48 = vmov 7  }
 0x22c   : > { %3146 = vset.pattern.permute.xlu2 %v3442_v48 }
 0x22d   : > { %v650_v54 = vadd.f32 %v648_v49, %v644_v52  ;;  %v651_v55 = vadd.f32 %v648_v49, %v645_v53 }
 0x22f   : > { %v652_v56 = vmax.f32 %v650_v54, 0.0  ;;  %v653_v57 = vmax.f32 %v651_v55, 0.0 }
 0x231   : > { %2923 = vmatpush.msk.msra.mxu0 %vm580_vm2, %v652_v56  ;;  %2926 = vmatpush.msk.msra.mxu1 %vm580_vm2, %v653_v57 }
 0x232   : > { %2924 = vmatmul.msk.f32.vlgmr.msra.gmra.mxu0 %vm656_vm11, %v654_v58  ;;  %2927 = vmatmul.msk.f32.vlgmr.msra.gmra.mxu1 %vm656_vm11, %v654_v58 }
 0x23a   : > { %2925 = vmatmul.msk.f32.gmra.mxu0 %vm656_vm11, %v655_v59  ;;  %2928 = vmatmul.msk.f32.gmra.mxu1 %vm656_vm11, %v655_v59 }
 0x2af   : > { %v686_v62 = vpop.f32.mrf.mxu0  ;;  %v709_v63 = vpop.f32.mrf.mxu1 }
 0x2b0   : > { %v687_v2 = vadd.f32 %v686_v62, %v3562_v15  ;;  %v710_v7 = vadd.f32 %v709_v63, %v3564_v16 }
 0x2b2   : > { %v3684_v8 = vmul.f32 %v687_v2, %v3576_v33  ;;  %v3687_v9 = vmul.f32 %v710_v7, %v3578_v34 }
 0x2b4   : > { %v727_v17 = vmul.f32 %v721_v10, %v3684_v8  ;;  %v728_v18 = vmul.f32 %v721_v10, %v3687_v9 }
 0x2b6   : > { %v739_v23 = vadd.f32 %v733_v19, %v727_v17 }
 0x2b7   : > { %v689_v11 = vpop.f32.mrf.mxu0  ;;  %v712_v12 = vpop.f32.mrf.mxu1 }
 0x2b8   : > { %v690_v13 = vadd.f32 %v689_v11, %v3556_v5  ;;  %v713_v14 = vadd.f32 %v712_v12, %v3558_v6  ;;  %v740_v5 = vadd.f32 %v733_v19, %v728_v18  ;;  %v743_v27 = vmax.f32 %v739_v23, 0.0 }
 0x2ba   : > { %v3694_v15 = vmul.f32 %v690_v13, %v3576_v33  ;;  %v3697_v16 = vmul.f32 %v713_v14, %v3578_v34  ;;  %v744_v28 = vmax.f32 %v740_v5, 0.0 }
 0x2bc   : > { %v729_v21 = vmul.f32 %v725_v1, %v3694_v15  ;;  %v730_v22 = vmul.f32 %v725_v1, %v3697_v16 }
 0x2be   : > { %v741_v24 = vadd.f32 %v737_v20, %v729_v21  ;;  %v742_v6 = vadd.f32 %v737_v20, %v730_v22 }
 0x2c0   : > { %v745_v25 = vmax.f32 %v741_v24, 0.0  ;;  %v746_v26 = vmax.f32 %v742_v6, 0.0 }
 0x2c2   : > { %766 = vmatpush.msra.mxu2 %v745_v25  ;;  %786 = vmatpush.msra.mxu3 %v746_v26 }
 0x2c4   : > { %767 = vmatpush.msra.mxu2 %v743_v27  ;;  %787 = vmatpush.msra.mxu3 %v744_v28 }
 0x2c5   : > { %2930 = vmatmul.msk.f32.vlgmr.msra.gmra.mxu2 %vm436_vm0, %v2929_v29  ;;  %2931 = vmatmul.msk.f32.vlgmr.msra.gmra.mxu3 %vm436_vm0, %v2929_v29 }
 0x348   : > { %v769_v32 = vpop.f32.mrf.mxu2  ;;  %v789_v35 = vpop.f32.mrf.mxu3 }
 0x349   : > { %v796_v36 = vmul.f32 %v794_v30, %v769_v32  ;;  %v797_v37 = vmul.f32 %v794_v30, %v789_v35 }
 0x34b   : > { %v802_v38 = vadd.f32 %v800_v31, %v796_v36  ;;  %v803_v39 = vadd.f32 %v800_v31, %v797_v37 }
 0x34d   : > { %v804_v40 = vmax.f32 %v802_v38, 0.0  ;;  %v805_v41 = vmax.f32 %v803_v39, 0.0 }
 0x34f   : > { %v3707_v42 = vmul.f32 %v804_v40, %v3576_v33  ;;  %v3710_v43 = vmul.f32 %v805_v41, %v3578_v34 }
 0x351   : > { %852 = vrot.lane.b32.xlu0 %v3710_v43, %s3429_s14  ;;  %850 = vrot.lane.b32.xlu2 %v3707_v42, %s3429_s14  ;;  %v3110_v44 = vpack.i.bf16 %v3710_v43, %v3707_v42 }
 0x353   : > { %3111 = vrot.lane.b32.xlu1 %v3110_v44, %s3430_s15 }
 0x359   : > { %3126 = vrot.lane.b32.xlu0 %v3110_v44, %s3431_s16  ;;  %3121 = vrot.lane.b32.xlu2 %v3110_v44, %s3432_s19 }
 0x35b   : > { %3116 = vrot.lane.b32.xlu1 %v3110_v44, %s3433_s20 }
 0x361   : > { %3141 = vrot.lane.b32.xlu0 %v3110_v44, %s4919_s21  ;;  %3136 = vrot.lane.b32.xlu2 %v3110_v44, %s3435_s22 }
 0x363   : > { %3131 = vrot.lane.b32.xlu1 %v3110_v44, %s4917_s23 }
 0x369   : > { %1023 = vperm.xlu0 %3147, %v3530_v0   ;;  %946 = vperm.xlu2 %3146, %v3544_v4  }
 0x36b   : > { %940 = vperm.xlu1 %3145, %v3544_v4  }
 0x371   : > { %3149 = vset.pattern.permute.xlu2 %v3440_v61 }
 0x372   : > { %1035 = vperm.xlu2 %3149, %v3530_v0  }
 0x373   : > { %3148 = vset.pattern.permute.xlu1 %v3439_v60 }
 0x374   : > { %1019 = vperm.xlu1 %3148, %v3537_v3  }
 0x37c   : > { %3150 = vset.pattern.permute.xlu1 %v3440_v61 }
 0x37d   : > { %1031 = vperm.xlu1 %3150, %v3537_v3  }
 0x3ab   : > { %v851_v45 = vpop.permute.xlu2 %850 }
 0x3b3   : > { %v3122_v49 = vpop.permute.xlu2 %3121 }
 0x3b4   : > { %v3124_v54 = vunpack.i.h.bf16 %v3122_v49  ;;  %v3123_v55 = vunpack.i.l.bf16 %v3122_v49  ;;  %v2932_v49 = vld [vmem:[%s4908_s4 + $0x4] sm:$0xf] }
 0x3b6   : > { %v842_v1 = vsel %vm539_vm4, %v3123_v55, %v3124_v54  ;;  %v843_v60 = vsel %vm539_vm4, %v3124_v54, %v3123_v55 }
 0x3bb   : > { %v3137_v13 = vpop.permute.xlu2 %3136 }
 0x3bc   : > { %v3139_v21 = vunpack.i.h.bf16 %v3137_v13  ;;  %v3138_v22 = vunpack.i.l.bf16 %v3137_v13 }
 0x3be   : > { %v825_v30 = vsel %vm518_vm7, %v3139_v21, %v3138_v22  ;;  %v824_v61 = vsel %vm518_vm7, %v3138_v22, %v3139_v21 }
 0x3c3   : > { %v853_v50 = vpop.permute.xlu0 %852 }
 0x3c4   : > { %v854_v51 = vsel %vm553_vm1, %v851_v45, %v853_v50  ;;  %v855_v52 = vsel %vm553_vm1, %v853_v50, %v851_v45 }
 0x3c5   : > { %2933 = vmatpush.msk.msrb.mxu0 %vm580_vm2, %v854_v51  ;;  %2935 = vmatpush.msk.msrb.mxu1 %vm580_vm2, %v855_v52  ;;  %v3112_v53 = vpop.permute.xlu1 %3111 }
 0x3c6   : > { %v3114_v56 = vunpack.i.h.bf16 %v3112_v53  ;;  %v3113_v57 = vunpack.i.l.bf16 %v3112_v53  ;;  %v947_v53 = vpop.permute.xlu2 %946 }
 0x3c8   : > { %v848_v58 = vsel %vm546_vm3, %v3113_v57, %v3114_v56  ;;  %v849_v59 = vsel %vm546_vm3, %v3114_v56, %v3113_v57 }
 0x3c9   : > { %v876_v62 = vrot.slane %v848_v58, 4  ;;  %v877_v63 = vrot.slane %v849_v59, 4 }
 0x3cb   : > { %v3127_v2 = vpop.permute.xlu0 %3126  ;;  %v886_v7 = vsel %vm580_vm2, %v842_v1, %v876_v62  ;;  %v887_v10 = vsel %vm580_vm2, %v843_v60, %v877_v63  ;;  %v2937_v1 = vld [vmem:[%s4909_s5 + $0x10] sm:$0xff]  ;;  %v2938_v60 = vld [vmem:[%s4909_s5 + $0x18] sm:$0xff] }
 0x3cc   : > { %v3129_v11 = vunpack.i.h.bf16 %v3127_v2  ;;  %v3128_v12 = vunpack.i.l.bf16 %v3127_v2  ;;  %911 = vmatpush.msrb.mxu0 %v886_v7  ;;  %931 = vmatpush.msrb.mxu1 %v887_v10  ;;  %v3443_v2 = vmov 9   ;;  %v3444_v7 = vmov 8  }
 0x3cd   : > { %v3117_v14 = vpop.permute.xlu1 %3116  ;;  %3152 = vset.pattern.permute.xlu0 %v3443_v2  ;;  %3151 = vset.pattern.permute.xlu2 %v3444_v7 }
 0x3ce   : > { %v3119_v17 = vunpack.i.h.bf16 %v3117_v14  ;;  %v3118_v18 = vunpack.i.l.bf16 %v3117_v14  ;;  %v831_v19 = vsel %vm525_vm6, %v3129_v11, %v3128_v12  ;;  %v830_v20 = vsel %vm525_vm6, %v3128_v12, %v3129_v11  ;;  %1098 = vperm.xlu0 %3152, %v3544_v4   ;;  %1092 = vperm.xlu2 %3151, %v3544_v4  }
 0x3cf   : > { %v864_v25 = vrot.slane %v831_v19, 4  ;;  %v865_v26 = vrot.slane %v830_v20, 4 }
 0x3d0   : > { %v836_v23 = vsel %vm532_vm5, %v3118_v18, %v3119_v17  ;;  %v837_v5 = vsel %vm532_vm5, %v3119_v17, %v3118_v18 }
 0x3d1   : > { %v870_v24 = vrot.slane %v836_v23, 4  ;;  %v871_v6 = vrot.slane %v837_v5, 4  ;;  %v882_v32 = vsel %vm580_vm2, %v825_v30, %v864_v25  ;;  %v883_v35 = vsel %vm580_vm2, %v824_v61, %v865_v26 }
 0x3d3   : > { %v3142_v27 = vpop.permute.xlu0 %3141  ;;  %v884_v28 = vsel %vm580_vm2, %v3707_v42, %v870_v24  ;;  %v885_v29 = vsel %vm580_vm2, %v3710_v43, %v871_v6 }
 0x3d4   : > { %912 = vmatpush.msrb.mxu0 %v884_v28  ;;  %932 = vmatpush.msrb.mxu1 %v885_v29  ;;  %v3144_v36 = vunpack.i.h.bf16 %v3142_v27  ;;  %v3143_v37 = vunpack.i.l.bf16 %v3142_v27  ;;  %v1036_v27 = vpop.permute.xlu2 %1035 }
 0x3d5   : > { %v3132_v31 = vpop.permute.xlu1 %3131 }
 0x3d6   : > { %v3134_v38 = vunpack.i.h.bf16 %v3132_v31  ;;  %v3133_v39 = vunpack.i.l.bf16 %v3132_v31  ;;  %913 = vmatpush.msrb.mxu0 %v882_v32  ;;  %933 = vmatpush.msrb.mxu1 %v883_v35  ;;  %v813_v44 = vsel %vm504_vm9, %v3144_v36, %v3143_v37  ;;  %v812_v45 = vsel %vm504_vm9, %v3143_v37, %v3144_v36 }
 0x3d7   : > { %3271 = vset.pattern.permute.xlu0 %v3441_v47 }
 0x3d8   : > { %v819_v40 = vsel %vm511_vm8, %v3134_v38, %v3133_v39  ;;  %v818_v41 = vsel %vm511_vm8, %v3133_v39, %v3134_v38  ;;  %v2945_v39 = vld [vmem:[%s4907_s3 + $0x8] sm:$0xf] }
 0x3d9   : > { %v858_v42 = vrot.slane %v819_v40, 4  ;;  %v859_v43 = vrot.slane %v818_v41, 4  ;;  %v3445_v40 = vmov 10  }
 0x3da   : > { %3188 = vset.pattern.permute.xlu2 %v3445_v40 }
 0x3db   : > { %v880_v50 = vsel %vm580_vm2, %v813_v44, %v858_v42  ;;  %v881_v51 = vsel %vm580_vm2, %v812_v45, %v859_v43  ;;  %v1024_v23 = vpop.permute.xlu0 %1023 }
 0x3dc   : > { %914 = vmatpush.msrb.mxu0 %v880_v50  ;;  %934 = vmatpush.msrb.mxu1 %v881_v51 }
 0x3dd   : > { %2934 = vmatmul.msk.f32.vlgmr.msrb.gmra.mxu0 %vm590_vm10, %v2932_v49  ;;  %2936 = vmatmul.msk.f32.vlgmr.msrb.gmra.mxu1 %vm590_vm10, %v2932_v49  ;;  %v941_v52 = vpop.permute.xlu1 %940 }
 0x3e6   : > { %v1020_v12 = vpop.permute.xlu1 %1019 }
 0x3ef   : > { %v1032_v26 = vpop.permute.xlu1 %1031 }
 0x428   : > { %v1093_v41 = vpop.permute.xlu2 %1092 }
 0x440   : > { %v1099_v42 = vpop.permute.xlu0 %1098 }
 0x45a   : > { %v916_v54 = vpop.f32.mrf.mxu0  ;;  %v936_v55 = vpop.f32.mrf.mxu1 }
 0x45b   : > { %v943_v56 = vmul.f32 %v941_v52, %v916_v54  ;;  %v944_v57 = vmul.f32 %v941_v52, %v936_v55 }
 0x45d   : > { %v949_v58 = vadd.f32 %v947_v53, %v943_v56  ;;  %v950_v59 = vadd.f32 %v947_v53, %v944_v57  ;;  %v3446_v57 = vmov 11  }
 0x45e   : > { %3194 = vset.pattern.permute.xlu1 %v3446_v57 }
 0x45f   : > { %v951_v62 = vmax.f32 %v949_v58, 0.0  ;;  %v952_v63 = vmax.f32 %v950_v59, 0.0  ;;  %v3850_v58 = vsel %vm1317_vm12, %v3684_v8, -1e+30  ;;  %v3855_v59 = vsel %vm1318_vm13, %v3687_v9, -1e+30 }
 0x461   : > { %2939 = vmatpush.msk.msrb.mxu2 %vm580_vm2, %v951_v62  ;;  %2942 = vmatpush.msk.msrb.mxu3 %vm580_vm2, %v952_v63  ;;  %v3189_v62 = vpack.i.bf16 %v3855_v59, %v3850_v58 }
 0x462   : > { %2940 = vmatmul.msk.f32.vlgmr.msrb.gmra.mxu2 %vm656_vm11, %v2937_v1  ;;  %2943 = vmatmul.msk.f32.vlgmr.msrb.gmra.mxu3 %vm656_vm11, %v2937_v1 }
 0x46a   : > { %2941 = vmatmul.msk.f32.gmra.mxu2 %vm656_vm11, %v2938_v60  ;;  %2944 = vmatmul.msk.f32.gmra.mxu3 %vm656_vm11, %v2938_v60 }
 0x4e5   : > { %v985_v10 = vpop.f32.mrf.mxu2  ;;  %v1008_v11 = vpop.f32.mrf.mxu3 }
 0x4e6   : > { %v986_v13 = vadd.f32 %v985_v10, %v3684_v8  ;;  %v1009_v14 = vadd.f32 %v1008_v11, %v3687_v9  ;;  %v3872_v8 = vsel %vm1317_vm12, %v3694_v15, -1e+30  ;;  %v3877_v9 = vsel %vm1318_vm13, %v3697_v16, -1e+30 }
 0x4e7   : > { %v3210_v63 = vpack.i.bf16 %v3877_v9, %v3872_v8 }
 0x4e8   : > { %v3805_v17 = vmul.f32 %v986_v13, %v3576_v33  ;;  %v3808_v18 = vmul.f32 %v1009_v14, %v3578_v34 }
 0x4ea   : > { %v1026_v5 = vmul.f32 %v1020_v12, %v3805_v17  ;;  %v1027_v24 = vmul.f32 %v1020_v12, %v3808_v18 }
 0x4ec   : > { %v1038_v30 = vadd.f32 %v1032_v26, %v1026_v5  ;;  %v1039_v61 = vadd.f32 %v1032_v26, %v1027_v24 }
 0x4ed   : > { %v988_v19 = vpop.f32.mrf.mxu2  ;;  %v1011_v20 = vpop.f32.mrf.mxu3 }
 0x4ee   : > { %v989_v21 = vadd.f32 %v988_v19, %v3694_v15  ;;  %v1012_v22 = vadd.f32 %v1011_v20, %v3697_v16  ;;  %v1042_v37 = vmax.f32 %v1038_v30, 0.0  ;;  %v1043_v38 = vmax.f32 %v1039_v61, 0.0 }
 0x4f0   : > { %v3815_v6 = vmul.f32 %v989_v21, %v3576_v33  ;;  %v3818_v25 = vmul.f32 %v1012_v22, %v3578_v34 }
 0x4f2   : > { %v1028_v28 = vmul.f32 %v1024_v23, %v3815_v6  ;;  %v1029_v29 = vmul.f32 %v1024_v23, %v3818_v25 }
 0x4f4   : > { %v1040_v31 = vadd.f32 %v1036_v27, %v1028_v28  ;;  %v1041_v32 = vadd.f32 %v1036_v27, %v1029_v29 }
 0x4f6   : > { %v1044_v35 = vmax.f32 %v1040_v31, 0.0  ;;  %v1045_v36 = vmax.f32 %v1041_v32, 0.0 }
 0x4f8   : > { %1065 = vmatpush.msra.mxu0 %v1044_v35  ;;  %1085 = vmatpush.msra.mxu1 %v1045_v36 }
 0x4fa   : > { %1066 = vmatpush.msra.mxu0 %v1042_v37  ;;  %1086 = vmatpush.msra.mxu1 %v1043_v38 }
 0x4fb   : > { %2946 = vmatmul.msk.f32.vlgmr.msra.gmra.mxu0 %vm436_vm0, %v2945_v39  ;;  %2947 = vmatmul.msk.f32.vlgmr.msra.gmra.mxu1 %vm436_vm0, %v2945_v39 }
 0x578   : > { %v1068_v43 = vpop.f32.mrf.mxu0  ;;  %v1088_v44 = vpop.f32.mrf.mxu1 }
 0x579   : > { %v1095_v45 = vmul.f32 %v1093_v41, %v1068_v43  ;;  %v1096_v49 = vmul.f32 %v1093_v41, %v1088_v44 }
 0x57b   : > { %v1101_v50 = vadd.f32 %v1099_v42, %v1095_v45  ;;  %v1102_v51 = vadd.f32 %v1099_v42, %v1096_v49 }
 0x57d   : > { %v1103_v52 = vmax.f32 %v1101_v50, 0.0  ;;  %v1104_v53 = vmax.f32 %v1102_v51, 0.0 }
 0x57f   : > { %v3829_v54 = vmul.f32 %v1103_v52, %v3576_v33  ;;  %v3832_v55 = vmul.f32 %v1104_v53, %v3578_v34 }
 0x581   : > { %1149 = vrot.lane.b32.xlu2 %v3829_v54, %s3429_s14  ;;  %v3163_v56 = vpack.i.bf16 %v3832_v55, %v3829_v54 }
 0x583   : > { %3164 = vrot.lane.b32.xlu0 %v3163_v56, %s3432_s19  ;;  %3154 = vrot.lane.b32.xlu1 %v3163_v56, %s3430_s15 }
 0x589   : > { %3159 = vrot.lane.b32.xlu2 %v3163_v56, %s3433_s20 }
 0x58b   : > { %3179 = vrot.lane.b32.xlu0 %v3163_v56, %s3435_s22  ;;  %1151 = vrot.lane.b32.xlu1 %v3832_v55, %s3429_s14 }
 0x591   : > { %3174 = vrot.lane.b32.xlu2 %v3163_v56, %s4917_s23 }
 0x593   : > { %3190 = vrot.lane.b32.xlu0 %v3189_v62, %s4919_s21  ;;  %3169 = vrot.lane.b32.xlu1 %v3163_v56, %s3431_s16 }
 0x599   : > { %1239 = vperm.xlu2 %3188, %v3544_v4  }
 0x59b   : > { %3201 = vrot.lane.b32.xlu0 %v3189_v62, %s3435_s22  ;;  %3184 = vrot.lane.b32.xlu1 %v3163_v56, %s4919_s21 }
 0x5a1   : > { %3196 = vrot.lane.b32.xlu2 %v3189_v62, %s4917_s23 }
 0x5a2   : > { %3270 = vset.pattern.permute.xlu2 %v3441_v47 }
 0x5a3   : > { %3216 = vrot.lane.b32.xlu0 %v3189_v62, %s3433_s20  ;;  %1245 = vperm.xlu1 %3194, %v3544_v4  }
 0x5a9   : > { %3211 = vrot.lane.b32.xlu2 %v3210_v63, %s4919_s21 }
 0x5ab   : > { %3231 = vrot.lane.b32.xlu0 %v3210_v63, %s3435_s22  ;;  %3206 = vrot.lane.b32.xlu1 %v3189_v62, %s3431_s16 }
 0x5ac   : > { %3272 = vset.pattern.permute.xlu1 %v3442_v48 }
 0x5b1   : > { %3226 = vrot.lane.b32.xlu2 %v3189_v62, %s3432_s19 }
 0x5b3   : > { %3246 = vrot.lane.b32.xlu0 %v3189_v62, %s3429_s14  ;;  %3221 = vrot.lane.b32.xlu1 %v3210_v63, %s4917_s23  ;;  %s4921_s23 = smov 17  }
 0x5b9   : > { %3241 = vrot.lane.b32.xlu2 %v3210_v63, %s3431_s16 }
 0x5bb   : > { %3261 = vrot.lane.b32.xlu0 %v3210_v63, %s3430_s15  ;;  %3236 = vrot.lane.b32.xlu1 %v3189_v62, %s3430_s15 }
 0x5c1   : > { %3256 = vrot.lane.b32.xlu2 %v3210_v63, %s3432_s19 }
 0x5c3   : > { %3251 = vrot.lane.b32.xlu1 %v3210_v63, %s3433_s20  ;;  %1608 = vperm.xlu0 %3271, %v3537_v3  }
 0x5c9   : > { %1612 = vperm.xlu2 %3270, %v3530_v0  }
 0x5cb   : > { %3266 = vrot.lane.b32.xlu1 %v3210_v63, %s3429_s14 }
 0x5d1   : > { %3273 = vset.pattern.permute.xlu2 %v3442_v48 }
 0x5d2   : > { %1620 = vperm.xlu2 %3273, %v3537_v3  }
 0x5d3   : > { %1624 = vperm.xlu1 %3272, %v3530_v0  }
 0x5db   : > { %v1150_v4 = vpop.permute.xlu2 %1149 }
 0x5e3   : > { %v3160_v15 = vpop.permute.xlu2 %3159 }
 0x5e4   : > { %v3162_v11 = vunpack.i.h.bf16 %v3160_v15  ;;  %v3161_v12 = vunpack.i.l.bf16 %v3160_v15 }
 0x5e6   : > { %v1135_v3 = vsel %vm532_vm5, %v3161_v12, %v3162_v11  ;;  %v1136_v0 = vsel %vm532_vm5, %v3162_v11, %v3161_v12  ;;  %v2948_v12 = vld [vmem:[%s4908_s4 + $0x8] sm:$0xf] }
 0x5e7   : > { %v1169_v26 = vrot.slane %v1135_v3, 4  ;;  %v1170_v27 = vrot.slane %v1136_v0, 4  ;;  %v1481_v3 = vld [vmem:[%s4911_s7 + $0xf0] sm:$0xff] }
 0x5e8   : > { %v1513_v0 = vld [vmem:[%s4911_s7 + $0x1f0] sm:$0xff] }
 0x5e9   : > { %v1183_v32 = vsel %vm580_vm2, %v3829_v54, %v1169_v26  ;;  %v1184_v35 = vsel %vm580_vm2, %v3832_v55, %v1170_v27  ;;  %v1475_v27 = vld [vmem:[%s4911_s7 + $0xc0] sm:$0xff] }
 0x5eb   : > { %v3175_v10 = vpop.permute.xlu2 %3174 }
 0x5ec   : > { %v3177_v43 = vunpack.i.h.bf16 %v3175_v10  ;;  %v3176_v44 = vunpack.i.l.bf16 %v3175_v10 }
 0x5ee   : > { %v1117_v62 = vsel %vm511_vm8, %v3176_v44, %v3177_v43  ;;  %v1118_v63 = vsel %vm511_vm8, %v3177_v43, %v3176_v44  ;;  %v1469_v43 = vld [vmem:[%s4911_s7 + $0x90] sm:$0xff] }
 0x5ef   : > { %v1501_v44 = vld [vmem:[%s4911_s7 + $0x190] sm:$0xff] }
 0x5f3   : > { %v3917_v30 = vpop.permute.xlu2 %1239 }
 0x5f5   : > { %v3165_v16 = vpop.permute.xlu0 %3164  ;;  %v3155_v47 = vpop.permute.xlu1 %3154 }
 0x5f6   : > { %v3157_v1 = vunpack.i.h.bf16 %v3155_v47  ;;  %v3156_v60 = vunpack.i.l.bf16 %v3155_v47  ;;  %v3167_v48 = vunpack.i.h.bf16 %v3165_v16  ;;  %v3166_v19 = vunpack.i.l.bf16 %v3165_v16 }
 0x5f8   : > { %v1147_v13 = vsel %vm546_vm3, %v3156_v60, %v3157_v1  ;;  %v1148_v14 = vsel %vm546_vm3, %v3157_v1, %v3156_v60  ;;  %v1141_v28 = vsel %vm539_vm4, %v3166_v19, %v3167_v48  ;;  %v1142_v29 = vsel %vm539_vm4, %v3167_v48, %v3166_v19  ;;  %v1479_v48 = vld [vmem:[%s4911_s7 + $0xe0] sm:$0xff] }
 0x5f9   : > { %v1175_v22 = vrot.slane %v1147_v13, 4  ;;  %v1176_v23 = vrot.slane %v1148_v14, 4  ;;  %v1157_v1 = vrot.slane %v1118_v63, 4  ;;  %v1158_v60 = vrot.slane %v1117_v62, 4  ;;  %v1511_v19 = vld [vmem:[%s4911_s7 + $0x1e0] sm:$0xff]  ;;  %v1465_v63 = vld [vmem:[%s4911_s7 + $0x70] sm:$0xff] }
 0x5fb   : > { %v1185_v61 = vsel %vm580_vm2, %v1141_v28, %v1175_v22  ;;  %v1186_v31 = vsel %vm580_vm2, %v1142_v29, %v1176_v23  ;;  %v3929_v52 = vpop.permute.xlu2 %3196  ;;  %v1477_v23 = vld [vmem:[%s4911_s7 + $0xd0] sm:$0xff]  ;;  %v1507_v28 = vld [vmem:[%s4911_s7 + $0x1c0] sm:$0xff] }
 0x5fc   : > { %v1473_v29 = vld [vmem:[%s4911_s7 + $0xb0] sm:$0xff] }
 0x5fd   : > { %v3180_v20 = vpop.permute.xlu0 %3179  ;;  %v1152_v21 = vpop.permute.xlu1 %1151 }
 0x5fe   : > { %v1153_v5 = vsel %vm553_vm1, %v1150_v4, %v1152_v21  ;;  %v1154_v24 = vsel %vm553_vm1, %v1152_v21, %v1150_v4  ;;  %v3182_v38 = vunpack.i.h.bf16 %v3180_v20  ;;  %v3181_v39 = vunpack.i.l.bf16 %v3180_v20 }
 0x5ff   : > { %2949 = vmatpush.msk.msra.mxu2 %vm580_vm2, %v1153_v5  ;;  %2951 = vmatpush.msk.msra.mxu3 %vm580_vm2, %v1154_v24  ;;  %v1509_v5 = vld [vmem:[%s4911_s7 + $0x1d0] sm:$0xff] }
 0x600   : > { %v1124_v53 = vsel %vm518_vm7, %v3182_v38, %v3181_v39  ;;  %v1123_v54 = vsel %vm518_vm7, %v3181_v39, %v3182_v38  ;;  %v3199_v38 = vunpack.i.h.bf16 %v3929_v52  ;;  %v3198_v39 = vunpack.i.l.bf16 %v3929_v52 }
 0x601   : > { %1210 = vmatpush.msra.mxu2 %v1185_v61  ;;  %1230 = vmatpush.msra.mxu3 %v1186_v31  ;;  %v1505_v61 = vld [vmem:[%s4911_s7 + $0x1b0] sm:$0xff] }
 0x603   : > { %1211 = vmatpush.msra.mxu2 %v1183_v32  ;;  %1231 = vmatpush.msra.mxu3 %v1184_v35  ;;  %v3966_v20 = vpop.permute.xlu2 %3211  ;;  %v1471_v35 = vld [vmem:[%s4911_s7 + $0xa0] sm:$0xff] }
 0x605   : > { %v3191_v36 = vpop.permute.xlu0 %3190  ;;  %v3170_v37 = vpop.permute.xlu1 %3169 }
 0x606   : > { %v3172_v41 = vunpack.i.h.bf16 %v3170_v37  ;;  %v3171_v42 = vunpack.i.l.bf16 %v3170_v37  ;;  %v3193_v24 = vunpack.i.h.bf16 %v3191_v36  ;;  %v3192_v26 = vunpack.i.l.bf16 %v3191_v36  ;;  %v1503_v36 = vld [vmem:[%s4911_s7 + $0x1a0] sm:$0xff] }
 0x608   : > { %v1129_v45 = vsel %vm525_vm6, %v3171_v42, %v3172_v41  ;;  %v1130_v49 = vsel %vm525_vm6, %v3172_v41, %v3171_v42  ;;  %v1331_v31 = vsel %vm504_vm9, %v3192_v26, %v3193_v24  ;;  %v1333_v32 = vsel %vm504_vm9, %v3193_v24, %v3192_v26 }
 0x609   : > { %v1163_v50 = vrot.slane %v1130_v49, 4  ;;  %v1164_v51 = vrot.slane %v1129_v45, 4  ;;  %v1335_v45 = vmax.f32 %v3850_v58, %v1333_v32  ;;  %v1336_v49 = vmax.f32 %v3855_v59, %v1331_v31 }
 0x60a   : > { %v1347_v58 = vsel %vm511_vm8, %v3198_v39, %v3199_v38  ;;  %v1349_v59 = vsel %vm511_vm8, %v3199_v38, %v3198_v39  ;;  %v1457_v38 = vld [vmem:[%s4911_s7 + $0x30] sm:$0xff] }
 0x60b   : > { %v1181_v55 = vsel %vm580_vm2, %v1124_v53, %v1163_v50  ;;  %v1182_v56 = vsel %vm580_vm2, %v1123_v54, %v1164_v51  ;;  %v4012_v50 = vpop.permute.xlu2 %3226  ;;  %v1467_v54 = vld [vmem:[%s4911_s7 + $0x80] sm:$0xff]  ;;  %v1489_v39 = vld [vmem:[%s4911_s7 + $0x130] sm:$0xff] }
 0x60c   : > { %1212 = vmatpush.msra.mxu2 %v1181_v55  ;;  %1232 = vmatpush.msra.mxu3 %v1182_v56  ;;  %v1499_v55 = vld [vmem:[%s4911_s7 + $0x180] sm:$0xff] }
 0x60d   : > { %v3941_v4 = vpop.permute.xlu0 %3201  ;;  %v3185_v15 = vpop.permute.xlu1 %3184 }
 0x60e   : > { %v3187_v16 = vunpack.i.h.bf16 %v3185_v15  ;;  %v3186_v47 = vunpack.i.l.bf16 %v3185_v15  ;;  %v3204_v41 = vunpack.i.h.bf16 %v3941_v4  ;;  %v3203_v42 = vunpack.i.l.bf16 %v3941_v4  ;;  %v1497_v4 = vld [vmem:[%s4911_s7 + $0x170] sm:$0xff] }
 0x60f   : > { %v1351_v15 = vmax.f32 %v1335_v45, %v1349_v59 }
 0x610   : > { %v1112_v10 = vsel %vm504_vm9, %v3187_v16, %v3186_v47  ;;  %v1111_v11 = vsel %vm504_vm9, %v3186_v47, %v3187_v16  ;;  %v1363_v56 = vsel %vm518_vm7, %v3203_v42, %v3204_v41  ;;  %v1365_v62 = vsel %vm518_vm7, %v3204_v41, %v3203_v42 }
 0x611   : > { %v1179_v13 = vsel %vm580_vm2, %v1112_v10, %v1157_v1  ;;  %v1180_v14 = vsel %vm580_vm2, %v1111_v11, %v1158_v60  ;;  %v1352_v16 = vmax.f32 %v1336_v49, %v1347_v58  ;;  %v1463_v60 = vld [vmem:[%s4911_s7 + $0x60] sm:$0xff]  ;;  %v3214_v11 = vunpack.i.h.bf16 %v3966_v20 }
 0x612   : > { %1213 = vmatpush.msra.mxu2 %v1179_v13  ;;  %1233 = vmatpush.msra.mxu3 %v1180_v14  ;;  %v1495_v10 = vld [vmem:[%s4911_s7 + $0x160] sm:$0xff]  ;;  %v1367_v13 = vmax.f32 %v1351_v15, %v1365_v62  ;;  %v1485_v15 = vld [vmem:[%s4911_s7 + $0x110] sm:$0xff] }
 0x613   : > { %2950 = vmatmul.msk.f32.vlgmr.msra.gmra.mxu2 %vm590_vm10, %v2948_v12  ;;  %2952 = vmatmul.msk.f32.vlgmr.msra.gmra.mxu3 %vm590_vm10, %v2948_v12  ;;  %v3213_v12 = vunpack.i.l.bf16 %v3966_v20  ;;  %v1368_v14 = vmax.f32 %v1352_v16, %v1363_v56  ;;  %v3242_v32 = vpop.permute.xlu2 %3241 }
 0x614   : > { %1515 = vmatpush.msrb.mxu2 %v1481_v3  ;;  %1538 = vmatpush.msrb.mxu3 %v1513_v0 }
 0x615   : > { %v3968_v21 = vpop.permute.xlu1 %1245  ;;  %v3970_v22 = vpop.permute.xlu0 %3216  ;;  %v1334_v31 = vsel %vm504_vm9, %v3214_v11, %v3213_v12 }
 0x616   : > { %1516 = vmatpush.msrb.mxu2 %v1479_v48  ;;  %1539 = vmatpush.msrb.mxu3 %v1511_v19  ;;  %v3219_v0 = vunpack.i.h.bf16 %v3970_v22  ;;  %v3218_v48 = vunpack.i.l.bf16 %v3970_v22  ;;  %v1461_v19 = vld [vmem:[%s4911_s7 + $0x50] sm:$0xff]  ;;  %v1459_v22 = vld [vmem:[%s4911_s7 + $0x40] sm:$0xff] }
 0x618   : > { %1517 = vmatpush.msrb.mxu2 %v1477_v23  ;;  %1540 = vmatpush.msrb.mxu3 %v1509_v5  ;;  %v1493_v23 = vld [vmem:[%s4911_s7 + $0x150] sm:$0xff] }
 0x61a   : > { %1518 = vmatpush.msrb.mxu2 %v1475_v27  ;;  %1541 = vmatpush.msrb.mxu3 %v1507_v28  ;;  %v3229_v27 = vunpack.i.h.bf16 %v4012_v50  ;;  %v3228_v28 = vunpack.i.l.bf16 %v4012_v50 }
 0x61c   : > { %1519 = vmatpush.msrb.mxu2 %v1473_v29  ;;  %1542 = vmatpush.msrb.mxu3 %v1505_v61  ;;  %v1491_v29 = vld [vmem:[%s4911_s7 + $0x140] sm:$0xff]  ;;  %v1332_v61 = vsel %vm504_vm9, %v3213_v12, %v3214_v11  ;;  %v1411_v49 = vsel %vm539_vm4, %v3228_v28, %v3229_v27 }
 0x61d   : > { %v3207_v37 = vpop.permute.xlu1 %3206  ;;  %v4014_v51 = vpop.permute.xlu0 %3231  ;;  %v1338_v45 = vmax.f32 %v3877_v9, %v1332_v61  ;;  %v1451_v11 = vld [vmem:[%s4911_s7] sm:$0xff] }
 0x61e   : > { %1520 = vmatpush.msrb.mxu2 %v1471_v35  ;;  %1543 = vmatpush.msrb.mxu3 %v1503_v36  ;;  %v3209_v52 = vunpack.i.h.bf16 %v3207_v37  ;;  %v3208_v53 = vunpack.i.l.bf16 %v3207_v37  ;;  %v1395_v35 = vsel %vm532_vm5, %v3218_v48, %v3219_v0  ;;  %v1397_v36 = vsel %vm532_vm5, %v3219_v0, %v3218_v48  ;;  %v1483_v12 = vld [vmem:[%s4911_s7 + $0x100] sm:$0xff] }
 0x61f   : > { %v3233_v9 = vunpack.i.l.bf16 %v4014_v51 }
 0x620   : > { %1521 = vmatpush.msrb.mxu2 %v1469_v43  ;;  %1544 = vmatpush.msrb.mxu3 %v1501_v44  ;;  %v1379_v47 = vsel %vm525_vm6, %v3208_v53, %v3209_v52  ;;  %v1381_v1 = vsel %vm525_vm6, %v3209_v52, %v3208_v53  ;;  %v1337_v44 = vmax.f32 %v3872_v8, %v1334_v31  ;;  %v1455_v52 = vld [vmem:[%s4911_s7 + $0x20] sm:$0xff]  ;;  %v3234_v8 = vunpack.i.h.bf16 %v4014_v51 }
 0x621   : > { %v1383_v5 = vmax.f32 %v1367_v13, %v1381_v1  ;;  %v1384_v24 = vmax.f32 %v1368_v14, %v1379_v47  ;;  %v1487_v53 = vld [vmem:[%s4911_s7 + $0x120] sm:$0xff]  ;;  %v3244_v51 = vunpack.i.h.bf16 %v3242_v32  ;;  %v3243_v13 = vunpack.i.l.bf16 %v3242_v32 }
 0x622   : > { %1522 = vmatpush.msrb.mxu2 %v1467_v54  ;;  %1545 = vmatpush.msrb.mxu3 %v1499_v55  ;;  %v1413_v54 = vsel %vm539_vm4, %v3229_v27, %v3228_v28  ;;  %v1366_v14 = vsel %vm518_vm7, %v3234_v8, %v3233_v9  ;;  %v1364_v48 = vsel %vm518_vm7, %v3233_v9, %v3234_v8 }
 0x623   : > { %v1399_v41 = vmax.f32 %v1383_v5, %v1395_v35  ;;  %v1400_v42 = vmax.f32 %v1384_v24, %v1397_v36  ;;  %v3257_v24 = vpop.permute.xlu2 %3256  ;;  %v1380_v28 = vsel %vm525_vm6, %v3243_v13, %v3244_v51 }
 0x624   : > { %1523 = vmatpush.msrb.mxu2 %v1465_v63  ;;  %1546 = vmatpush.msrb.mxu3 %v1497_v4  ;;  %v1453_v4 = vld [vmem:[%s4911_s7 + $0x10] sm:$0xff]  ;;  %v3259_v61 = vunpack.i.h.bf16 %v3257_v24  ;;  %v3258_v31 = vunpack.i.l.bf16 %v3257_v24  ;;  %v1474_v24 = vld [vmem:[%s4911_s7 + $0xb8] sm:$0xff] }
 0x625   : > { %v3222_v3 = vpop.permute.xlu1 %3221  ;;  %v3247_v37 = vpop.permute.xlu0 %3246  ;;  %v1415_v47 = vmax.f32 %v1399_v41, %v1411_v49  ;;  %v1416_v1 = vmax.f32 %v1400_v42, %v1413_v54 }
 0x626   : > { %v3224_v20 = vunpack.i.h.bf16 %v3222_v3  ;;  %v3223_v26 = vunpack.i.l.bf16 %v3222_v3  ;;  %1524 = vmatpush.msrb.mxu2 %v1463_v60  ;;  %1547 = vmatpush.msrb.mxu3 %v1495_v10  ;;  %v3249_v55 = vunpack.i.h.bf16 %v3247_v37  ;;  %v3248_v59 = vunpack.i.l.bf16 %v3247_v37 }
 0x628   : > { %1525 = vmatpush.msrb.mxu2 %v1461_v19  ;;  %1548 = vmatpush.msrb.mxu3 %v1493_v23  ;;  %v1350_v43 = vsel %vm511_vm8, %v3224_v20, %v3223_v26  ;;  %v1348_v50 = vsel %vm511_vm8, %v3223_v26, %v3224_v20  ;;  %v1443_v19 = vsel %vm553_vm1, %v3248_v59, %v3249_v55 }
 0x629   : > { %v1353_v56 = vmax.f32 %v1337_v44, %v1350_v43  ;;  %v1354_v16 = vmax.f32 %v1338_v45, %v1348_v50  ;;  %v1445_v23 = vsel %vm553_vm1, %v3249_v55, %v3248_v59  ;;  %v1412_v44 = vsel %vm539_vm4, %v3258_v31, %v3259_v61 }
 0x62a   : > { %1526 = vmatpush.msrb.mxu2 %v1459_v22  ;;  %1549 = vmatpush.msrb.mxu3 %v1491_v29  ;;  %v1382_v22 = vsel %vm525_vm6, %v3244_v51, %v3243_v13  ;;  %v1414_v45 = vsel %vm539_vm4, %v3259_v61, %v3258_v31  ;;  %v2953_v13 = vld [vmem:[%s4909_s5 + $0x20] sm:$0xff]  ;;  %v1502_v61 = vld [vmem:[%s4911_s7 + $0x198] sm:$0xff]  ;;  %v1468_v31 = vld [vmem:[%s4911_s7 + $0x88] sm:$0xff] }
 0x62b   : > { %v1369_v5 = vmax.f32 %v1353_v56, %v1366_v14  ;;  %v1370_v20 = vmax.f32 %v1354_v16, %v1364_v48  ;;  %v1482_v14 = vld [vmem:[%s4911_s7 + $0xf8] sm:$0xff] }
 0x62c   : > { %1527 = vmatpush.msrb.mxu2 %v1457_v38  ;;  %1550 = vmatpush.msrb.mxu3 %v1489_v39  ;;  %v1510_v48 = vld [vmem:[%s4911_s7 + $0x1d8] sm:$0xff] }
 0x62d   : > { %v3237_v58 = vpop.permute.xlu1 %3236  ;;  %v3262_v36 = vpop.permute.xlu0 %3261  ;;  %v1385_v37 = vmax.f32 %v1369_v5, %v1382_v22  ;;  %v1386_v38 = vmax.f32 %v1370_v20, %v1380_v28  ;;  %v2954_v5 = vld [vmem:[%s4909_s5 + $0x28] sm:$0xff]  ;;  %v1506_v20 = vld [vmem:[%s4911_s7 + $0x1b8] sm:$0xff] }
 0x62e   : > { %v3239_v62 = vunpack.i.h.bf16 %v3237_v58  ;;  %v3238_v63 = vunpack.i.l.bf16 %v3237_v58  ;;  %1528 = vmatpush.msrb.mxu2 %v1455_v52  ;;  %1551 = vmatpush.msrb.mxu3 %v1487_v53  ;;  %v3264_v49 = vunpack.i.h.bf16 %v3262_v36  ;;  %v3263_v50 = vunpack.i.l.bf16 %v3262_v36  ;;  %v1472_v28 = vld [vmem:[%s4911_s7 + $0xa8] sm:$0xff]  ;;  %v1498_v36 = vld [vmem:[%s4911_s7 + $0x178] sm:$0xff] }
 0x62f   : > { %v1504_v22 = vld [vmem:[%s4911_s7 + $0x1a8] sm:$0xff] }
 0x630   : > { %v1427_v60 = vsel %vm546_vm3, %v3238_v63, %v3239_v62  ;;  %v1429_v10 = vsel %vm546_vm3, %v3239_v62, %v3238_v63  ;;  %1529 = vmatpush.msrb.mxu2 %v1453_v4  ;;  %1552 = vmatpush.msrb.mxu3 %v1485_v15  ;;  %v1428_v55 = vsel %vm546_vm3, %v3263_v50, %v3264_v49 }
 0x631   : > { %v1431_v3 = vmax.f32 %v1415_v47, %v1427_v60  ;;  %v1432_v0 = vmax.f32 %v1416_v1, %v1429_v10  ;;  %v1430_v58 = vsel %vm546_vm3, %v3264_v49, %v3263_v50  ;;  %v1456_v49 = vld [vmem:[%s4911_s7 + $0x28] sm:$0xff] }
 0x632   : > { %1530 = vmatpush.msrb.mxu2 %v1451_v11  ;;  %1553 = vmatpush.msrb.mxu3 %v1483_v12  ;;  %v1488_v50 = vld [vmem:[%s4911_s7 + $0x128] sm:$0xff] }
 0x633   : > { %v4120_v26 = vmax.f32 %v1431_v3, %v1443_v19  ;;  %v4122_v27 = vmax.f32 %v1432_v0, %v1445_v23  ;;  %v1514_v3 = vld [vmem:[%s4911_s7 + $0x1f8] sm:$0xff]  ;;  %v1476_v19 = vld [vmem:[%s4911_s7 + $0xc8] sm:$0xff] }
 0x634   : > { %v1478_v0 = vld [vmem:[%s4911_s7 + $0xd8] sm:$0xff]  ;;  %v1508_v23 = vld [vmem:[%s4911_s7 + $0x1c8] sm:$0xff] }
 0x635   : > { %v3252_v29 = vpop.permute.xlu1 %3251  ;;  %1531 = vmatmul.f32.vlgmr.msrb.gmra.mxu2 %v4120_v26  ;;  %1554 = vmatmul.f32.vlgmr.msrb.gmra.mxu3 %v4122_v27 }
 0x636   : > { %v3254_v32 = vunpack.i.h.bf16 %v3252_v29  ;;  %v3253_v35 = vunpack.i.l.bf16 %v3252_v29  ;;  %v1470_v29 = vld [vmem:[%s4911_s7 + $0x98] sm:$0xff] }
 0x638   : > { %v1396_v39 = vsel %vm532_vm5, %v3253_v35, %v3254_v32  ;;  %v1398_v41 = vsel %vm532_vm5, %v3254_v32, %v3253_v35  ;;  %v1500_v32 = vld [vmem:[%s4911_s7 + $0x188] sm:$0xff]  ;;  %v1466_v35 = vld [vmem:[%s4911_s7 + $0x78] sm:$0xff] }
 0x639   : > { %v1401_v42 = vmax.f32 %v1385_v37, %v1396_v39  ;;  %v1402_v43 = vmax.f32 %v1386_v38, %v1398_v41  ;;  %v1464_v37 = vld [vmem:[%s4911_s7 + $0x68] sm:$0xff]  ;;  %v1462_v39 = vld [vmem:[%s4911_s7 + $0x58] sm:$0xff] }
 0x63a   : > { %v1496_v38 = vld [vmem:[%s4911_s7 + $0x168] sm:$0xff]  ;;  %v1494_v41 = vld [vmem:[%s4911_s7 + $0x158] sm:$0xff] }
 0x63b   : > { %v1417_v52 = vmax.f32 %v1401_v42, %v1412_v44  ;;  %v1418_v53 = vmax.f32 %v1402_v43, %v1414_v45  ;;  %v1460_v42 = vld [vmem:[%s4911_s7 + $0x48] sm:$0xff]  ;;  %v1458_v44 = vld [vmem:[%s4911_s7 + $0x38] sm:$0xff] }
 0x63c   : > { %v1492_v43 = vld [vmem:[%s4911_s7 + $0x148] sm:$0xff]  ;;  %v1490_v45 = vld [vmem:[%s4911_s7 + $0x138] sm:$0xff] }
 0x63d   : > { %v3267_v54 = vpop.permute.xlu1 %3266  ;;  %v1433_v59 = vmax.f32 %v1417_v52, %v1428_v55  ;;  %v1434_v56 = vmax.f32 %v1418_v53, %v1430_v58  ;;  %v1454_v52 = vld [vmem:[%s4911_s7 + $0x18] sm:$0xff] }
 0x63e   : > { %v3269_v8 = vunpack.i.h.bf16 %v3267_v54  ;;  %v3268_v9 = vunpack.i.l.bf16 %v3267_v54  ;;  %v1486_v53 = vld [vmem:[%s4911_s7 + $0x118] sm:$0xff]  ;;  %v1452_v54 = vld [vmem:[%s4911_s7 + $0x8] sm:$0xff] }
 0x640   : > { %v1444_v62 = vsel %vm553_vm1, %v3268_v9, %v3269_v8  ;;  %v1446_v63 = vsel %vm553_vm1, %v3269_v8, %v3268_v9  ;;  %v1484_v8 = vld [vmem:[%s4911_s7 + $0x108] sm:$0xff]  ;;  %v1613_v9 = vpop.permute.xlu2 %1612 }
 0x641   : > { %v4146_v4 = vmax.f32 %v1433_v59, %v1444_v62  ;;  %v4148_v15 = vmax.f32 %v1434_v56, %v1446_v63  ;;  %v1609_v56 = vpop.permute.xlu0 %1608 }
 0x643   : > { %1534 = vmatmul.f32.gmra.mxu2 %v4146_v4  ;;  %1557 = vmatmul.f32.gmra.mxu3 %v4148_v15 }
 0x696   : > { %v1215_v16 = vpop.f32.mrf.mxu2  ;;  %v1235_v47 = vpop.f32.mrf.mxu3 }
 0x697   : > { %v1242_v1 = vmul.f32 %v3917_v30, %v1215_v16  ;;  %v1243_v51 = vmul.f32 %v3917_v30, %v1235_v47  ;;  %v1480_v30 = vld [vmem:[%s4911_s7 + $0xe8] sm:$0xff] }
 0x699   : > { %v1248_v60 = vadd.f32 %v3968_v21, %v1242_v1  ;;  %v1249_v10 = vadd.f32 %v3968_v21, %v1243_v51  ;;  %v1512_v21 = vld [vmem:[%s4911_s7 + $0x1e8] sm:$0xff]  ;;  %v1621_v1 = vpop.permute.xlu2 %1620  ;;  %v1625_v51 = vpop.permute.xlu1 %1624 }
 0x69b   : > { %v1250_v11 = vmax.f32 %v1248_v60, 0.0  ;;  %v1251_v12 = vmax.f32 %v1249_v10, 0.0 }
 0x69d   : > { %2955 = vmatpush.msk.msrb.mxu0 %vm580_vm2, %v1250_v11  ;;  %2958 = vmatpush.msk.msrb.mxu1 %vm580_vm2, %v1251_v12  ;;  %v2961_v12 = vld [vmem:[%s4907_s3 + $0xc] sm:$0xf] }
 0x69e   : > { %2956 = vmatmul.msk.f32.vlgmr.msrb.gmra.mxu0 %vm656_vm11, %v2953_v13  ;;  %2959 = vmatmul.msk.f32.vlgmr.msrb.gmra.mxu1 %vm656_vm11, %v2953_v13 }
 0x69f   : > { %1561 = vmatpush.msra.mxu0 %v1482_v14  ;;  %1584 = vmatpush.msra.mxu1 %v1514_v3  ;;  %v3448_v3 = vmov 13  }
 0x6a0   : > { %3275 = vset.pattern.permute.xlu2 %v3448_v3 }
 0x6a1   : > { %1562 = vmatpush.msra.mxu0 %v1480_v30  ;;  %1585 = vmatpush.msra.mxu1 %v1512_v21 }
 0x6a3   : > { %1563 = vmatpush.msra.mxu0 %v1478_v0  ;;  %1586 = vmatpush.msra.mxu1 %v1510_v48 }
 0x6a5   : > { %1564 = vmatpush.msra.mxu0 %v1476_v19  ;;  %1587 = vmatpush.msra.mxu1 %v1508_v23 }
 0x6a6   : > { %2957 = vmatmul.msk.f32.gmra.mxu0 %vm656_vm11, %v2954_v5  ;;  %2960 = vmatmul.msk.f32.gmra.mxu1 %vm656_vm11, %v2954_v5 }
 0x6a7   : > { %1565 = vmatpush.msra.mxu0 %v1474_v24  ;;  %1588 = vmatpush.msra.mxu1 %v1506_v20 }
 0x6a9   : > { %1566 = vmatpush.msra.mxu0 %v1472_v28  ;;  %1589 = vmatpush.msra.mxu1 %v1504_v22 }
 0x6ab   : > { %1567 = vmatpush.msra.mxu0 %v1470_v29  ;;  %1590 = vmatpush.msra.mxu1 %v1502_v61 }
 0x6ad   : > { %1568 = vmatpush.msra.mxu0 %v1468_v31  ;;  %1591 = vmatpush.msra.mxu1 %v1500_v32 }
 0x6af   : > { %1569 = vmatpush.msra.mxu0 %v1466_v35  ;;  %1592 = vmatpush.msra.mxu1 %v1498_v36  ;;  %v388_v36 = vld [vmem:[%s4914_s10] sm:$0x3] }
 0x6b1   : > { %1570 = vmatpush.msra.mxu0 %v1464_v37  ;;  %1593 = vmatpush.msra.mxu1 %v1496_v38 }
 0x6b3   : > { %1571 = vmatpush.msra.mxu0 %v1462_v39  ;;  %1594 = vmatpush.msra.mxu1 %v1494_v41  ;;  %v4306_v39 = vperm.slane %v388_v36, 0 }
 0x6b5   : > { %1572 = vmatpush.msra.mxu0 %v1460_v42  ;;  %1595 = vmatpush.msra.mxu1 %v1492_v43 }
 0x6b7   : > { %1573 = vmatpush.msra.mxu0 %v1458_v44  ;;  %1596 = vmatpush.msra.mxu1 %v1490_v45 }
 0x6b8   : > { %v1532_v55 = vpop.f32.mrf.mxu2  ;;  %v1555_v58 = vpop.f32.mrf.mxu3 }
 0x6b9   : > { %1574 = vmatpush.msra.mxu0 %v1456_v49  ;;  %1597 = vmatpush.msra.mxu1 %v1488_v50  ;;  %v4266_v59 = vadd.f32 %v1555_v58, %v1532_v55  ;;  %v4313_v49 = vperm.slane %v388_v36, 1 }
 0x6bb   : > { %1575 = vmatpush.msra.mxu0 %v1454_v52  ;;  %1598 = vmatpush.msra.mxu1 %v1486_v53  ;;  %v1615_v16 = vmul.f32 %v1609_v56, %v4266_v59 }
 0x6bd   : > { %1576 = vmatpush.msra.mxu0 %v1452_v54  ;;  %1599 = vmatpush.msra.mxu1 %v1484_v8  ;;  %v4332_v8 = vld [vmem:[%s4905_s1 + $0x8] sm:$0xff] }
 0x6be   : > { %1577 = vmatmul.f32.vlgmr.msra.gmra.mxu0 %v4120_v26  ;;  %1600 = vmatmul.f32.vlgmr.msra.gmra.mxu1 %v4122_v27  ;;  %v1627_v26 = vadd.f32 %v1621_v1, %v1615_v16 }
 0x6c0   : > { %v1631_v11 = vmax.f32 %v1627_v26, 0.0 }
 0x6c6   : > { %v1535_v62 = vpop.f32.mrf.mxu2  ;;  %v1558_v63 = vpop.f32.mrf.mxu3  ;;  %1580 = vmatmul.f32.gmra.mxu0 %v4146_v4  ;;  %1603 = vmatmul.f32.gmra.mxu1 %v4148_v15  ;;  %v3447_v4 = vmov 12   ;;  %v4282_v15 = vld [vmem:[%s4906_s2] sm:$0xf] }
 0x6c7   : > { %v4271_v47 = vadd.f32 %v1558_v63, %v1535_v62  ;;  %3274 = vset.pattern.permute.xlu1 %v3447_v4  ;;  %1687 = vperm.xlu2 %3275, %v4282_v15   ;;  %v3449_v62 = vmov 14   ;;  %v3450_v63 = vmov 15  }
 0x6c8   : > { %1681 = vperm.xlu1 %3274, %v4282_v15   ;;  %3311 = vset.pattern.permute.xlu0 %v3449_v62 }
 0x6c9   : > { %v1617_v60 = vmul.f32 %v1613_v9, %v4271_v47 }
 0x6cb   : > { %v1629_v10 = vadd.f32 %v1625_v51, %v1617_v60 }
 0x6cd   : > { %v1633_v27 = vmax.f32 %v1629_v10, 0.0 }
 0x6cf   : > { %1654 = vmatpush.msra.mxu2 %v1633_v27  ;;  %3313 = vset.pattern.permute.xlu2 %v3444_v7 }
 0x6d0   : > { %3312 = vset.pattern.permute.xlu1 %v3450_v63 }
 0x6d1   : > { %1655 = vmatpush.msra.mxu2 %v1631_v11 }
 0x6d2   : > { %2962 = vmatmul.msk.f32.vlgmr.msra.gmra.mxu2 %vm436_vm0, %v2961_v12 }
 0x71b   : > { %v4285_v13 = vpop.f32.mrf.mxu0  ;;  %v4287_v14 = vpop.f32.mrf.mxu1 }
 0x721   : > { %v1688_v37 = vpop.permute.xlu2 %1687 }
 0x723   : > { %v4291_v30 = vpop.f32.mrf.mxu0  ;;  %v4293_v21 = vpop.f32.mrf.mxu1 }
 0x73a   : > { %v1682_v35 = vpop.permute.xlu1 %1681 }
 0x73b   : > { %v1578_v0 = vpop.f32.mrf.mxu0  ;;  %v1601_v48 = vpop.f32.mrf.mxu1 }
 0x73c   : > { %v4296_v19 = vadd.f32 %v1601_v48, %v1578_v0 }
 0x73e   : > { %v1616_v24 = vmul.f32 %v1609_v56, %v4296_v19 }
 0x740   : > { %v1628_v29 = vadd.f32 %v1621_v1, %v1616_v24 }
 0x742   : > { %v1632_v31 = vmax.f32 %v1628_v29, 0.0 }
 0x743   : > { %v1581_v23 = vpop.f32.mrf.mxu0  ;;  %v1604_v5 = vpop.f32.mrf.mxu1 }
 0x744   : > { %v4299_v20 = vadd.f32 %v1604_v5, %v1581_v23 }
 0x746   : > { %v1618_v28 = vmul.f32 %v1613_v9, %v4299_v20 }
 0x748   : > { %v1630_v22 = vadd.f32 %v1625_v51, %v1618_v28 }
 0x74a   : > { %v1634_v61 = vmax.f32 %v1630_v22, 0.0 }
 0x74c   : > { %1674 = vmatpush.msra.mxu3 %v1634_v61 }
 0x74e   : > { %1675 = vmatpush.msra.mxu3 %v1632_v31 }
 0x74f   : > { %2963 = vmatmul.msk.f32.vlgmr.msra.gmra.mxu3 %vm436_vm0, %v2961_v12  ;;  %v4356_v12 = vld [vmem:[%s4905_s1] sm:$0xff] }
 0x755   : > { %v1657_v32 = vpop.f32.mrf.mxu2 }
 0x756   : > { %v1684_v38 = vmul.f32 %v1682_v35, %v1657_v32 }
 0x758   : > { %v1690_v41 = vadd.f32 %v1688_v37, %v1684_v38 }
 0x75a   : > { %v1692_v42 = vmax.f32 %v1690_v41, 0.0 }
 0x75c   : > { %v4309_v43 = vmul.f32 %v1692_v42, %v4306_v39 }
 0x75e   : > { %1738 = vrot.lane.b32.xlu1 %v4309_v43, %s3429_s14 }
 0x7d0   : > { %v1739_v9 = vpop.permute.xlu1 %1738 }
 0x7d2   : > { %v1677_v44 = vpop.f32.mrf.mxu3 }
 0x7d3   : > { %v1685_v45 = vmul.f32 %v1682_v35, %v1677_v44 }
 0x7d5   : > { %v1691_v50 = vadd.f32 %v1688_v37, %v1685_v45 }
 0x7d7   : > { %v1693_v52 = vmax.f32 %v1691_v50, 0.0 }
 0x7d9   : > { %v4316_v53 = vmul.f32 %v1693_v52, %v4313_v49 }
 0x7db   : > { %1740 = vrot.lane.b32.xlu2 %v4316_v53, %s3429_s14  ;;  %v3286_v54 = vpack.i.bf16 %v4316_v53, %v4309_v43 }
 0x7dd   : > { %3287 = vrot.lane.b32.xlu1 %v3286_v54, %s3432_s19  ;;  %3277 = vrot.lane.b32.xlu0 %v3286_v54, %s3430_s15 }
 0x7e3   : > { %3292 = vrot.lane.b32.xlu2 %v3286_v54, %s3431_s16 }
 0x7e5   : > { %3302 = vrot.lane.b32.xlu1 %v3286_v54, %s3435_s22  ;;  %3282 = vrot.lane.b32.xlu0 %v3286_v54, %s3433_s20 }
 0x7eb   : > { %3307 = vrot.lane.b32.xlu2 %v3286_v54, %s4919_s21 }
 0x7ed   : > { %3297 = vrot.lane.b32.xlu0 %v3286_v54, %s4920_s25  ;;  %1834 = vperm.xlu1 %3312, %v4282_v15  }
 0x7f3   : > { %1911 = vperm.xlu2 %3313, %v4332_v8  }
 0x7f5   : > { %1828 = vperm.xlu0 %3311, %v4282_v15   ;;  %3314 = vset.pattern.permute.xlu1 %v3444_v7 }
 0x7f6   : > { %1907 = vperm.xlu1 %3314, %v4356_v12  }
 0x7fb   : > { %3315 = vset.pattern.permute.xlu2 %v3443_v2 }
 0x7fc   : > { %1923 = vperm.xlu2 %3315, %v4332_v8  }
 0x7fd   : > { %3316 = vset.pattern.permute.xlu0 %v3443_v2 }
 0x7fe   : > { %1919 = vperm.xlu0 %3316, %v4356_v12  }
 0x806   : > { %3356 = vset.pattern.permute.xlu0 %v3447_v4 }
 0x835   : > { %v1741_v55 = vpop.permute.xlu2 %1740 }
 0x836   : > { %v1742_v58 = vsel %vm553_vm1, %v1739_v9, %v1741_v55  ;;  %v1743_v56 = vsel %vm553_vm1, %v1741_v55, %v1739_v9 }
 0x837   : > { %2965 = vmatpush.msk.msrb.mxu0 %vm580_vm2, %v1742_v58  ;;  %2967 = vmatpush.msk.msrb.mxu1 %vm580_vm2, %v1743_v56 }
 0x83d   : > { %v3293_v0 = vpop.permute.xlu2 %3292 }
 0x83e   : > { %v3295_v28 = vunpack.i.h.bf16 %v3293_v0  ;;  %v3294_v22 = vunpack.i.l.bf16 %v3293_v0 }
 0x840   : > { %v1718_v37 = vsel %vm525_vm6, %v3294_v22, %v3295_v28  ;;  %v1719_v38 = vsel %vm525_vm6, %v3295_v28, %v3294_v22 }
 0x841   : > { %v1752_v58 = vrot.slane %v1719_v38, 4  ;;  %v1753_v56 = vrot.slane %v1718_v37, 4  ;;  %v2969_v38 = vld [vmem:[%s4909_s5 + $0x30] sm:$0xff] }
 0x845   : > { %v3308_v54 = vpop.permute.xlu2 %3307 }
 0x84f   : > { %v3288_v16 = vpop.permute.xlu1 %3287  ;;  %v3278_v1 = vpop.permute.xlu0 %3277 }
 0x850   : > { %v3290_v51 = vunpack.i.h.bf16 %v3288_v16  ;;  %v3289_v60 = vunpack.i.l.bf16 %v3288_v16  ;;  %v3280_v26 = vunpack.i.h.bf16 %v3278_v1  ;;  %v3279_v10 = vunpack.i.l.bf16 %v3278_v1 }
 0x852   : > { %v1736_v27 = vsel %vm546_vm3, %v3279_v10, %v3280_v26  ;;  %v1737_v11 = vsel %vm546_vm3, %v3280_v26, %v3279_v10  ;;  %v1730_v2 = vsel %vm539_vm4, %v3289_v60, %v3290_v51  ;;  %v1731_v7 = vsel %vm539_vm4, %v3290_v51, %v3289_v60 }
 0x853   : > { %v1764_v48 = vrot.slane %v1736_v27, 4  ;;  %v1765_v23 = vrot.slane %v1737_v11, 4  ;;  %v3310_v60 = vunpack.i.h.bf16 %v3308_v54  ;;  %v3309_v26 = vunpack.i.l.bf16 %v3308_v54 }
 0x855   : > { %v1774_v5 = vsel %vm580_vm2, %v1730_v2, %v1764_v48  ;;  %v1775_v24 = vsel %vm580_vm2, %v1731_v7, %v1765_v23  ;;  %v1701_v48 = vsel %vm504_vm9, %v3310_v60, %v3309_v26  ;;  %v1700_v23 = vsel %vm504_vm9, %v3309_v26, %v3310_v60  ;;  %v2964_v2 = vld [vmem:[%s4908_s4 + $0xc] sm:$0xf] }
 0x856   : > { %1799 = vmatpush.msrb.mxu0 %v1774_v5  ;;  %1819 = vmatpush.msrb.mxu1 %v1775_v24 }
 0x857   : > { %v3303_v29 = vpop.permute.xlu1 %3302  ;;  %v3283_v61 = vpop.permute.xlu0 %3282 }
 0x858   : > { %v3305_v31 = vunpack.i.h.bf16 %v3303_v29  ;;  %v3304_v32 = vunpack.i.l.bf16 %v3303_v29  ;;  %v3285_v35 = vunpack.i.h.bf16 %v3283_v61  ;;  %v3284_v36 = vunpack.i.l.bf16 %v3283_v61 }
 0x85a   : > { %v1724_v41 = vsel %vm532_vm5, %v3284_v36, %v3285_v35  ;;  %v1725_v42 = vsel %vm532_vm5, %v3285_v35, %v3284_v36  ;;  %v1713_v50 = vsel %vm518_vm7, %v3305_v31, %v3304_v32  ;;  %v1712_v52 = vsel %vm518_vm7, %v3304_v32, %v3305_v31 }
 0x85b   : > { %v1758_v44 = vrot.slane %v1724_v41, 4  ;;  %v1759_v45 = vrot.slane %v1725_v42, 4  ;;  %v1770_v1 = vsel %vm580_vm2, %v1713_v50, %v1752_v58  ;;  %v1771_v51 = vsel %vm580_vm2, %v1712_v52, %v1753_v56  ;;  %v2970_v41 = vld [vmem:[%s4909_s5 + $0x38] sm:$0xff]  ;;  %v1912_v52 = vpop.permute.xlu2 %1911 }
 0x85c   : > { %v3451_v42 = vmov 16  }
 0x85d   : > { %v1772_v9 = vsel %vm580_vm2, %v4309_v43, %v1758_v44  ;;  %v1773_v55 = vsel %vm580_vm2, %v4316_v53, %v1759_v45  ;;  %3317 = vset.pattern.permute.xlu1 %v3451_v42  ;;  %v3452_v44 = vmov 17  }
 0x85e   : > { %1800 = vmatpush.msrb.mxu0 %v1772_v9  ;;  %1820 = vmatpush.msrb.mxu1 %v1773_v55 }
 0x85f   : > { %v3298_v16 = vpop.permute.xlu0 %3297  ;;  %v1835_v28 = vpop.permute.xlu1 %1834  ;;  %3318 = vset.pattern.permute.xlu2 %v3452_v44  ;;  %1980 = vperm.xlu1 %3317, %v4282_v15  }
 0x860   : > { %v3300_v10 = vunpack.i.h.bf16 %v3298_v16  ;;  %v3299_v27 = vunpack.i.l.bf16 %v3298_v16  ;;  %1801 = vmatpush.msrb.mxu0 %v1770_v1  ;;  %1821 = vmatpush.msrb.mxu1 %v1771_v51 }
 0x861   : > { %1986 = vperm.xlu2 %3318, %v4282_v15  }
 0x862   : > { %v1706_v43 = vsel %vm511_vm8, %v3299_v27, %v3300_v10  ;;  %v1707_v53 = vsel %vm511_vm8, %v3300_v10, %v3299_v27 }
 0x863   : > { %v1746_v11 = vrot.slane %v1707_v53, 4  ;;  %v1747_v0 = vrot.slane %v1706_v43, 4  ;;  %v1924_v43 = vpop.permute.xlu2 %1923 }
 0x865   : > { %v1768_v7 = vsel %vm580_vm2, %v1701_v48, %v1746_v11  ;;  %v1769_v5 = vsel %vm580_vm2, %v1700_v23, %v1747_v0 }
 0x866   : > { %1802 = vmatpush.msrb.mxu0 %v1768_v7  ;;  %1822 = vmatpush.msrb.mxu1 %v1769_v5 }
 0x867   : > { %2966 = vmatmul.msk.f32.vlgmr.msrb.gmra.mxu0 %vm590_vm10, %v2964_v2  ;;  %2968 = vmatmul.msk.f32.vlgmr.msrb.gmra.mxu1 %vm590_vm10, %v2964_v2  ;;  %v1829_v24 = vpop.permute.xlu0 %1828 }
 0x868   : > { %v1908_v56 = vpop.permute.xlu1 %1907 }
 0x870   : > { %v1920_v27 = vpop.permute.xlu0 %1919 }
 0x8e4   : > { %v1804_v22 = vpop.f32.mrf.mxu0  ;;  %v1824_v29 = vpop.f32.mrf.mxu1 }
 0x8e5   : > { %v1831_v61 = vmul.f32 %v1829_v24, %v1804_v22  ;;  %v1832_v31 = vmul.f32 %v1829_v24, %v1824_v29  ;;  %v2977_v24 = vld [vmem:[%s4907_s3 + $0x10] sm:$0xf]  ;;  %v1987_v22 = vpop.permute.xlu2 %1986 }
 0x8e7   : > { %v1837_v32 = vadd.f32 %v1835_v28, %v1831_v61  ;;  %v1838_v35 = vadd.f32 %v1835_v28, %v1832_v31  ;;  %v1981_v28 = vpop.permute.xlu1 %1980 }
 0x8e9   : > { %v1839_v36 = vmax.f32 %v1837_v32, 0.0  ;;  %v1840_v37 = vmax.f32 %v1838_v35, 0.0 }
 0x8eb   : > { %2971 = vmatpush.msk.msrb.mxu2 %vm580_vm2, %v1839_v36  ;;  %2974 = vmatpush.msk.msrb.mxu3 %vm580_vm2, %v1840_v37 }
 0x8ec   : > { %2972 = vmatmul.msk.f32.vlgmr.msrb.gmra.mxu2 %vm656_vm11, %v2969_v38  ;;  %2975 = vmatmul.msk.f32.vlgmr.msrb.gmra.mxu3 %vm656_vm11, %v2969_v38 }
 0x8f4   : > { %2973 = vmatmul.msk.f32.gmra.mxu2 %vm656_vm11, %v2970_v41  ;;  %2976 = vmatmul.msk.f32.gmra.mxu3 %vm656_vm11, %v2970_v41 }
 0x96f   : > { %v1873_v45 = vpop.f32.mrf.mxu2  ;;  %v1896_v50 = vpop.f32.mrf.mxu3 }
 0x970   : > { %v1874_v54 = vadd.f32 %v1873_v45, %v4266_v59  ;;  %v1897_v9 = vadd.f32 %v1896_v50, %v4296_v19  ;;  %v3453_v50 = vmov 18  }
 0x971   : > { %3354 = vset.pattern.permute.xlu1 %v3453_v50 }
 0x972   : > { %v4417_v55 = vmul.f32 %v1874_v54, %v4306_v39  ;;  %v4420_v58 = vmul.f32 %v1897_v9, %v4313_v49 }
 0x974   : > { %v1914_v26 = vmul.f32 %v1908_v56, %v4417_v55  ;;  %v1915_v10 = vmul.f32 %v1908_v56, %v4420_v58 }
 0x976   : > { %v1926_v0 = vadd.f32 %v1920_v27, %v1914_v26 }
 0x977   : > { %v1876_v16 = vpop.f32.mrf.mxu2  ;;  %v1899_v1 = vpop.f32.mrf.mxu3 }
 0x978   : > { %v1877_v51 = vadd.f32 %v1876_v16, %v4271_v47  ;;  %v1900_v60 = vadd.f32 %v1899_v1, %v4299_v20  ;;  %v1927_v47 = vadd.f32 %v1920_v27, %v1915_v10  ;;  %v1930_v7 = vmax.f32 %v1926_v0, 0.0 }
 0x97a   : > { %v4427_v59 = vmul.f32 %v1877_v51, %v4306_v39  ;;  %v4430_v19 = vmul.f32 %v1900_v60, %v4313_v49  ;;  %v1931_v5 = vmax.f32 %v1927_v47, 0.0 }
 0x97c   : > { %v1916_v53 = vmul.f32 %v1912_v52, %v4427_v59  ;;  %v1917_v11 = vmul.f32 %v1912_v52, %v4430_v19  ;;  %v3454_v52 = vmov 19  }
 0x97d   : > { %3355 = vset.pattern.permute.xlu2 %v3454_v52 }
 0x97e   : > { %v1928_v48 = vadd.f32 %v1924_v43, %v1916_v53  ;;  %v1929_v20 = vadd.f32 %v1924_v43, %v1917_v11 }
 0x980   : > { %v1932_v23 = vmax.f32 %v1928_v48, 0.0  ;;  %v1933_v2 = vmax.f32 %v1929_v20, 0.0 }
 0x982   : > { %1953 = vmatpush.msra.mxu0 %v1932_v23  ;;  %1973 = vmatpush.msra.mxu1 %v1933_v2 }
 0x984   : > { %1954 = vmatpush.msra.mxu0 %v1930_v7  ;;  %1974 = vmatpush.msra.mxu1 %v1931_v5 }
 0x985   : > { %2978 = vmatmul.msk.f32.vlgmr.msra.gmra.mxu0 %vm436_vm0, %v2977_v24  ;;  %2979 = vmatmul.msk.f32.vlgmr.msra.gmra.mxu1 %vm436_vm0, %v2977_v24 }
 0xa02   : > { %v1956_v29 = vpop.f32.mrf.mxu0  ;;  %v1976_v61 = vpop.f32.mrf.mxu1 }
 0xa03   : > { %v1983_v31 = vmul.f32 %v1981_v28, %v1956_v29  ;;  %v1984_v32 = vmul.f32 %v1981_v28, %v1976_v61 }
 0xa05   : > { %v1989_v35 = vadd.f32 %v1987_v22, %v1983_v31  ;;  %v1990_v36 = vadd.f32 %v1987_v22, %v1984_v32 }
 0xa07   : > { %v1991_v37 = vmax.f32 %v1989_v35, 0.0  ;;  %v1992_v38 = vmax.f32 %v1990_v36, 0.0 }
 0xa09   : > { %v4440_v41 = vmul.f32 %v1991_v37, %v4306_v39  ;;  %v4443_v42 = vmul.f32 %v1992_v38, %v4313_v49 }
 0xa0b   : > { %2039 = vrot.lane.b32.xlu0 %v4443_v42, %s3429_s14  ;;  %2037 = vrot.lane.b32.xlu2 %v4440_v41, %s3429_s14  ;;  %v3319_v44 = vpack.i.bf16 %v4443_v42, %v4440_v41 }
 0xa0d   : > { %3320 = vrot.lane.b32.xlu1 %v3319_v44, %s3430_s15 }
 0xa13   : > { %3335 = vrot.lane.b32.xlu0 %v3319_v44, %s3431_s16  ;;  %3330 = vrot.lane.b32.xlu2 %v3319_v44, %s3432_s19 }
 0xa15   : > { %3325 = vrot.lane.b32.xlu1 %v3319_v44, %s3433_s20 }
 0xa1b   : > { %3350 = vrot.lane.b32.xlu0 %v3319_v44, %s4919_s21  ;;  %3345 = vrot.lane.b32.xlu2 %v3319_v44, %s3435_s22 }
 0xa1d   : > { %3340 = vrot.lane.b32.xlu1 %v3319_v44, %s4920_s25 }
 0xa23   : > { %2366 = vperm.xlu0 %3356, %v4332_v8   ;;  %2133 = vperm.xlu2 %3355, %v4282_v15  }
 0xa25   : > { %2127 = vperm.xlu1 %3354, %v4282_v15  }
 0xa2b   : > { %3361 = vset.pattern.permute.xlu0 %v3449_v62  ;;  %3358 = vset.pattern.permute.xlu2 %v3448_v3 }
 0xa2c   : > { %2444 = vperm.xlu0 %3361, %v4356_v12   ;;  %2378 = vperm.xlu2 %3358, %v4332_v8  }
 0xa2d   : > { %3357 = vset.pattern.permute.xlu1 %v3447_v4 }
 0xa2e   : > { %2362 = vperm.xlu1 %3357, %v4356_v12  }
 0xa34   : > { %3366 = vset.pattern.permute.xlu0 %v3446_v57  ;;  %3360 = vset.pattern.permute.xlu2 %v3449_v62 }
 0xa35   : > { %2567 = vperm.xlu0 %3366, %v4332_v8   ;;  %2448 = vperm.xlu2 %3360, %v4332_v8  }
 0xa36   : > { %3359 = vset.pattern.permute.xlu1 %v3448_v3 }
 0xa37   : > { %2374 = vperm.xlu1 %3359, %v4356_v12  }
 0xa3d   : > { %3363 = vset.pattern.permute.xlu2 %v3450_v63 }
 0xa3e   : > { %2456 = vperm.xlu2 %3363, %v4356_v12  }
 0xa3f   : > { %3362 = vset.pattern.permute.xlu1 %v3450_v63  ;;  %v2235_v63 = vld [vmem:[%s4912_s8 + $0xf0] sm:$0xff] }
 0xa40   : > { %2460 = vperm.xlu1 %3362, %v4332_v8  }
 0xa46   : > { %3365 = vset.pattern.permute.xlu2 %v3445_v40 }
 0xa47   : > { %2551 = vperm.xlu2 %3365, %v4356_v12  }
 0xa48   : > { %3364 = vset.pattern.permute.xlu1 %v3445_v40  ;;  %v2233_v40 = vld [vmem:[%s4912_s8 + $0xe0] sm:$0xff] }
 0xa49   : > { %2555 = vperm.xlu1 %3364, %v4332_v8   ;;  %v2231_v8 = vld [vmem:[%s4912_s8 + $0xd0] sm:$0xff] }
 0xa51   : > { %3367 = vset.pattern.permute.xlu1 %v3446_v57  ;;  %v2265_v57 = vld [vmem:[%s4912_s8 + $0x1e0] sm:$0xff] }
 0xa52   : > { %2563 = vperm.xlu1 %3367, %v4356_v12   ;;  %v2263_v12 = vld [vmem:[%s4912_s8 + $0x1d0] sm:$0xff] }
 0xa65   : > { %v2038_v45 = vpop.permute.xlu2 %2037 }
 0xa6d   : > { %v3331_v54 = vpop.permute.xlu2 %3330 }
 0xa6e   : > { %v3333_v51 = vunpack.i.h.bf16 %v3331_v54  ;;  %v3332_v60 = vunpack.i.l.bf16 %v3331_v54 }
 0xa70   : > { %v2029_v11 = vsel %vm539_vm4, %v3332_v60, %v3333_v51  ;;  %v2030_v4 = vsel %vm539_vm4, %v3333_v51, %v3332_v60 }
 0xa75   : > { %v3346_v2 = vpop.permute.xlu2 %3345 }
 0xa76   : > { %v3348_v29 = vunpack.i.h.bf16 %v3346_v2  ;;  %v3347_v61 = vunpack.i.l.bf16 %v3346_v2  ;;  %v2223_v2 = vld [vmem:[%s4912_s8 + $0x90] sm:$0xff] }
 0xa78   : > { %v2012_v3 = vsel %vm518_vm7, %v3348_v29, %v3347_v61  ;;  %v2011_v62 = vsel %vm518_vm7, %v3347_v61, %v3348_v29  ;;  %v2251_v29 = vld [vmem:[%s4912_s8 + $0x170] sm:$0xff] }
 0xa7d   : > { %v2040_v9 = vpop.permute.xlu0 %2039  ;;  %v2134_v61 = vpop.permute.xlu2 %2133 }
 0xa7e   : > { %v2041_v56 = vsel %vm553_vm1, %v2038_v45, %v2040_v9  ;;  %v2042_v16 = vsel %vm553_vm1, %v2040_v9, %v2038_v45 }
 0xa7f   : > { %2981 = vmatpush.msk.msrb.mxu0 %vm580_vm2, %v2041_v56  ;;  %2983 = vmatpush.msk.msrb.mxu1 %vm580_vm2, %v2042_v16  ;;  %v3321_v1 = vpop.permute.xlu1 %3320 }
 0xa80   : > { %v3323_v26 = vunpack.i.h.bf16 %v3321_v1  ;;  %v3322_v10 = vunpack.i.l.bf16 %v3321_v1 }
 0xa82   : > { %v2035_v15 = vsel %vm546_vm3, %v3322_v10, %v3323_v26  ;;  %v2036_v27 = vsel %vm546_vm3, %v3323_v26, %v3322_v10 }
 0xa83   : > { %v2063_v43 = vrot.slane %v2035_v15, 4  ;;  %v2064_v53 = vrot.slane %v2036_v27, 4  ;;  %v2980_v27 = vld [vmem:[%s4908_s4 + $0x10] sm:$0xf] }
 0xa85   : > { %v3336_v0 = vpop.permute.xlu0 %3335  ;;  %v2073_v47 = vsel %vm580_vm2, %v2029_v11, %v2063_v43  ;;  %v2074_v48 = vsel %vm580_vm2, %v2030_v4, %v2064_v53  ;;  %v2267_v11 = vld [vmem:[%s4912_s8 + $0x1f0] sm:$0xff]  ;;  %v2229_v4 = vld [vmem:[%s4912_s8 + $0xc0] sm:$0xff] }
 0xa86   : > { %v3338_v20 = vunpack.i.h.bf16 %v3336_v0  ;;  %v3337_v23 = vunpack.i.l.bf16 %v3336_v0  ;;  %2098 = vmatpush.msrb.mxu0 %v2073_v47  ;;  %2118 = vmatpush.msrb.mxu1 %v2074_v48  ;;  %v2261_v0 = vld [vmem:[%s4912_s8 + $0x1c0] sm:$0xff]  ;;  %v2227_v47 = vld [vmem:[%s4912_s8 + $0xb0] sm:$0xff] }
 0xa87   : > { %v3326_v7 = vpop.permute.xlu1 %3325  ;;  %v2259_v48 = vld [vmem:[%s4912_s8 + $0x1b0] sm:$0xff] }
 0xa88   : > { %v2017_v5 = vsel %vm525_vm6, %v3337_v23, %v3338_v20  ;;  %v2018_v24 = vsel %vm525_vm6, %v3338_v20, %v3337_v23  ;;  %v3328_v28 = vunpack.i.h.bf16 %v3326_v7  ;;  %v3327_v22 = vunpack.i.l.bf16 %v3326_v7  ;;  %v2225_v20 = vld [vmem:[%s4912_s8 + $0xa0] sm:$0xff]  ;;  %v2255_v7 = vld [vmem:[%s4912_s8 + $0x190] sm:$0xff] }
 0xa89   : > { %v2051_v37 = vrot.slane %v2018_v24, 4  ;;  %v2052_v38 = vrot.slane %v2017_v5, 4  ;;  %v2257_v23 = vld [vmem:[%s4912_s8 + $0x1a0] sm:$0xff] }
 0xa8a   : > { %v2023_v31 = vsel %vm532_vm5, %v3327_v22, %v3328_v28  ;;  %v2024_v32 = vsel %vm532_vm5, %v3328_v28, %v3327_v22  ;;  %v2221_v5 = vld [vmem:[%s4912_s8 + $0x80] sm:$0xff]  ;;  %v2219_v22 = vld [vmem:[%s4912_s8 + $0x70] sm:$0xff] }
 0xa8b   : > { %v2057_v35 = vrot.slane %v2023_v31, 4  ;;  %v2058_v36 = vrot.slane %v2024_v32, 4  ;;  %v2069_v54 = vsel %vm580_vm2, %v2012_v3, %v2051_v37  ;;  %v2070_v9 = vsel %vm580_vm2, %v2011_v62, %v2052_v38  ;;  %v2253_v24 = vld [vmem:[%s4912_s8 + $0x180] sm:$0xff] }
 0xa8d   : > { %v3351_v44 = vpop.permute.xlu0 %3350  ;;  %v2071_v45 = vsel %vm580_vm2, %v4440_v41, %v2057_v35  ;;  %v2072_v50 = vsel %vm580_vm2, %v4443_v42, %v2058_v36  ;;  %v2217_v35 = vld [vmem:[%s4912_s8 + $0x60] sm:$0xff] }
 0xa8e   : > { %2099 = vmatpush.msrb.mxu0 %v2071_v45  ;;  %2119 = vmatpush.msrb.mxu1 %v2072_v50  ;;  %v3353_v56 = vunpack.i.h.bf16 %v3351_v44  ;;  %v3352_v16 = vunpack.i.l.bf16 %v3351_v44  ;;  %v2249_v36 = vld [vmem:[%s4912_s8 + $0x160] sm:$0xff]  ;;  %v2215_v44 = vld [vmem:[%s4912_s8 + $0x50] sm:$0xff] }
 0xa8f   : > { %v3341_v52 = vpop.permute.xlu1 %3340  ;;  %v2247_v45 = vld [vmem:[%s4912_s8 + $0x150] sm:$0xff] }
 0xa90   : > { %v3343_v1 = vunpack.i.h.bf16 %v3341_v52  ;;  %v3342_v41 = vunpack.i.l.bf16 %v3341_v52  ;;  %2100 = vmatpush.msrb.mxu0 %v2069_v54  ;;  %2120 = vmatpush.msrb.mxu1 %v2070_v9  ;;  %v2000_v10 = vsel %vm504_vm9, %v3353_v56, %v3352_v16  ;;  %v1999_v15 = vsel %vm504_vm9, %v3352_v16, %v3353_v56  ;;  %v2985_v54 = vld [vmem:[%s4909_s5 + $0x40] sm:$0xff]  ;;  %v2236_v9 = vld [vmem:[%s4912_s8 + $0xf8] sm:$0xff] }
 0xa91   : > { %v2268_v56 = vld [vmem:[%s4912_s8 + $0x1f8] sm:$0xff]  ;;  %v2213_v16 = vld [vmem:[%s4912_s8 + $0x40] sm:$0xff] }
 0xa92   : > { %v2005_v42 = vsel %vm511_vm8, %v3342_v41, %v3343_v1  ;;  %v2006_v51 = vsel %vm511_vm8, %v3343_v1, %v3342_v41  ;;  %v2245_v1 = vld [vmem:[%s4912_s8 + $0x140] sm:$0xff]  ;;  %v2234_v41 = vld [vmem:[%s4912_s8 + $0xe8] sm:$0xff] }
 0xa93   : > { %v2045_v60 = vrot.slane %v2006_v51, 4  ;;  %v2046_v26 = vrot.slane %v2005_v42, 4  ;;  %v2266_v42 = vld [vmem:[%s4912_s8 + $0x1e8] sm:$0xff]  ;;  %v2211_v51 = vld [vmem:[%s4912_s8 + $0x30] sm:$0xff] }
 0xa95   : > { %v2067_v43 = vsel %vm580_vm2, %v2000_v10, %v2045_v60  ;;  %v2068_v53 = vsel %vm580_vm2, %v1999_v15, %v2046_v26  ;;  %v2243_v60 = vld [vmem:[%s4912_s8 + $0x130] sm:$0xff]  ;;  %v2232_v26 = vld [vmem:[%s4912_s8 + $0xd8] sm:$0xff]  ;;  %v2230_v15 = vld [vmem:[%s4912_s8 + $0xc8] sm:$0xff] }
 0xa96   : > { %2101 = vmatpush.msrb.mxu0 %v2067_v43  ;;  %2121 = vmatpush.msrb.mxu1 %v2068_v53  ;;  %v2264_v10 = vld [vmem:[%s4912_s8 + $0x1d8] sm:$0xff]  ;;  %v2986_v43 = vld [vmem:[%s4909_s5 + $0x48] sm:$0xff] }
 0xa97   : > { %2982 = vmatmul.msk.f32.vlgmr.msrb.gmra.mxu0 %vm590_vm10, %v2980_v27  ;;  %2984 = vmatmul.msk.f32.vlgmr.msrb.gmra.mxu1 %vm590_vm10, %v2980_v27  ;;  %v2128_v28 = vpop.permute.xlu1 %2127  ;;  %v2262_v27 = vld [vmem:[%s4912_s8 + $0x1c8] sm:$0xff]  ;;  %v2228_v53 = vld [vmem:[%s4912_s8 + $0xb8] sm:$0xff] }
 0xa98   : > { %2269 = vmatpush.msra.mxu0 %v2235_v63  ;;  %2292 = vmatpush.msra.mxu1 %v2267_v11  ;;  %v2260_v63 = vld [vmem:[%s4912_s8 + $0x1b8] sm:$0xff]  ;;  %v2226_v11 = vld [vmem:[%s4912_s8 + $0xa8] sm:$0xff] }
 0xa9a   : > { %2270 = vmatpush.msra.mxu0 %v2233_v40  ;;  %2293 = vmatpush.msra.mxu1 %v2265_v57  ;;  %v2258_v40 = vld [vmem:[%s4912_s8 + $0x1a8] sm:$0xff]  ;;  %v2224_v57 = vld [vmem:[%s4912_s8 + $0x98] sm:$0xff] }
 0xa9c   : > { %2271 = vmatpush.msra.mxu0 %v2231_v8  ;;  %2294 = vmatpush.msra.mxu1 %v2263_v12  ;;  %v2256_v8 = vld [vmem:[%s4912_s8 + $0x198] sm:$0xff]  ;;  %v2222_v12 = vld [vmem:[%s4912_s8 + $0x88] sm:$0xff] }
 0xa9e   : > { %2272 = vmatpush.msra.mxu0 %v2229_v4  ;;  %2295 = vmatpush.msra.mxu1 %v2261_v0  ;;  %v2254_v4 = vld [vmem:[%s4912_s8 + $0x188] sm:$0xff]  ;;  %v2220_v0 = vld [vmem:[%s4912_s8 + $0x78] sm:$0xff] }
 0xaa0   : > { %2273 = vmatpush.msra.mxu0 %v2227_v47  ;;  %2296 = vmatpush.msra.mxu1 %v2259_v48  ;;  %v2252_v47 = vld [vmem:[%s4912_s8 + $0x178] sm:$0xff]  ;;  %v2218_v48 = vld [vmem:[%s4912_s8 + $0x68] sm:$0xff] }
 0xaa2   : > { %2274 = vmatpush.msra.mxu0 %v2225_v20  ;;  %2297 = vmatpush.msra.mxu1 %v2257_v23  ;;  %v2250_v20 = vld [vmem:[%s4912_s8 + $0x168] sm:$0xff]  ;;  %v2216_v23 = vld [vmem:[%s4912_s8 + $0x58] sm:$0xff] }
 0xaa4   : > { %2275 = vmatpush.msra.mxu0 %v2223_v2  ;;  %2298 = vmatpush.msra.mxu1 %v2255_v7  ;;  %v2248_v2 = vld [vmem:[%s4912_s8 + $0x158] sm:$0xff]  ;;  %v2214_v7 = vld [vmem:[%s4912_s8 + $0x48] sm:$0xff] }
 0xaa6   : > { %2276 = vmatpush.msra.mxu0 %v2221_v5  ;;  %2299 = vmatpush.msra.mxu1 %v2253_v24  ;;  %v2246_v5 = vld [vmem:[%s4912_s8 + $0x148] sm:$0xff]  ;;  %v2212_v24 = vld [vmem:[%s4912_s8 + $0x38] sm:$0xff] }
 0xaa8   : > { %2277 = vmatpush.msra.mxu0 %v2219_v22  ;;  %2300 = vmatpush.msra.mxu1 %v2251_v29  ;;  %v2209_v22 = vld [vmem:[%s4912_s8 + $0x20] sm:$0xff] }
 0xaa9   : > { %v2241_v29 = vld [vmem:[%s4912_s8 + $0x120] sm:$0xff] }
 0xaaa   : > { %2278 = vmatpush.msra.mxu0 %v2217_v35  ;;  %2301 = vmatpush.msra.mxu1 %v2249_v36  ;;  %v2239_v35 = vld [vmem:[%s4912_s8 + $0x110] sm:$0xff]  ;;  %v2208_v36 = vld [vmem:[%s4912_s8 + $0x18] sm:$0xff] }
 0xaac   : > { %2279 = vmatpush.msra.mxu0 %v2215_v44  ;;  %2302 = vmatpush.msra.mxu1 %v2247_v45  ;;  %v2237_v44 = vld [vmem:[%s4912_s8 + $0x100] sm:$0xff]  ;;  %v2206_v45 = vld [vmem:[%s4912_s8 + $0x8] sm:$0xff] }
 0xaae   : > { %2280 = vmatpush.msra.mxu0 %v2213_v16  ;;  %2303 = vmatpush.msra.mxu1 %v2245_v1 }
 0xab0   : > { %2281 = vmatpush.msra.mxu0 %v2211_v51  ;;  %2304 = vmatpush.msra.mxu1 %v2243_v60 }
 0xab2   : > { %2282 = vmatpush.msra.mxu0 %v2209_v22  ;;  %2305 = vmatpush.msra.mxu1 %v2241_v29 }
 0xab4   : > { %2306 = vmatpush.msra.mxu1 %v2239_v35 }
 0xab6   : > { %2307 = vmatpush.msra.mxu1 %v2237_v44 }
 0xb14   : > { %v2103_v31 = vpop.f32.mrf.mxu0  ;;  %v2123_v32 = vpop.f32.mrf.mxu1 }
 0xb15   : > { %v2130_v37 = vmul.f32 %v2128_v28, %v2103_v31  ;;  %v2131_v38 = vmul.f32 %v2128_v28, %v2123_v32  ;;  %v2244_v28 = vld [vmem:[%s4912_s8 + $0x138] sm:$0xff]  ;;  %v2242_v31 = vld [vmem:[%s4912_s8 + $0x128] sm:$0xff]  ;;  %v2207_v32 = vld [vmem:[%s4912_s8 + $0x10] sm:$0xff] }
 0xb16   : > { %2283 = vmatpush.msra.mxu0 %v2207_v32  ;;  %v2390_v32 = vld [vmem:[%s4910_s6 + $0x8] sm:$0xff] }
 0xb17   : > { %v2136_v50 = vadd.f32 %v2134_v61, %v2130_v37  ;;  %v2137_v3 = vadd.f32 %v2134_v61, %v2131_v38  ;;  %v2210_v61 = vld [vmem:[%s4912_s8 + $0x28] sm:$0xff]  ;;  %v2240_v37 = vld [vmem:[%s4912_s8 + $0x118] sm:$0xff]  ;;  %v2205_v38 = vld [vmem:[%s4912_s8] sm:$0xff] }
 0xb18   : > { %2284 = vmatpush.msra.mxu0 %v2205_v38 }
 0xb19   : > { %v2138_v62 = vmax.f32 %v2136_v50, 0.0  ;;  %v2139_v52 = vmax.f32 %v2137_v3, 0.0  ;;  %v2238_v50 = vld [vmem:[%s4912_s8 + $0x108] sm:$0xff] }
 0xb1b   : > { %2987 = vmatpush.msk.msra.mxu2 %vm580_vm2, %v2138_v62  ;;  %2990 = vmatpush.msk.msra.mxu3 %vm580_vm2, %v2139_v52 }
 0xb1c   : > { %2988 = vmatmul.msk.f32.vlgmr.msra.gmra.mxu2 %vm656_vm11, %v2985_v54  ;;  %2991 = vmatmul.msk.f32.vlgmr.msra.gmra.mxu3 %vm656_vm11, %v2985_v54 }
 0xb1d   : > { %2315 = vmatpush.msrb.mxu2 %v2236_v9  ;;  %2338 = vmatpush.msrb.mxu3 %v2268_v56 }
 0xb1f   : > { %2316 = vmatpush.msrb.mxu2 %v2234_v41  ;;  %2339 = vmatpush.msrb.mxu3 %v2266_v42 }
 0xb21   : > { %2317 = vmatpush.msrb.mxu2 %v2232_v26  ;;  %2340 = vmatpush.msrb.mxu3 %v2264_v10 }
 0xb23   : > { %2318 = vmatpush.msrb.mxu2 %v2230_v15  ;;  %2341 = vmatpush.msrb.mxu3 %v2262_v27  ;;  %v2363_v15 = vpop.permute.xlu1 %2362 }
 0xb24   : > { %2989 = vmatmul.msk.f32.gmra.mxu2 %vm656_vm11, %v2986_v43  ;;  %2992 = vmatmul.msk.f32.gmra.mxu3 %vm656_vm11, %v2986_v43 }
 0xb25   : > { %2319 = vmatpush.msrb.mxu2 %v2228_v53  ;;  %2342 = vmatpush.msrb.mxu3 %v2260_v63 }
 0xb27   : > { %2320 = vmatpush.msrb.mxu2 %v2226_v11  ;;  %2343 = vmatpush.msrb.mxu3 %v2258_v40  ;;  %v2367_v40 = vpop.permute.xlu0 %2366 }
 0xb29   : > { %2321 = vmatpush.msrb.mxu2 %v2224_v57  ;;  %2344 = vmatpush.msrb.mxu3 %v2256_v8  ;;  %v2379_v8 = vpop.permute.xlu2 %2378 }
 0xb2b   : > { %2322 = vmatpush.msrb.mxu2 %v2222_v12  ;;  %2345 = vmatpush.msrb.mxu3 %v2254_v4  ;;  %v2375_v57 = vpop.permute.xlu1 %2374 }
 0xb2d   : > { %2323 = vmatpush.msrb.mxu2 %v2220_v0  ;;  %2346 = vmatpush.msrb.mxu3 %v2252_v47 }
 0xb2f   : > { %2324 = vmatpush.msrb.mxu2 %v2218_v48  ;;  %2347 = vmatpush.msrb.mxu3 %v2250_v20 }
 0xb31   : > { %2325 = vmatpush.msrb.mxu2 %v2216_v23  ;;  %2348 = vmatpush.msrb.mxu3 %v2248_v2  ;;  %v2449_v35 = vpop.permute.xlu2 %2448 }
 0xb33   : > { %2326 = vmatpush.msrb.mxu2 %v2214_v7  ;;  %2349 = vmatpush.msrb.mxu3 %v2246_v5 }
 0xb35   : > { %2327 = vmatpush.msrb.mxu2 %v2212_v24  ;;  %2350 = vmatpush.msrb.mxu3 %v2244_v28  ;;  %v2389_v24 = vld [vmem:[%s4910_s6] sm:$0xff] }
 0xb37   : > { %2328 = vmatpush.msrb.mxu2 %v2210_v61  ;;  %2351 = vmatpush.msrb.mxu3 %v2242_v31 }
 0xb39   : > { %2329 = vmatpush.msrb.mxu2 %v2208_v36  ;;  %2352 = vmatpush.msrb.mxu3 %v2240_v37  ;;  %v2445_v37 = vpop.permute.xlu0 %2444 }
 0xb3b   : > { %2330 = vmatpush.msrb.mxu2 %v2206_v45  ;;  %2353 = vmatpush.msrb.mxu3 %v2238_v50  ;;  %v2457_v45 = vpop.permute.xlu2 %2456 }
 0xb9f   : > { %v2172_v3 = vpop.f32.mrf.mxu2  ;;  %v2195_v62 = vpop.f32.mrf.mxu3 }
 0xba0   : > { %v2173_v52 = vadd.f32 %v2172_v3, %v4417_v55  ;;  %v2196_v54 = vadd.f32 %v2195_v62, %v4420_v58  ;;  %v1285_v58 = vadd.f32 %v4285_v13, %v3805_v17  ;;  %v2461_v3 = vpop.permute.xlu1 %2460 }
 0xba2   : > { %v2201_v9 = vmul.f32 %v2173_v52, %v4306_v39  ;;  %v2202_v56 = vmul.f32 %v2196_v54, %v4313_v49  ;;  %v4747_v10 = vmul.f32 %v1285_v58, %v3576_v33 }
 0xba4   : > { %2285 = vmatmul.f32.vlgmr.msra.gmra.mxu0 %v2201_v9  ;;  %2308 = vmatmul.f32.vlgmr.msra.gmra.mxu1 %v2202_v56 }
 0xba5   : > { %2331 = vmatmul.f32.vlgmr.msrb.gmra.mxu2 %v2201_v9  ;;  %2354 = vmatmul.f32.vlgmr.msrb.gmra.mxu3 %v2202_v56 }
 0xba7   : > { %v2175_v16 = vpop.f32.mrf.mxu2  ;;  %v2198_v1 = vpop.f32.mrf.mxu3 }
 0xba8   : > { %v2176_v41 = vadd.f32 %v2175_v16, %v4427_v59  ;;  %v2199_v42 = vadd.f32 %v2198_v1, %v4430_v19  ;;  %v1288_v59 = vadd.f32 %v4291_v30, %v3815_v6  ;;  %v1311_v6 = vadd.f32 %v4293_v21, %v3818_v25 }
 0xbaa   : > { %v2203_v51 = vmul.f32 %v2176_v41, %v4306_v39  ;;  %v2204_v55 = vmul.f32 %v2199_v42, %v4313_v49  ;;  %v1308_v49 = vadd.f32 %v4287_v14, %v3808_v18  ;;  %v4755_v53 = vmul.f32 %v1288_v59, %v3576_v33  ;;  %v2997_v41 = vld [vmem:[%s4910_s6 + $0x10] sm:$0xff] }
 0xbab   : > { %v4765_v0 = vmul.f32 %v1311_v6, %v3578_v34  ;;  %v3456_v6 = vmov 20  }
 0xbac   : > { %2288 = vmatmul.f32.gmra.mxu0 %v2203_v51  ;;  %2311 = vmatmul.f32.gmra.mxu1 %v2204_v55  ;;  %v4758_v17 = vmul.f32 %v1308_v49, %v3578_v34 }
 0xbad   : > { %2334 = vmatmul.f32.gmra.mxu2 %v2203_v51  ;;  %2357 = vmatmul.f32.gmra.mxu3 %v2204_v55 }
 0xbae   : > { %3368 = vset.pattern.permute.xlu2 %v3456_v6 }
 0xc21   : > { %v2286_v60 = vpop.f32.mrf.mxu0  ;;  %v2309_v26 = vpop.f32.mrf.mxu1 }
 0xc22   : > { %v2287_v39 = vadd.f32 %v2286_v60, %v4747_v10 }
 0xc24   : > { %v2310_v19 = vadd.f32 %v2309_v26, %v2287_v39  ;;  %v2998_v26 = vld [vmem:[%s4910_s6 + $0x18] sm:$0xff] }
 0xc26   : > { %v2369_v18 = vmul.f32 %v2363_v15, %v2310_v19 }
 0xc28   : > { %v2332_v27 = vpop.f32.mrf.mxu2  ;;  %v2355_v43 = vpop.f32.mrf.mxu3  ;;  %v2381_v47 = vadd.f32 %v2375_v57, %v2369_v18 }
 0xc29   : > { %v2289_v13 = vpop.f32.mrf.mxu0  ;;  %v2333_v30 = vadd.f32 %v2332_v27, %v4758_v17  ;;  %v2312_v11 = vpop.f32.mrf.mxu1 }
 0xc2a   : > { %v2290_v63 = vadd.f32 %v2289_v13, %v4755_v53  ;;  %v2385_v5 = vmax.f32 %v2381_v47, 0.0 }
 0xc2b   : > { %v2356_v4 = vadd.f32 %v2355_v43, %v2333_v30 }
 0xc2c   : > { %v2313_v14 = vadd.f32 %v2312_v11, %v2290_v63  ;;  %v3455_v63 = vmov 21   ;;  %v4791_v11 = vld [vmem:[%s4906_s2] sm:$0xf] }
 0xc2d   : > { %v2370_v21 = vmul.f32 %v2363_v15, %v2356_v4  ;;  %3369 = vset.pattern.permute.xlu1 %v3455_v63  ;;  %2624 = vperm.xlu2 %3368, %v4791_v11  }
 0xc2e   : > { %v2371_v12 = vmul.f32 %v2367_v40, %v2313_v14  ;;  %2630 = vperm.xlu1 %3369, %v4791_v11  }
 0xc2f   : > { %v2382_v29 = vadd.f32 %v2375_v57, %v2370_v21 }
 0xc30   : > { %v2383_v48 = vadd.f32 %v2379_v8, %v2371_v12  ;;  %v2335_v20 = vpop.f32.mrf.mxu2  ;;  %v2358_v25 = vpop.f32.mrf.mxu3 }
 0xc31   : > { %v2336_v23 = vadd.f32 %v2335_v20, %v4765_v0  ;;  %v2386_v31 = vmax.f32 %v2382_v29, 0.0  ;;  %v2568_v29 = vpop.permute.xlu0 %2567 }
 0xc32   : > { %v2387_v2 = vmax.f32 %v2383_v48, 0.0 }
 0xc33   : > { %v2359_v7 = vadd.f32 %v2358_v25, %v2336_v23 }
 0xc34   : > { %2411 = vmatpush.msrb.mxu0 %v2387_v2  ;;  %v2552_v2 = vpop.permute.xlu2 %2551 }
 0xc35   : > { %v2372_v28 = vmul.f32 %v2367_v40, %v2359_v7  ;;  %v2556_v40 = vpop.permute.xlu1 %2555 }
 0xc36   : > { %2412 = vmatpush.msrb.mxu0 %v2385_v5 }
 0xc37   : > { %v2384_v22 = vadd.f32 %v2379_v8, %v2372_v28  ;;  %2993 = vmatmul.msk.f32.vlgmr.msrb.gmra.mxu0 %vm436_vm0, %v2389_v24 }
 0xc39   : > { %v2388_v61 = vmax.f32 %v2384_v22, 0.0 }
 0xc3b   : > { %2434 = vmatpush.msrb.mxu1 %v2388_v61 }
 0xc3d   : > { %2435 = vmatpush.msrb.mxu1 %v2386_v31  ;;  %v2564_v22 = vpop.permute.xlu1 %2563 }
 0xc3e   : > { %2995 = vmatmul.msk.f32.vlgmr.msrb.gmra.mxu1 %vm436_vm0, %v2389_v24 }
 0xc3f   : > { %2994 = vmatmul.msk.f32.gmra.mxu0 %vm436_vm0, %v2390_v32 }
 0xc46   : > { %2996 = vmatmul.msk.f32.gmra.mxu1 %vm436_vm0, %v2390_v32 }
 0xcb4   : > { %v2414_v36 = vpop.f32.mrf.mxu0 }
 0xcb5   : > { %v2451_v38 = vmul.f32 %v2445_v37, %v2414_v36 }
 0xcb7   : > { %v2463_v52 = vadd.f32 %v2457_v45, %v2451_v38 }
 0xcb9   : > { %v2467_v16 = vmax.f32 %v2463_v52, 0.0 }
 0xcbb   : > { %v2437_v44 = vpop.f32.mrf.mxu1 }
 0xcbc   : > { %v2417_v50 = vpop.f32.mrf.mxu0  ;;  %v2452_v56 = vmul.f32 %v2445_v37, %v2437_v44 }
 0xcbd   : > { %v2453_v62 = vmul.f32 %v2449_v35, %v2417_v50 }
 0xcbe   : > { %v2464_v51 = vadd.f32 %v2457_v45, %v2452_v56  ;;  %v3003_v45 = vld [vmem:[%s4907_s3 + $0x14] sm:$0xf] }
 0xcbf   : > { %v2465_v54 = vadd.f32 %v2461_v3, %v2453_v62 }
 0xcc0   : > { %v2468_v60 = vmax.f32 %v2464_v51, 0.0 }
 0xcc1   : > { %v2469_v9 = vmax.f32 %v2465_v54, 0.0 }
 0xcc3   : > { %v2440_v1 = vpop.f32.mrf.mxu1  ;;  %2494 = vmatpush.msra.mxu2 %v2469_v9  ;;  %v2631_v9 = vpop.permute.xlu1 %2630 }
 0xcc4   : > { %v2454_v42 = vmul.f32 %v2449_v35, %v2440_v1 }
 0xcc5   : > { %2495 = vmatpush.msra.mxu2 %v2467_v16 }
 0xcc6   : > { %v2466_v55 = vadd.f32 %v2461_v3, %v2454_v42  ;;  %2999 = vmatmul.msk.f32.vlgmr.msra.gmra.mxu2 %vm436_vm0, %v2997_v41 }
 0xcc8   : > { %v2470_v58 = vmax.f32 %v2466_v55, 0.0 }
 0xcca   : > { %2517 = vmatpush.msra.mxu3 %v2470_v58 }
 0xccc   : > { %2518 = vmatpush.msra.mxu3 %v2468_v60 }
 0xccd   : > { %3001 = vmatmul.msk.f32.vlgmr.msra.gmra.mxu3 %vm436_vm0, %v2997_v41 }
 0xcce   : > { %3000 = vmatmul.msk.f32.gmra.mxu2 %vm436_vm0, %v2998_v26 }
 0xcd5   : > { %3002 = vmatmul.msk.f32.gmra.mxu3 %vm436_vm0, %v2998_v26 }
 0xd49   : > { %v2497_v15 = vpop.f32.mrf.mxu2 }
 0xd4a   : > { %v2526_v59 = vmul.f32 0.5, %v2497_v15 }
 0xd4c   : > { %3407 = vtanh.f32 %v2526_v59  ;;  %v3457_v59 = vmov 23  }
 0xd4d   : > { %3406 = vset.pattern.permute.xlu0 %v3457_v59 }
 0xd50   : > { %v2520_v39 = vpop.f32.mrf.mxu3 }
 0xd51   : > { %v2527_v49 = vmul.f32 0.5, %v2520_v39  ;;  %v2500_v19 = vpop.f32.mrf.mxu2  ;;  %v3458_v39 = vmov 22  }
 0xd52   : > { %v3408_v27 = vpop.eup %3407  ;;  %v2528_v43 = vmul.f32 0.5, %v2500_v19  ;;  %3405 = vset.pattern.permute.xlu2 %v3458_v39 }
 0xd53   : > { %v2534_v13 = vadd.f32 1.0, %v3408_v27  ;;  %3409 = vtanh.f32 %v2527_v49 }
 0xd54   : > { %3411 = vtanh.f32 %v2528_v43 }
 0xd55   : > { %v2538_v30 = vmul.f32 0.5, %v2534_v13 }
 0xd57   : > { %v2542_v57 = vadd.f32 1.0, %v2538_v30 }
 0xd58   : > { %v2523_v18 = vpop.f32.mrf.mxu3 }
 0xd59   : > { %v3410_v14 = vpop.eup %3409  ;;  %v2529_v8 = vmul.f32 0.5, %v2523_v18  ;;  %v4796_v23 = vmul.f32 %v2542_v57, %v4747_v10 }
 0xd5a   : > { %v3412_v12 = vpop.eup %3411  ;;  %v2535_v4 = vadd.f32 1.0, %v3410_v14 }
 0xd5b   : > { %v2536_v47 = vadd.f32 1.0, %v3412_v12  ;;  %3413 = vtanh.f32 %v2529_v8  ;;  %v2558_v24 = vmul.f32 %v2552_v2, %v4796_v23 }
 0xd5c   : > { %v2539_v48 = vmul.f32 0.5, %v2535_v4 }
 0xd5d   : > { %v2540_v20 = vmul.f32 0.5, %v2536_v47  ;;  %v2570_v10 = vadd.f32 %v2564_v22, %v2558_v24 }
 0xd5e   : > { %v2543_v21 = vadd.f32 1.0, %v2539_v48 }
 0xd5f   : > { %v2544_v25 = vadd.f32 1.0, %v2540_v20  ;;  %v2574_v44 = vmax.f32 %v2570_v10, 0.0 }
 0xd60   : > { %v4804_v32 = vmul.f32 %v2543_v21, %v4758_v17 }
 0xd61   : > { %v3414_v7 = vpop.eup %3413  ;;  %v4799_v5 = vmul.f32 %v2544_v25, %v4755_v53 }
 0xd62   : > { %v2537_v28 = vadd.f32 1.0, %v3414_v7  ;;  %v2559_v38 = vmul.f32 %v2552_v2, %v4804_v32 }
 0xd63   : > { %v2560_v61 = vmul.f32 %v2556_v40, %v4799_v5 }
 0xd64   : > { %v2541_v31 = vmul.f32 0.5, %v2537_v28  ;;  %v2571_v17 = vadd.f32 %v2564_v22, %v2559_v38 }
 0xd65   : > { %v2572_v35 = vadd.f32 %v2568_v29, %v2560_v61 }
 0xd66   : > { %v2545_v36 = vadd.f32 1.0, %v2541_v31  ;;  %v2575_v52 = vmax.f32 %v2571_v17, 0.0 }
 0xd67   : > { %v2576_v37 = vmax.f32 %v2572_v35, 0.0 }
 0xd68   : > { %v4808_v53 = vmul.f32 %v2545_v36, %v4765_v0  ;;  %v2625_v0 = vpop.permute.xlu2 %2624 }
 0xd69   : > { %2597 = vmatpush.msra.mxu0 %v2576_v37 }
 0xd6a   : > { %v2561_v50 = vmul.f32 %v2556_v40, %v4808_v53 }
 0xd6b   : > { %2598 = vmatpush.msra.mxu0 %v2574_v44 }
 0xd6c   : > { %v2573_v3 = vadd.f32 %v2568_v29, %v2561_v50  ;;  %3004 = vmatmul.msk.f32.vlgmr.msra.gmra.mxu0 %vm436_vm0, %v3003_v45 }
 0xd6e   : > { %v2577_v62 = vmax.f32 %v2573_v3, 0.0 }
 0xd70   : > { %2617 = vmatpush.msra.mxu1 %v2577_v62 }
 0xd72   : > { %2618 = vmatpush.msra.mxu1 %v2575_v52 }
 0xd73   : > { %3005 = vmatmul.msk.f32.vlgmr.msra.gmra.mxu1 %vm436_vm0, %v3003_v45 }
 0xde9   : > { %v2600_v54 = vpop.f32.mrf.mxu0 }
 0xdea   : > { %v2627_v56 = vmul.f32 %v2625_v0, %v2600_v54 }
 0xdec   : > { %v2633_v16 = vadd.f32 %v2631_v9, %v2627_v56 }
 0xdee   : > { %v2635_v1 = vmax.f32 %v2633_v16, 0.0 }
 0xdf0   : > { %v2637_v41 = vmul.f32 %v2635_v1, %v3576_v33  ;;  %v2620_v42 = vpop.f32.mrf.mxu1 }
 0xdf1   : > { %v2628_v51 = vmul.f32 %v2625_v0, %v2620_v42 }
 0xdf2   : > { %2681 = vrot.lane.b32.xlu0 %v2637_v41, %s3429_s14 }
 0xdf3   : > { %v2634_v55 = vadd.f32 %v2631_v9, %v2628_v51 }
 0xdf5   : > { %v2636_v58 = vmax.f32 %v2634_v55, 0.0 }
 0xdf7   : > { %v2638_v60 = vmul.f32 %v2636_v58, %v3578_v34 }
 0xdf9   : > { %2683 = vrot.lane.b32.xlu1 %v2638_v60, %s3429_s14  ;;  %v3370_v26 = vpack.i.bf16 %v2638_v60, %v2637_v41 }
 0xdfb   : > { %3371 = vrot.lane.b32.xlu2 %v3370_v26, %s3430_s15  ;;  %3381 = vrot.lane.b32.xlu0 %v3370_v26, %s3432_s19 }
 0xe01   : > { %3386 = vrot.lane.b32.xlu1 %v3370_v26, %s3431_s16 }
 0xe03   : > { %3376 = vrot.lane.b32.xlu2 %v3370_v26, %s3433_s20  ;;  %3396 = vrot.lane.b32.xlu0 %v3370_v26, %s3435_s22 }
 0xe09   : > { %3401 = vrot.lane.b32.xlu1 %v3370_v26, %s4921_s23 }
 0xe0b   : > { %3391 = vrot.lane.b32.xlu2 %v3370_v26, %s4920_s25  ;;  %2777 = vperm.xlu0 %3406, %v4791_v11   ;;  %s4922_s25 = sshll.u32 %s4924_s18, 5 }
 0xe0c   : > { %s386_s27 = scalar_lea.vmem %s4915_s11, %s4922_s25 }
 0xe13   : > { %2771 = vperm.xlu2 %3405, %v4791_v11  }
 0xe55   : > { %v3372_v15 = vpop.permute.xlu2 %3371 }
 0xe56   : > { %v3374_v27 = vunpack.i.h.bf16 %v3372_v15  ;;  %v3373_v43 = vunpack.i.l.bf16 %v3372_v15 }
 0xe58   : > { %v2679_v6 = vsel %vm546_vm3, %v3373_v43, %v3374_v27  ;;  %v2680_v30 = vsel %vm546_vm3, %v3374_v27, %v3373_v43 }
 0xe59   : > { %v2707_v47 = vrot.slane %v2679_v6, 4  ;;  %v2708_v48 = vrot.slane %v2680_v30, 4  ;;  %v3011_v30 = vld [vmem:[%s4909_s5 + $0x50] sm:$0xff] }
 0xe5d   : > { %v3377_v19 = vpop.permute.xlu2 %3376 }
 0xe5e   : > { %v3379_v13 = vunpack.i.h.bf16 %v3377_v19  ;;  %v3378_v63 = vunpack.i.l.bf16 %v3377_v19 }
 0xe60   : > { %v2667_v18 = vsel %vm532_vm5, %v3378_v63, %v3379_v13  ;;  %v2668_v14 = vsel %vm532_vm5, %v3379_v13, %v3378_v63 }
 0xe61   : > { %v2701_v20 = vrot.slane %v2667_v18, 4  ;;  %v2702_v2 = vrot.slane %v2668_v14, 4 }
 0xe63   : > { %v2715_v29 = vsel %vm580_vm2, %v2637_v41, %v2701_v20  ;;  %v2716_v61 = vsel %vm580_vm2, %v2638_v60, %v2702_v2  ;;  %v3006_v60 = vld [vmem:[%s4908_s4 + $0x14] sm:$0xf] }
 0xe64   : > { %v2682_v49 = vpop.permute.xlu0 %2681 }
 0xe65   : > { %v3392_v28 = vpop.permute.xlu2 %3391 }
 0xe66   : > { %v3394_v35 = vunpack.i.h.bf16 %v3392_v28  ;;  %v3393_v36 = vunpack.i.l.bf16 %v3392_v28 }
 0xe68   : > { %v2649_v9 = vsel %vm511_vm8, %v3393_v36, %v3394_v35  ;;  %v2650_v56 = vsel %vm511_vm8, %v3394_v35, %v3393_v36 }
 0xe69   : > { %v2689_v42 = vrot.slane %v2650_v56, 4  ;;  %v2690_v51 = vrot.slane %v2649_v9, 4 }
 0xe6b   : > { %v2684_v40 = vpop.permute.xlu1 %2683 }
 0xe6c   : > { %v2685_v11 = vsel %vm553_vm1, %v2682_v49, %v2684_v40  ;;  %v2686_v57 = vsel %vm553_vm1, %v2684_v40, %v2682_v49  ;;  %v3012_v40 = vld [vmem:[%s4909_s5 + $0x58] sm:$0xff] }
 0xe6d   : > { %v3382_v8 = vpop.permute.xlu0 %3381  ;;  %3007 = vmatpush.msk.msrb.mxu2 %vm580_vm2, %v2685_v11  ;;  %3009 = vmatpush.msk.msrb.mxu3 %vm580_vm2, %v2686_v57  ;;  %v2772_v59 = vpop.permute.xlu2 %2771 }
 0xe6e   : > { %v3384_v12 = vunpack.i.h.bf16 %v3382_v8  ;;  %v3383_v4 = vunpack.i.l.bf16 %v3382_v8 }
 0xe70   : > { %v2673_v25 = vsel %vm539_vm4, %v3383_v4, %v3384_v12  ;;  %v2674_v21 = vsel %vm539_vm4, %v3384_v12, %v3383_v4 }
 0xe71   : > { %v2717_v7 = vsel %vm580_vm2, %v2673_v25, %v2707_v47  ;;  %v2718_v24 = vsel %vm580_vm2, %v2674_v21, %v2708_v48 }
 0xe72   : > { %2742 = vmatpush.msrb.mxu2 %v2717_v7  ;;  %2762 = vmatpush.msrb.mxu3 %v2718_v24 }
 0xe73   : > { %v3387_v22 = vpop.permute.xlu1 %3386 }
 0xe74   : > { %v3389_v31 = vunpack.i.h.bf16 %v3387_v22  ;;  %v3388_v10 = vunpack.i.l.bf16 %v3387_v22  ;;  %2743 = vmatpush.msrb.mxu2 %v2715_v29  ;;  %2763 = vmatpush.msrb.mxu3 %v2716_v61 }
 0xe75   : > { %v3397_v37 = vpop.permute.xlu0 %3396 }
 0xe76   : > { %v2661_v38 = vsel %vm525_vm6, %v3388_v10, %v3389_v31  ;;  %v2662_v44 = vsel %vm525_vm6, %v3389_v31, %v3388_v10  ;;  %v3399_v45 = vunpack.i.h.bf16 %v3397_v37  ;;  %v3398_v50 = vunpack.i.l.bf16 %v3397_v37 }
 0xe77   : > { %v2695_v17 = vrot.slane %v2662_v44, 4  ;;  %v2696_v3 = vrot.slane %v2661_v38, 4 }
 0xe78   : > { %v2656_v62 = vsel %vm518_vm7, %v3399_v45, %v3398_v50  ;;  %v2655_v52 = vsel %vm518_vm7, %v3398_v50, %v3399_v45 }
 0xe79   : > { %v2713_v0 = vsel %vm580_vm2, %v2656_v62, %v2695_v17  ;;  %v2714_v54 = vsel %vm580_vm2, %v2655_v52, %v2696_v3 }
 0xe7a   : > { %2744 = vmatpush.msrb.mxu2 %v2713_v0  ;;  %2764 = vmatpush.msrb.mxu3 %v2714_v54 }
 0xe7b   : > { %v3402_v16 = vpop.permute.xlu1 %3401 }
 0xe7c   : > { %v3404_v1 = vunpack.i.h.bf16 %v3402_v16  ;;  %v3403_v41 = vunpack.i.l.bf16 %v3402_v16 }
 0xe7d   : > { %v2778_v39 = vpop.permute.xlu0 %2777 }
 0xe7e   : > { %v2644_v55 = vsel %vm504_vm9, %v3404_v1, %v3403_v41  ;;  %v2643_v58 = vsel %vm504_vm9, %v3403_v41, %v3404_v1 }
 0xe7f   : > { %v2711_v26 = vsel %vm580_vm2, %v2644_v55, %v2689_v42  ;;  %v2712_v15 = vsel %vm580_vm2, %v2643_v58, %v2690_v51 }
 0xe80   : > { %2745 = vmatpush.msrb.mxu2 %v2711_v26  ;;  %2765 = vmatpush.msrb.mxu3 %v2712_v15 }
 0xe81   : > { %3008 = vmatmul.msk.f32.vlgmr.msrb.gmra.mxu2 %vm590_vm10, %v3006_v60  ;;  %3010 = vmatmul.msk.f32.vlgmr.msrb.gmra.mxu3 %vm590_vm10, %v3006_v60 }
 0xf04   : > { %v2747_v49 = vpop.f32.mrf.mxu2  ;;  %v2767_v19 = vpop.f32.mrf.mxu3 }
 0xf05   : > { %v2774_v46 = vmul.f32 %v2772_v59, %v2747_v49  ;;  %v2775_v27 = vmul.f32 %v2772_v59, %v2767_v19 }
 0xf07   : > { %v2780_v43 = vadd.f32 %v2778_v39, %v2774_v46  ;;  %v2781_v13 = vadd.f32 %v2778_v39, %v2775_v27 }
 0xf09   : > { %v2782_v63 = vmax.f32 %v2780_v43, 0.0  ;;  %v2783_v6 = vmax.f32 %v2781_v13, 0.0 }
 0xf0b   : > { %3013 = vmatpush.msk.msrb.mxu0 %vm580_vm2, %v2782_v63  ;;  %3016 = vmatpush.msk.msrb.mxu1 %vm580_vm2, %v2783_v6 }
 0xf0c   : > { %3014 = vmatmul.msk.f32.vlgmr.msrb.gmra.mxu0 %vm656_vm11, %v3011_v30  ;;  %3017 = vmatmul.msk.f32.vlgmr.msrb.gmra.mxu1 %vm656_vm11, %v3011_v30 }
 0xf14   : > { %3015 = vmatmul.msk.f32.gmra.mxu0 %vm656_vm11, %v3012_v40  ;;  %3018 = vmatmul.msk.f32.gmra.mxu1 %vm656_vm11, %v3012_v40 }
 0xf89   : > { %v2816_v18 = vpop.f32.mrf.mxu0  ;;  %v2839_v14 = vpop.f32.mrf.mxu1 }
 0xf8a   : > { %v2817_v11 = vadd.f32 %v2816_v18, %v4796_v23  ;;  %v2840_v57 = vadd.f32 %v2839_v14, %v4804_v32 }
 0xf8c   : > { %v2845_v8 = vmul.f32 %v2817_v11, %v3576_v33  ;;  %v2846_v12 = vmul.f32 %v2840_v57, %v3578_v34 }
 0xf8e   : > { %2849 = vst [vmem:[%s386_s27] sm:$0xff] %v2845_v8 }
 0xf8f   : > { %2850 = vst [vmem:[%s386_s27 + $0x8] sm:$0xff] %v2846_v12 }
 0xf91   : > { %v2819_v4 = vpop.f32.mrf.mxu0  ;;  %v2842_v47 = vpop.f32.mrf.mxu1 }
 0xf92   : > { %v2820_v48 = vadd.f32 %v2819_v4, %v4799_v5  ;;  %v2843_v20 = vadd.f32 %v2842_v47, %v4808_v53 }
 0xf94   : > { %v2847_v23 = vmul.f32 %v2820_v48, %v3576_v33  ;;  %v2848_v32 = vmul.f32 %v2843_v20, %v3578_v34 }
 0xf96   : > { %2851 = vst [vmem:[%s386_s27 + $0x10] sm:$0xff] %v2847_v23 }
 0xf97   : > { %2852 = vst [vmem:[%s386_s27 + $0x18] sm:$0xff] %v2848_v32 }
 0xf98 PF: > { %s21_s17 = sadd.s32 1, %s3425_s17  }
 0xf99   : > { %p18_p4 = scmp.ge.s32.totalorder %s21_s17, 4  }
 0xf9b   :  { %20 = sbr.rel (!%p18_p4) target bundleno = 1 (0x1), region = 110 }

</bundles_post_ra>
